<compile_context>
chip_gen: v5e
topology: v5e:2x2
jax: 0.10.0
libtpu: 0.0.40
codegen_flags: <defaults>
</compile_context>

<pallas_src>
import functools

import jax
import jax.numpy as jnp
import numpy as np
from jax.experimental import pallas as pl
from jax.experimental.pallas import tpu as pltpu


# ----------------------------------------------------------------------------
# Static helpers (built once in the wrapper)
# ----------------------------------------------------------------------------
def _make_tap_masks(H, W):
    """mask[t] (1, HW): 1 where the source pixel of conv tap t=(ky*3+kx) is
    inside the image for that destination position, 0 where the zero padding
    would be read (also kills the row-wrap of the flattened horizontal roll)."""
    HW = H * W
    yy, xx = np.divmod(np.arange(HW), W)
    masks = np.zeros((9, 1, HW), np.float32)
    for ky in range(3):
        for kx in range(3):
            sy = yy + ky - 1
            sx = xx + kx - 1
            masks[ky * 3 + kx, 0] = (
                (sy >= 0) & (sy < H) & (sx >= 0) & (sx < W)).astype(np.float32)
    return masks


def _make_group_matrices(C, groups):
    """One-hot group membership M (groups, C) and its transpose (C, groups)."""
    gidx = np.arange(C) // (C // groups)
    M = (np.arange(groups)[:, None] == gidx[None, :]).astype(np.float32)
    return jnp.asarray(M), jnp.asarray(M.T)


# ----------------------------------------------------------------------------
# Fused ResnetBlock kernel (one batch element per grid step)
# ----------------------------------------------------------------------------
def _resnet_block_kernel(x_ref, w1_ref, b1_ref, g1_ref, be1_ref,
                         w2_ref, b2_ref, g2_ref, be2_ref,
                         wr_ref, br_ref, m_ref, mt_ref, mask_ref,
                         *rest, H, W, group_size_hw, apply_scale_shift, gn_eps):
    if apply_scale_shift:
        scale_ref, shift_ref, o_ref = rest
    else:
        (o_ref,) = rest

    f32 = jnp.float32
    md = w1_ref.dtype                                     # matmul operand dtype
    HW = H * W
    x = x_ref[0]                                          # (C_in, HW), dtype md

    # per-tap flat-index offsets for a 3x3 / padding=1 conv on row-major (H, W)
    offsets = [(ky - 1) * W + (kx - 1) for ky in range(3) for kx in range(3)]

    def conv3x3(inp, w_packed_ref, b_col):                # inp (C, HW) in md
        parts = []
        for t, off in enumerate(offsets):
            if off == 0:                                  # centre tap: mask is all-ones
                parts.append(inp)
            else:
                # xs[c, k] = inp[c, k + off] (valid positions); roll uses XLU.
                xs = pltpu.roll(inp, shift=(-off) % HW, axis=1)
                parts.append(xs * mask_ref[t])            # zero the padded taps
        x9 = jnp.concatenate(parts, axis=0)               # (9*C, HW)
        return jnp.dot(w_packed_ref[...], x9,
                       preferred_element_type=f32) + b_col  # (C_out, HW) f32

    def group_norm(h, gamma, beta):                       # h (C_out, HW) f32
        ch_sum = jnp.sum(h, axis=1, keepdims=True)                              # (C, 1)
        g_mean = jnp.dot(m_ref[...], ch_sum, preferred_element_type=f32) / group_size_hw
        ch_mean = jnp.dot(mt_ref[...], g_mean, preferred_element_type=f32)      # broadcast
        d = h - ch_mean
        ch_ss = jnp.sum(d * d, axis=1, keepdims=True)
        g_var = jnp.dot(m_ref[...], ch_ss, preferred_element_type=f32) / group_size_hw
        ch_rstd = jnp.dot(mt_ref[...], jax.lax.rsqrt(g_var + gn_eps),
                          preferred_element_type=f32)
        return d * ch_rstd * gamma + beta

    # block1: WS-conv3x3 + GroupNorm (no SiLU: Block returns early for no_act=False)
    h = group_norm(conv3x3(x, w1_ref, b1_ref[...]), g1_ref[...], be1_ref[...])
    # block2: WS-conv3x3 + GroupNorm + (scale + 1, shift) modulation
    h2 = group_norm(conv3x3(h.astype(md), w2_ref, b2_ref[...]),
                    g2_ref[...], be2_ref[...])
    if apply_scale_shift:
        h2 = h2 * (scale_ref[0] + 1.0) + shift_ref[0]
    # residual: 1x1 conv (identity weights if dim == dim_out)
    res = jnp.dot(wr_ref[...], x, preferred_element_type=f32) + br_ref[...]
    o_ref[0] = h2 + res


# ----------------------------------------------------------------------------
# Wrapper
# ----------------------------------------------------------------------------
def resnet_block_forward(x, time_emb, params, *, groups=8,
                         matmul_dtype=jnp.bfloat16):
    """x: (B, C_in, H, W); time_emb: (B, time_emb_dim) or None."""
    B, C_in, H, W = x.shape
    C_out = params["w1"].shape[0]
    HW = H * W
    assert C_out % groups == 0
    md = matmul_dtype

    x_flat = x.reshape(B, C_in, HW).astype(md)            # free contiguous reshape

    # Weight standardization + (O,I,3,3)->(O, 9*I) packing hoisted out of the
    # kernel (grid-invariant).  Statistics computed in f32, exact.
    def ws_pack(w):
        w = w.astype(jnp.float32)
        O, I = w.shape[0], w.shape[1]
        wf = w.reshape(O, -1)
        mean = jnp.mean(wf, axis=1)
        var = jnp.mean((wf - mean[:, None]) ** 2, axis=1)              # unbiased=False
        ws = (w - mean.reshape(-1, 1, 1, 1)) * jax.lax.rsqrt(var + 1e-5).reshape(-1, 1, 1, 1)
        # pack so column index = (ky*3 + kx) * I + c  (matches in-kernel tap stacking)
        return jnp.transpose(ws, (0, 2, 3, 1)).reshape(O, 9 * I).astype(md)

    w1p = ws_pack(params["w1"])
    w2p = ws_pack(params["w2"])

    if "wr" in params:                                    # res_conv = Conv2d(dim, dim_out, 1)
        wr = params["wr"].reshape(C_out, C_in).astype(md)
        br = params["br"]
    else:                                                 # res_conv = Identity (dim == dim_out)
        wr = jnp.eye(C_out, dtype=md)
        br = jnp.zeros((C_out,), jnp.float32)

    # t_emb_layers = SiLU -> Linear(time_emb_dim, 2*dim_out): tiny, left to XLA.
    apply_ss = time_emb is not None
    if apply_ss:
        t = jax.nn.silu(time_emb.astype(jnp.float32)) @ params["wt"].T + params["bt"]
        scale = t[:, :C_out].reshape(B, C_out, 1).astype(jnp.float32)
        shift = t[:, C_out:].reshape(B, C_out, 1).astype(jnp.float32)

    masks = jnp.asarray(_make_tap_masks(H, W)).astype(md)   # (9, 1, HW), 0/1 exact in bf16
    M, MT = _make_group_matrices(C_out, groups)
    col = lambda v: v.reshape(-1, 1).astype(jnp.float32)

    def resident(shape):                                  # constant-index, fully resident block
        return pl.BlockSpec(shape, lambda n: (0,) * len(shape))

    kernel = functools.partial(
        _resnet_block_kernel,
        H=H, W=W,
        group_size_hw=float((C_out // groups) * HW),
        apply_scale_shift=apply_ss, gn_eps=1e-5)

    in_specs = [
        pl.BlockSpec((1, C_in, HW), lambda n: (n, 0, 0)),   # x (per batch element)
        resident((C_out, 9 * C_in)),                        # conv1 packed WS weights
        resident((C_out, 1)),                               # conv1 bias
        resident((C_out, 1)),                               # GN1 gamma
        resident((C_out, 1)),                               # GN1 beta
        resident((C_out, 9 * C_out)),                       # conv2 packed WS weights
        resident((C_out, 1)),                               # conv2 bias
        resident((C_out, 1)),                               # GN2 gamma
        resident((C_out, 1)),                               # GN2 beta
        resident((C_out, C_in)),                            # 1x1 residual conv weight
        resident((C_out, 1)),                               # 1x1 residual conv bias
        resident((groups, C_out)),                          # group one-hot
        resident((C_out, groups)),                          # group one-hot transpose
        resident((9, 1, HW)),                               # per-tap boundary masks
    ]
    args = [x_flat, w1p, col(params["b1"]), col(params["gn1_g"]), col(params["gn1_b"]),
            w2p, col(params["b2"]), col(params["gn2_g"]), col(params["gn2_b"]),
            wr, col(br), M, MT, masks]
    if apply_ss:                                          # only DMA scale/shift when used
        in_specs += [pl.BlockSpec((1, C_out, 1), lambda n: (n, 0, 0)),
                     pl.BlockSpec((1, C_out, 1), lambda n: (n, 0, 0))]
        args += [scale, shift]

    # Resident set + per-step blocks are well under 1 MiB now (no shift
    # matrices), so default scoped-VMEM limits / double-buffering are fine on
    # v5e, v6e and v7x alike.
    out = pl.pallas_call(
        kernel,
        out_shape=jax.ShapeDtypeStruct((B, C_out, HW), jnp.float32),
        grid=(B,),
        in_specs=in_specs,
        out_specs=pl.BlockSpec((1, C_out, HW), lambda n: (n, 0, 0)),
        compiler_params=pltpu.CompilerParams(
            dimension_semantics=("parallel",)),
    )(*args)

    return out.reshape(B, C_out, H, W)                    # free contiguous reshape


# ----------------------------------------------------------------------------
# Pure-JAX reference (mirrors the PyTorch forward semantics, f32 / HIGHEST)
# ----------------------------------------------------------------------------
def resnet_block_reference(x, time_emb, params, *, groups=8):
    eps = 1e-5
    HIGH = jax.lax.Precision.HIGHEST
    C_out = params["w1"].shape[0]

    def ws_conv3x3(v, w, b):
        wf = w.reshape(w.shape[0], -1)
        mean = jnp.mean(wf, axis=1)
        var = jnp.mean((wf - mean[:, None]) ** 2, axis=1)          # unbiased=False
        ws = (w - mean.reshape(-1, 1, 1, 1)) * jax.lax.rsqrt(var + eps).reshape(-1, 1, 1, 1)
        out = jax.lax.conv_general_dilated(
            v, ws, window_strides=(1, 1), padding="SAME",
            dimension_numbers=("NCHW", "OIHW", "NCHW"), precision=HIGH)
        return out + b.reshape(1, -1, 1, 1)

    def group_norm(v, gamma, beta):
        B, C, H, W = v.shape
        g = v.reshape(B, groups, C // groups, H, W)
        mean = jnp.mean(g, axis=(2, 3, 4), keepdims=True)
        var = jnp.mean((g - mean) ** 2, axis=(2, 3, 4), keepdims=True)
        gn = ((g - mean) * jax.lax.rsqrt(var + eps)).reshape(B, C, H, W)
        return gn * gamma.reshape(1, -1, 1, 1) + beta.reshape(1, -1, 1, 1)

    h = group_norm(ws_conv3x3(x, params["w1"], params["b1"]),
                   params["gn1_g"], params["gn1_b"])
    h2 = ws_conv3x3(h, params["w2"], params["b2"])
    h2 = group_norm(h2, params["gn2_g"], params["gn2_b"])
    if time_emb is not None:
        t = jax.nn.silu(time_emb) @ params["wt"].T + params["bt"]
        scale, shift = t[:, :C_out], t[:, C_out:]
        h2 = h2 * (scale[:, :, None, None] + 1.0) + shift[:, :, None, None]
    if "wr" in params:
        res = jnp.einsum("oc,bchw->bohw", params["wr"].reshape(C_out, -1), x,
                         precision=HIGH) + params["br"].reshape(1, -1, 1, 1)
    else:
        res = x
    return h2 + res


if __name__ == "__main__":
    B, C_IN, C_OUT, H, W = 2, 32, 64, 16, 16     # H*W = 256 -> lane-dense blocks
    T_DIM, GROUPS = 32, 8

    key = jax.random.PRNGKey(0)
    ks = jax.random.split(key, 16)
    x = jax.random.normal(ks[0], (B, C_IN, H, W), jnp.float32)
    time_emb = jax.random.normal(ks[1], (B, T_DIM), jnp.float32)
    params = {
        "w1": 0.2 * jax.random.normal(ks[2], (C_OUT, C_IN, 3, 3), jnp.float32),
        "b1": 0.1 * jax.random.normal(ks[3], (C_OUT,), jnp.float32),
        "gn1_g": 1.0 + 0.1 * jax.random.normal(ks[4], (C_OUT,), jnp.float32),
        "gn1_b": 0.1 * jax.random.normal(ks[5], (C_OUT,), jnp.float32),
        "w2": 0.2 * jax.random.normal(ks[6], (C_OUT, C_OUT, 3, 3), jnp.float32),
        "b2": 0.1 * jax.random.normal(ks[7], (C_OUT,), jnp.float32),
        "gn2_g": 1.0 + 0.1 * jax.random.normal(ks[8], (C_OUT,), jnp.float32),
        "gn2_b": 0.1 * jax.random.normal(ks[9], (C_OUT,), jnp.float32),
        "wr": 0.2 * jax.random.normal(ks[10], (C_OUT, C_IN, 1, 1), jnp.float32),
        "br": 0.1 * jax.random.normal(ks[11], (C_OUT,), jnp.float32),
        "wt": 0.2 * jax.random.normal(ks[12], (2 * C_OUT, T_DIM), jnp.float32),
        "bt": 0.1 * jax.random.normal(ks[13], (2 * C_OUT,), jnp.float32),
    }

    ref = jax.block_until_ready(resnet_block_reference(x, time_emb, params, groups=GROUPS))
    ref0 = jax.block_until_ready(resnet_block_reference(x, None, params, groups=GROUPS))

    # Exact f32 path (tight tolerance), with and without time-embedding modulation.
    out = jax.block_until_ready(
        resnet_block_forward(x, time_emb, params, groups=GROUPS, matmul_dtype=jnp.float32))
    np.testing.assert_allclose(np.asarray(out), np.asarray(ref), rtol=1e-3, atol=1e-3)

    out0 = jax.block_until_ready(
        resnet_block_forward(x, None, params, groups=GROUPS, matmul_dtype=jnp.float32))
    np.testing.assert_allclose(np.asarray(out0), np.asarray(ref0), rtol=1e-3, atol=1e-3)

    # bf16-MXU fast path (f32 statistics & accumulation); looser tolerance due to
    # bf16 operand rounding only.
    out_bf = jax.block_until_ready(
        resnet_block_forward(x, time_emb, params, groups=GROUPS, matmul_dtype=jnp.bfloat16))
    np.testing.assert_allclose(np.asarray(out_bf), np.asarray(ref), rtol=3e-2, atol=3e-2)

    print("KERNEL_OK")
</pallas_src>

<mosaic_0001>
module attributes {stable_mosaic.version = 11 : i64} {
  func.func @_resnet_block_kernel(%arg0: i32, %arg1: memref<1x32x256xf32, #tpu.memory_space<vmem>>, %arg2: memref<64x288xf32, #tpu.memory_space<vmem>>, %arg3: memref<64x1xf32, #tpu.memory_space<vmem>>, %arg4: memref<64x1xf32, #tpu.memory_space<vmem>>, %arg5: memref<64x1xf32, #tpu.memory_space<vmem>>, %arg6: memref<64x576xf32, #tpu.memory_space<vmem>>, %arg7: memref<64x1xf32, #tpu.memory_space<vmem>>, %arg8: memref<64x1xf32, #tpu.memory_space<vmem>>, %arg9: memref<64x1xf32, #tpu.memory_space<vmem>>, %arg10: memref<64x32xf32, #tpu.memory_space<vmem>>, %arg11: memref<64x1xf32, #tpu.memory_space<vmem>>, %arg12: memref<8x64xf32, #tpu.memory_space<vmem>>, %arg13: memref<64x8xf32, #tpu.memory_space<vmem>>, %arg14: memref<9x1x256xf32, #tpu.memory_space<vmem>>, %arg15: memref<1x64x1xf32, #tpu.memory_space<vmem>>, %arg16: memref<1x64x1xf32, #tpu.memory_space<vmem>>, %arg17: memref<1x64x256xf32, #tpu.memory_space<vmem>>) attributes {dimension_semantics = [#tpu.dimension_semantics<parallel>], iteration_bounds = array<i64: 2>, scalar_prefetch = 0 : i64, scratch_operands = 0 : i64, tpu.core_type = #tpu.core_type<tc>, window_params = [{transform_indices = @transform_0, window_bounds = array<i64: 1, 32, 256>}, {pipeline_mode = #tpu.pipeline_mode<synchronous>, transform_indices = @transform_1, window_bounds = array<i64: 64, 288>}, {pipeline_mode = #tpu.pipeline_mode<synchronous>, transform_indices = @transform_2, window_bounds = array<i64: 64, 1>}, {pipeline_mode = #tpu.pipeline_mode<synchronous>, transform_indices = @transform_3, window_bounds = array<i64: 64, 1>}, {pipeline_mode = #tpu.pipeline_mode<synchronous>, transform_indices = @transform_4, window_bounds = array<i64: 64, 1>}, {pipeline_mode = #tpu.pipeline_mode<synchronous>, transform_indices = @transform_5, window_bounds = array<i64: 64, 576>}, {pipeline_mode = #tpu.pipeline_mode<synchronous>, transform_indices = @transform_6, window_bounds = array<i64: 64, 1>}, {pipeline_mode = #tpu.pipeline_mode<synchronous>, transform_indices = @transform_7, window_bounds = array<i64: 64, 1>}, {pipeline_mode = #tpu.pipeline_mode<synchronous>, transform_indices = @transform_8, window_bounds = array<i64: 64, 1>}, {pipeline_mode = #tpu.pipeline_mode<synchronous>, transform_indices = @transform_9, window_bounds = array<i64: 64, 32>}, {pipeline_mode = #tpu.pipeline_mode<synchronous>, transform_indices = @transform_10, window_bounds = array<i64: 64, 1>}, {pipeline_mode = #tpu.pipeline_mode<synchronous>, transform_indices = @transform_11, window_bounds = array<i64: 8, 64>}, {pipeline_mode = #tpu.pipeline_mode<synchronous>, transform_indices = @transform_12, window_bounds = array<i64: 64, 8>}, {pipeline_mode = #tpu.pipeline_mode<synchronous>, transform_indices = @transform_13, window_bounds = array<i64: 9, 1, 256>}, {transform_indices = @transform_14, window_bounds = array<i64: 1, 64, 1>}, {transform_indices = @transform_15, window_bounds = array<i64: 1, 64, 1>}, {transform_indices = @transform_16, window_bounds = array<i64: 1, 64, 256>}]} {
    %c0 = arith.constant 0 : index
    %c0_0 = arith.constant 0 : index
    %c0_1 = arith.constant 0 : index
    %0 = vector.load %arg1[%c0, %c0_0, %c0_1] : memref<1x32x256xf32, #tpu.memory_space<vmem>>, vector<1x32x256xf32>
    %1 = vector.shape_cast %0 : vector<1x32x256xf32> to vector<32x256xf32>
    %c0_2 = arith.constant 0 : index
    %c0_3 = arith.constant 0 : index
    %2 = vector.load %arg3[%c0_2, %c0_3] : memref<64x1xf32, #tpu.memory_space<vmem>>, vector<64x1xf32>
    %c17_i32 = arith.constant 17 : i32
    %3 = tpu.dynamic_rotate %1 by %c17_i32 dim 1 : vector<32x256xf32>, i32 -> vector<32x256xf32>
    %c0_4 = arith.constant 0 : index
    %c0_5 = arith.constant 0 : index
    %c0_6 = arith.constant 0 : index
    %4 = vector.load %arg14[%c0_4, %c0_5, %c0_6] : memref<9x1x256xf32, #tpu.memory_space<vmem>>, vector<1x1x256xf32>
    %5 = vector.shape_cast %4 : vector<1x1x256xf32> to vector<1x256xf32>
    %6 = vector.broadcast %5 : vector<1x256xf32> to vector<32x256xf32>
    %7 = arith.mulf %3, %6 : vector<32x256xf32>
    %c16_i32 = arith.constant 16 : i32
    %8 = tpu.dynamic_rotate %1 by %c16_i32 dim 1 : vector<32x256xf32>, i32 -> vector<32x256xf32>
    %c1 = arith.constant 1 : index
    %c0_7 = arith.constant 0 : index
    %c0_8 = arith.constant 0 : index
    %9 = vector.load %arg14[%c1, %c0_7, %c0_8] : memref<9x1x256xf32, #tpu.memory_space<vmem>>, vector<1x1x256xf32>
    %10 = vector.shape_cast %9 : vector<1x1x256xf32> to vector<1x256xf32>
    %11 = vector.broadcast %10 : vector<1x256xf32> to vector<32x256xf32>
    %12 = arith.mulf %8, %11 : vector<32x256xf32>
    %c15_i32 = arith.constant 15 : i32
    %13 = tpu.dynamic_rotate %1 by %c15_i32 dim 1 : vector<32x256xf32>, i32 -> vector<32x256xf32>
    %c2 = arith.constant 2 : index
    %c0_9 = arith.constant 0 : index
    %c0_10 = arith.constant 0 : index
    %14 = vector.load %arg14[%c2, %c0_9, %c0_10] : memref<9x1x256xf32, #tpu.memory_space<vmem>>, vector<1x1x256xf32>
    %15 = vector.shape_cast %14 : vector<1x1x256xf32> to vector<1x256xf32>
    %16 = vector.broadcast %15 : vector<1x256xf32> to vector<32x256xf32>
    %17 = arith.mulf %13, %16 : vector<32x256xf32>
    %c1_i32 = arith.constant 1 : i32
    %18 = tpu.dynamic_rotate %1 by %c1_i32 dim 1 : vector<32x256xf32>, i32 -> vector<32x256xf32>
    %c3 = arith.constant 3 : index
    %c0_11 = arith.constant 0 : index
    %c0_12 = arith.constant 0 : index
    %19 = vector.load %arg14[%c3, %c0_11, %c0_12] : memref<9x1x256xf32, #tpu.memory_space<vmem>>, vector<1x1x256xf32>
    %20 = vector.shape_cast %19 : vector<1x1x256xf32> to vector<1x256xf32>
    %21 = vector.broadcast %20 : vector<1x256xf32> to vector<32x256xf32>
    %22 = arith.mulf %18, %21 : vector<32x256xf32>
    %c255_i32 = arith.constant 255 : i32
    %23 = tpu.dynamic_rotate %1 by %c255_i32 dim 1 : vector<32x256xf32>, i32 -> vector<32x256xf32>
    %c5 = arith.constant 5 : index
    %c0_13 = arith.constant 0 : index
    %c0_14 = arith.constant 0 : index
    %24 = vector.load %arg14[%c5, %c0_13, %c0_14] : memref<9x1x256xf32, #tpu.memory_space<vmem>>, vector<1x1x256xf32>
    %25 = vector.shape_cast %24 : vector<1x1x256xf32> to vector<1x256xf32>
    %26 = vector.broadcast %25 : vector<1x256xf32> to vector<32x256xf32>
    %27 = arith.mulf %23, %26 : vector<32x256xf32>
    %c241_i32 = arith.constant 241 : i32
    %28 = tpu.dynamic_rotate %1 by %c241_i32 dim 1 : vector<32x256xf32>, i32 -> vector<32x256xf32>
    %c6 = arith.constant 6 : index
    %c0_15 = arith.constant 0 : index
    %c0_16 = arith.constant 0 : index
    %29 = vector.load %arg14[%c6, %c0_15, %c0_16] : memref<9x1x256xf32, #tpu.memory_space<vmem>>, vector<1x1x256xf32>
    %30 = vector.shape_cast %29 : vector<1x1x256xf32> to vector<1x256xf32>
    %31 = vector.broadcast %30 : vector<1x256xf32> to vector<32x256xf32>
    %32 = arith.mulf %28, %31 : vector<32x256xf32>
    %c240_i32 = arith.constant 240 : i32
    %33 = tpu.dynamic_rotate %1 by %c240_i32 dim 1 : vector<32x256xf32>, i32 -> vector<32x256xf32>
    %c7 = arith.constant 7 : index
    %c0_17 = arith.constant 0 : index
    %c0_18 = arith.constant 0 : index
    %34 = vector.load %arg14[%c7, %c0_17, %c0_18] : memref<9x1x256xf32, #tpu.memory_space<vmem>>, vector<1x1x256xf32>
    %35 = vector.shape_cast %34 : vector<1x1x256xf32> to vector<1x256xf32>
    %36 = vector.broadcast %35 : vector<1x256xf32> to vector<32x256xf32>
    %37 = arith.mulf %33, %36 : vector<32x256xf32>
    %c239_i32 = arith.constant 239 : i32
    %38 = tpu.dynamic_rotate %1 by %c239_i32 dim 1 : vector<32x256xf32>, i32 -> vector<32x256xf32>
    %c8 = arith.constant 8 : index
    %c0_19 = arith.constant 0 : index
    %c0_20 = arith.constant 0 : index
    %39 = vector.load %arg14[%c8, %c0_19, %c0_20] : memref<9x1x256xf32, #tpu.memory_space<vmem>>, vector<1x1x256xf32>
    %40 = vector.shape_cast %39 : vector<1x1x256xf32> to vector<1x256xf32>
    %41 = vector.broadcast %40 : vector<1x256xf32> to vector<32x256xf32>
    %42 = arith.mulf %38, %41 : vector<32x256xf32>
    %43 = tpu.concatenate %7, %12, %17, %22, %1, %27, %32, %37, %42 in 0 : vector<32x256xf32>, vector<32x256xf32>, vector<32x256xf32>, vector<32x256xf32>, vector<32x256xf32>, vector<32x256xf32>, vector<32x256xf32>, vector<32x256xf32>, vector<32x256xf32> -> vector<288x256xf32>
    %c0_21 = arith.constant 0 : index
    %c0_22 = arith.constant 0 : index
    %44 = vector.load %arg2[%c0_21, %c0_22] : memref<64x288xf32, #tpu.memory_space<vmem>>, vector<64x288xf32>
    %cst = arith.constant dense<0.000000e+00> : vector<64x256xf32>
    %45 = tpu.matmul %44, %43, %cst {dimension_numbers = #tpu.dot_dimension_numbers<[1], [0], [0], [1], [0, 0, 1, 1], [], []>} : vector<64x288xf32>, vector<288x256xf32>, vector<64x256xf32> -> vector<64x256xf32>
    %46 = vector.broadcast %2 : vector<64x1xf32> to vector<64x256xf32>
    %47 = arith.addf %45, %46 : vector<64x256xf32>
    %c0_23 = arith.constant 0 : index
    %c0_24 = arith.constant 0 : index
    %48 = vector.load %arg4[%c0_23, %c0_24] : memref<64x1xf32, #tpu.memory_space<vmem>>, vector<64x1xf32>
    %c0_25 = arith.constant 0 : index
    %c0_26 = arith.constant 0 : index
    %49 = vector.load %arg5[%c0_25, %c0_26] : memref<64x1xf32, #tpu.memory_space<vmem>>, vector<64x1xf32>
    %cst_27 = arith.constant dense<0.000000e+00> : vector<64xf32>
    %50 = vector.multi_reduction <add>, %47, %cst_27 [1] : vector<64x256xf32> to vector<64xf32>
    %51 = vector.shape_cast %50 : vector<64xf32> to vector<64x1xf32>
    %c0_28 = arith.constant 0 : index
    %c0_29 = arith.constant 0 : index
    %52 = vector.load %arg12[%c0_28, %c0_29] : memref<8x64xf32, #tpu.memory_space<vmem>>, vector<8x64xf32>
    %cst_30 = arith.constant dense<0.000000e+00> : vector<8x1xf32>
    %53 = tpu.matmul %52, %51, %cst_30 {dimension_numbers = #tpu.dot_dimension_numbers<[1], [0], [0], [1], [0, 0, 1, 1], [], []>} : vector<8x64xf32>, vector<64x1xf32>, vector<8x1xf32> -> vector<8x1xf32>
    %cst_31 = arith.constant 2.048000e+03 : f32
    %54 = vector.broadcast %cst_31 : f32 to vector<8x1xf32>
    %55 = arith.divf %53, %54 : vector<8x1xf32>
    %c0_32 = arith.constant 0 : index
    %c0_33 = arith.constant 0 : index
    %56 = vector.load %arg13[%c0_32, %c0_33] : memref<64x8xf32, #tpu.memory_space<vmem>>, vector<64x8xf32>
    %cst_34 = arith.constant dense<0.000000e+00> : vector<64x1xf32>
    %57 = tpu.matmul %56, %55, %cst_34 {dimension_numbers = #tpu.dot_dimension_numbers<[1], [0], [0], [1], [0, 0, 1, 1], [], []>} : vector<64x8xf32>, vector<8x1xf32>, vector<64x1xf32> -> vector<64x1xf32>
    %58 = vector.broadcast %57 : vector<64x1xf32> to vector<64x256xf32>
    %59 = arith.subf %47, %58 : vector<64x256xf32>
    %60 = arith.mulf %59, %59 : vector<64x256xf32>
    %cst_35 = arith.constant dense<0.000000e+00> : vector<64xf32>
    %61 = vector.multi_reduction <add>, %60, %cst_35 [1] : vector<64x256xf32> to vector<64xf32>
    %62 = vector.shape_cast %61 : vector<64xf32> to vector<64x1xf32>
    %c0_36 = arith.constant 0 : index
    %c0_37 = arith.constant 0 : index
    %63 = vector.load %arg12[%c0_36, %c0_37] : memref<8x64xf32, #tpu.memory_space<vmem>>, vector<8x64xf32>
    %cst_38 = arith.constant dense<0.000000e+00> : vector<8x1xf32>
    %64 = tpu.matmul %63, %62, %cst_38 {dimension_numbers = #tpu.dot_dimension_numbers<[1], [0], [0], [1], [0, 0, 1, 1], [], []>} : vector<8x64xf32>, vector<64x1xf32>, vector<8x1xf32> -> vector<8x1xf32>
    %cst_39 = arith.constant 2.048000e+03 : f32
    %65 = vector.broadcast %cst_39 : f32 to vector<8x1xf32>
    %66 = arith.divf %64, %65 : vector<8x1xf32>
    %c0_40 = arith.constant 0 : index
    %c0_41 = arith.constant 0 : index
    %67 = vector.load %arg13[%c0_40, %c0_41] : memref<64x8xf32, #tpu.memory_space<vmem>>, vector<64x8xf32>
    %cst_42 = arith.constant 9.99999974E-6 : f32
    %68 = vector.broadcast %cst_42 : f32 to vector<8x1xf32>
    %69 = arith.addf %66, %68 : vector<8x1xf32>
    %70 = math.rsqrt %69 : vector<8x1xf32>
    %cst_43 = arith.constant dense<0.000000e+00> : vector<64x1xf32>
    %71 = tpu.matmul %67, %70, %cst_43 {dimension_numbers = #tpu.dot_dimension_numbers<[1], [0], [0], [1], [0, 0, 1, 1], [], []>} : vector<64x8xf32>, vector<8x1xf32>, vector<64x1xf32> -> vector<64x1xf32>
    %72 = vector.broadcast %71 : vector<64x1xf32> to vector<64x256xf32>
    %73 = arith.mulf %59, %72 : vector<64x256xf32>
    %74 = vector.broadcast %48 : vector<64x1xf32> to vector<64x256xf32>
    %75 = arith.mulf %73, %74 : vector<64x256xf32>
    %76 = vector.broadcast %49 : vector<64x1xf32> to vector<64x256xf32>
    %77 = arith.addf %75, %76 : vector<64x256xf32>
    %c0_44 = arith.constant 0 : index
    %c0_45 = arith.constant 0 : index
    %78 = vector.load %arg7[%c0_44, %c0_45] : memref<64x1xf32, #tpu.memory_space<vmem>>, vector<64x1xf32>
    %c17_i32_46 = arith.constant 17 : i32
    %79 = tpu.dynamic_rotate %77 by %c17_i32_46 dim 1 : vector<64x256xf32>, i32 -> vector<64x256xf32>
    %c0_47 = arith.constant 0 : index
    %c0_48 = arith.constant 0 : index
    %c0_49 = arith.constant 0 : index
    %80 = vector.load %arg14[%c0_47, %c0_48, %c0_49] : memref<9x1x256xf32, #tpu.memory_space<vmem>>, vector<1x1x256xf32>
    %81 = vector.shape_cast %80 : vector<1x1x256xf32> to vector<1x256xf32>
    %82 = vector.broadcast %81 : vector<1x256xf32> to vector<64x256xf32>
    %83 = arith.mulf %79, %82 : vector<64x256xf32>
    %c16_i32_50 = arith.constant 16 : i32
    %84 = tpu.dynamic_rotate %77 by %c16_i32_50 dim 1 : vector<64x256xf32>, i32 -> vector<64x256xf32>
    %c1_51 = arith.constant 1 : index
    %c0_52 = arith.constant 0 : index
    %c0_53 = arith.constant 0 : index
    %85 = vector.load %arg14[%c1_51, %c0_52, %c0_53] : memref<9x1x256xf32, #tpu.memory_space<vmem>>, vector<1x1x256xf32>
    %86 = vector.shape_cast %85 : vector<1x1x256xf32> to vector<1x256xf32>
    %87 = vector.broadcast %86 : vector<1x256xf32> to vector<64x256xf32>
    %88 = arith.mulf %84, %87 : vector<64x256xf32>
    %c15_i32_54 = arith.constant 15 : i32
    %89 = tpu.dynamic_rotate %77 by %c15_i32_54 dim 1 : vector<64x256xf32>, i32 -> vector<64x256xf32>
    %c2_55 = arith.constant 2 : index
    %c0_56 = arith.constant 0 : index
    %c0_57 = arith.constant 0 : index
    %90 = vector.load %arg14[%c2_55, %c0_56, %c0_57] : memref<9x1x256xf32, #tpu.memory_space<vmem>>, vector<1x1x256xf32>
    %91 = vector.shape_cast %90 : vector<1x1x256xf32> to vector<1x256xf32>
    %92 = vector.broadcast %91 : vector<1x256xf32> to vector<64x256xf32>
    %93 = arith.mulf %89, %92 : vector<64x256xf32>
    %c1_i32_58 = arith.constant 1 : i32
    %94 = tpu.dynamic_rotate %77 by %c1_i32_58 dim 1 : vector<64x256xf32>, i32 -> vector<64x256xf32>
    %c3_59 = arith.constant 3 : index
    %c0_60 = arith.constant 0 : index
    %c0_61 = arith.constant 0 : index
    %95 = vector.load %arg14[%c3_59, %c0_60, %c0_61] : memref<9x1x256xf32, #tpu.memory_space<vmem>>, vector<1x1x256xf32>
    %96 = vector.shape_cast %95 : vector<1x1x256xf32> to vector<1x256xf32>
    %97 = vector.broadcast %96 : vector<1x256xf32> to vector<64x256xf32>
    %98 = arith.mulf %94, %97 : vector<64x256xf32>
    %c255_i32_62 = arith.constant 255 : i32
    %99 = tpu.dynamic_rotate %77 by %c255_i32_62 dim 1 : vector<64x256xf32>, i32 -> vector<64x256xf32>
    %c5_63 = arith.constant 5 : index
    %c0_64 = arith.constant 0 : index
    %c0_65 = arith.constant 0 : index
    %100 = vector.load %arg14[%c5_63, %c0_64, %c0_65] : memref<9x1x256xf32, #tpu.memory_space<vmem>>, vector<1x1x256xf32>
    %101 = vector.shape_cast %100 : vector<1x1x256xf32> to vector<1x256xf32>
    %102 = vector.broadcast %101 : vector<1x256xf32> to vector<64x256xf32>
    %103 = arith.mulf %99, %102 : vector<64x256xf32>
    %c241_i32_66 = arith.constant 241 : i32
    %104 = tpu.dynamic_rotate %77 by %c241_i32_66 dim 1 : vector<64x256xf32>, i32 -> vector<64x256xf32>
    %c6_67 = arith.constant 6 : index
    %c0_68 = arith.constant 0 : index
    %c0_69 = arith.constant 0 : index
    %105 = vector.load %arg14[%c6_67, %c0_68, %c0_69] : memref<9x1x256xf32, #tpu.memory_space<vmem>>, vector<1x1x256xf32>
    %106 = vector.shape_cast %105 : vector<1x1x256xf32> to vector<1x256xf32>
    %107 = vector.broadcast %106 : vector<1x256xf32> to vector<64x256xf32>
    %108 = arith.mulf %104, %107 : vector<64x256xf32>
    %c240_i32_70 = arith.constant 240 : i32
    %109 = tpu.dynamic_rotate %77 by %c240_i32_70 dim 1 : vector<64x256xf32>, i32 -> vector<64x256xf32>
    %c7_71 = arith.constant 7 : index
    %c0_72 = arith.constant 0 : index
    %c0_73 = arith.constant 0 : index
    %110 = vector.load %arg14[%c7_71, %c0_72, %c0_73] : memref<9x1x256xf32, #tpu.memory_space<vmem>>, vector<1x1x256xf32>
    %111 = vector.shape_cast %110 : vector<1x1x256xf32> to vector<1x256xf32>
    %112 = vector.broadcast %111 : vector<1x256xf32> to vector<64x256xf32>
    %113 = arith.mulf %109, %112 : vector<64x256xf32>
    %c239_i32_74 = arith.constant 239 : i32
    %114 = tpu.dynamic_rotate %77 by %c239_i32_74 dim 1 : vector<64x256xf32>, i32 -> vector<64x256xf32>
    %c8_75 = arith.constant 8 : index
    %c0_76 = arith.constant 0 : index
    %c0_77 = arith.constant 0 : index
    %115 = vector.load %arg14[%c8_75, %c0_76, %c0_77] : memref<9x1x256xf32, #tpu.memory_space<vmem>>, vector<1x1x256xf32>
    %116 = vector.shape_cast %115 : vector<1x1x256xf32> to vector<1x256xf32>
    %117 = vector.broadcast %116 : vector<1x256xf32> to vector<64x256xf32>
    %118 = arith.mulf %114, %117 : vector<64x256xf32>
    %119 = tpu.concatenate %83, %88, %93, %98, %77, %103, %108, %113, %118 in 0 : vector<64x256xf32>, vector<64x256xf32>, vector<64x256xf32>, vector<64x256xf32>, vector<64x256xf32>, vector<64x256xf32>, vector<64x256xf32>, vector<64x256xf32>, vector<64x256xf32> -> vector<576x256xf32>
    %c0_78 = arith.constant 0 : index
    %c0_79 = arith.constant 0 : index
    %120 = vector.load %arg6[%c0_78, %c0_79] : memref<64x576xf32, #tpu.memory_space<vmem>>, vector<64x576xf32>
    %cst_80 = arith.constant dense<0.000000e+00> : vector<64x256xf32>
    %121 = tpu.matmul %120, %119, %cst_80 {dimension_numbers = #tpu.dot_dimension_numbers<[1], [0], [0], [1], [0, 0, 1, 1], [], []>} : vector<64x576xf32>, vector<576x256xf32>, vector<64x256xf32> -> vector<64x256xf32>
    %122 = vector.broadcast %78 : vector<64x1xf32> to vector<64x256xf32>
    %123 = arith.addf %121, %122 : vector<64x256xf32>
    %c0_81 = arith.constant 0 : index
    %c0_82 = arith.constant 0 : index
    %124 = vector.load %arg8[%c0_81, %c0_82] : memref<64x1xf32, #tpu.memory_space<vmem>>, vector<64x1xf32>
    %c0_83 = arith.constant 0 : index
    %c0_84 = arith.constant 0 : index
    %125 = vector.load %arg9[%c0_83, %c0_84] : memref<64x1xf32, #tpu.memory_space<vmem>>, vector<64x1xf32>
    %cst_85 = arith.constant dense<0.000000e+00> : vector<64xf32>
    %126 = vector.multi_reduction <add>, %123, %cst_85 [1] : vector<64x256xf32> to vector<64xf32>
    %127 = vector.shape_cast %126 : vector<64xf32> to vector<64x1xf32>
    %c0_86 = arith.constant 0 : index
    %c0_87 = arith.constant 0 : index
    %128 = vector.load %arg12[%c0_86, %c0_87] : memref<8x64xf32, #tpu.memory_space<vmem>>, vector<8x64xf32>
    %cst_88 = arith.constant dense<0.000000e+00> : vector<8x1xf32>
    %129 = tpu.matmul %128, %127, %cst_88 {dimension_numbers = #tpu.dot_dimension_numbers<[1], [0], [0], [1], [0, 0, 1, 1], [], []>} : vector<8x64xf32>, vector<64x1xf32>, vector<8x1xf32> -> vector<8x1xf32>
    %cst_89 = arith.constant 2.048000e+03 : f32
    %130 = vector.broadcast %cst_89 : f32 to vector<8x1xf32>
    %131 = arith.divf %129, %130 : vector<8x1xf32>
    %c0_90 = arith.constant 0 : index
    %c0_91 = arith.constant 0 : index
    %132 = vector.load %arg13[%c0_90, %c0_91] : memref<64x8xf32, #tpu.memory_space<vmem>>, vector<64x8xf32>
    %cst_92 = arith.constant dense<0.000000e+00> : vector<64x1xf32>
    %133 = tpu.matmul %132, %131, %cst_92 {dimension_numbers = #tpu.dot_dimension_numbers<[1], [0], [0], [1], [0, 0, 1, 1], [], []>} : vector<64x8xf32>, vector<8x1xf32>, vector<64x1xf32> -> vector<64x1xf32>
    %134 = vector.broadcast %133 : vector<64x1xf32> to vector<64x256xf32>
    %135 = arith.subf %123, %134 : vector<64x256xf32>
    %136 = arith.mulf %135, %135 : vector<64x256xf32>
    %cst_93 = arith.constant dense<0.000000e+00> : vector<64xf32>
    %137 = vector.multi_reduction <add>, %136, %cst_93 [1] : vector<64x256xf32> to vector<64xf32>
    %138 = vector.shape_cast %137 : vector<64xf32> to vector<64x1xf32>
    %c0_94 = arith.constant 0 : index
    %c0_95 = arith.constant 0 : index
    %139 = vector.load %arg12[%c0_94, %c0_95] : memref<8x64xf32, #tpu.memory_space<vmem>>, vector<8x64xf32>
    %cst_96 = arith.constant dense<0.000000e+00> : vector<8x1xf32>
    %140 = tpu.matmul %139, %138, %cst_96 {dimension_numbers = #tpu.dot_dimension_numbers<[1], [0], [0], [1], [0, 0, 1, 1], [], []>} : vector<8x64xf32>, vector<64x1xf32>, vector<8x1xf32> -> vector<8x1xf32>
    %cst_97 = arith.constant 2.048000e+03 : f32
    %141 = vector.broadcast %cst_97 : f32 to vector<8x1xf32>
    %142 = arith.divf %140, %141 : vector<8x1xf32>
    %c0_98 = arith.constant 0 : index
    %c0_99 = arith.constant 0 : index
    %143 = vector.load %arg13[%c0_98, %c0_99] : memref<64x8xf32, #tpu.memory_space<vmem>>, vector<64x8xf32>
    %cst_100 = arith.constant 9.99999974E-6 : f32
    %144 = vector.broadcast %cst_100 : f32 to vector<8x1xf32>
    %145 = arith.addf %142, %144 : vector<8x1xf32>
    %146 = math.rsqrt %145 : vector<8x1xf32>
    %cst_101 = arith.constant dense<0.000000e+00> : vector<64x1xf32>
    %147 = tpu.matmul %143, %146, %cst_101 {dimension_numbers = #tpu.dot_dimension_numbers<[1], [0], [0], [1], [0, 0, 1, 1], [], []>} : vector<64x8xf32>, vector<8x1xf32>, vector<64x1xf32> -> vector<64x1xf32>
    %148 = vector.broadcast %147 : vector<64x1xf32> to vector<64x256xf32>
    %149 = arith.mulf %135, %148 : vector<64x256xf32>
    %150 = vector.broadcast %124 : vector<64x1xf32> to vector<64x256xf32>
    %151 = arith.mulf %149, %150 : vector<64x256xf32>
    %152 = vector.broadcast %125 : vector<64x1xf32> to vector<64x256xf32>
    %153 = arith.addf %151, %152 : vector<64x256xf32>
    %c0_102 = arith.constant 0 : index
    %c0_103 = arith.constant 0 : index
    %c0_104 = arith.constant 0 : index
    %154 = vector.load %arg15[%c0_102, %c0_103, %c0_104] : memref<1x64x1xf32, #tpu.memory_space<vmem>>, vector<1x64x1xf32>
    %155 = vector.shape_cast %154 : vector<1x64x1xf32> to vector<64x1xf32>
    %cst_105 = arith.constant 1.000000e+00 : f32
    %156 = vector.broadcast %cst_105 : f32 to vector<64x1xf32>
    %157 = arith.addf %155, %156 : vector<64x1xf32>
    %158 = vector.broadcast %157 : vector<64x1xf32> to vector<64x256xf32>
    %159 = arith.mulf %153, %158 : vector<64x256xf32>
    %c0_106 = arith.constant 0 : index
    %c0_107 = arith.constant 0 : index
    %c0_108 = arith.constant 0 : index
    %160 = vector.load %arg16[%c0_106, %c0_107, %c0_108] : memref<1x64x1xf32, #tpu.memory_space<vmem>>, vector<1x64x1xf32>
    %161 = vector.shape_cast %160 : vector<1x64x1xf32> to vector<64x1xf32>
    %162 = vector.broadcast %161 : vector<64x1xf32> to vector<64x256xf32>
    %163 = arith.addf %159, %162 : vector<64x256xf32>
    %c0_109 = arith.constant 0 : index
    %c0_110 = arith.constant 0 : index
    %164 = vector.load %arg10[%c0_109, %c0_110] : memref<64x32xf32, #tpu.memory_space<vmem>>, vector<64x32xf32>
    %cst_111 = arith.constant dense<0.000000e+00> : vector<64x256xf32>
    %165 = tpu.matmul %164, %1, %cst_111 {dimension_numbers = #tpu.dot_dimension_numbers<[1], [0], [0], [1], [0, 0, 1, 1], [], []>} : vector<64x32xf32>, vector<32x256xf32>, vector<64x256xf32> -> vector<64x256xf32>
    %c0_112 = arith.constant 0 : index
    %c0_113 = arith.constant 0 : index
    %166 = vector.load %arg11[%c0_112, %c0_113] : memref<64x1xf32, #tpu.memory_space<vmem>>, vector<64x1xf32>
    %167 = vector.broadcast %166 : vector<64x1xf32> to vector<64x256xf32>
    %168 = arith.addf %165, %167 : vector<64x256xf32>
    %169 = arith.addf %163, %168 : vector<64x256xf32>
    %c0_114 = arith.constant 0 : index
    %c0_115 = arith.constant 0 : index
    %c0_116 = arith.constant 0 : index
    %170 = vector.load %arg17[%c0_114, %c0_115, %c0_116] : memref<1x64x256xf32, #tpu.memory_space<vmem>>, vector<1x64x256xf32>
    %171 = vector.shape_cast %170 : vector<1x64x256xf32> to vector<64x256xf32>
    %172 = vector.shape_cast %169 : vector<64x256xf32> to vector<1x64x256xf32>
    tpu.vector_store %arg17[%c0_114, %c0_115, %c0_116], %172 {strides = array<i32>} : memref<1x64x256xf32, #tpu.memory_space<vmem>>, vector<1x64x256xf32>,
    return
  }
  func.func @transform_0(%arg0: i32) -> (i32, i32, i32) {
    %c0_i32 = arith.constant 0 : i32
    %c0_i32_0 = arith.constant 0 : i32
    %c0_i32_1 = arith.constant 0 : i32
    return %arg0, %c0_i32, %c0_i32_0 : i32, i32, i32
  }
  func.func @transform_1(%arg0: i32) -> (i32, i32) {
    %c0_i32 = arith.constant 0 : i32
    %c0_i32_0 = arith.constant 0 : i32
    %c0_i32_1 = arith.constant 0 : i32
    return %c0_i32, %c0_i32_0 : i32, i32
  }
  func.func @transform_2(%arg0: i32) -> (i32, i32) {
    %c0_i32 = arith.constant 0 : i32
    %c0_i32_0 = arith.constant 0 : i32
    %c0_i32_1 = arith.constant 0 : i32
    return %c0_i32, %c0_i32_0 : i32, i32
  }
  func.func @transform_3(%arg0: i32) -> (i32, i32) {
    %c0_i32 = arith.constant 0 : i32
    %c0_i32_0 = arith.constant 0 : i32
    %c0_i32_1 = arith.constant 0 : i32
    return %c0_i32, %c0_i32_0 : i32, i32
  }
  func.func @transform_4(%arg0: i32) -> (i32, i32) {
    %c0_i32 = arith.constant 0 : i32
    %c0_i32_0 = arith.constant 0 : i32
    %c0_i32_1 = arith.constant 0 : i32
    return %c0_i32, %c0_i32_0 : i32, i32
  }
  func.func @transform_5(%arg0: i32) -> (i32, i32) {
    %c0_i32 = arith.constant 0 : i32
    %c0_i32_0 = arith.constant 0 : i32
    %c0_i32_1 = arith.constant 0 : i32
    return %c0_i32, %c0_i32_0 : i32, i32
  }
  func.func @transform_6(%arg0: i32) -> (i32, i32) {
    %c0_i32 = arith.constant 0 : i32
    %c0_i32_0 = arith.constant 0 : i32
    %c0_i32_1 = arith.constant 0 : i32
    return %c0_i32, %c0_i32_0 : i32, i32
  }
  func.func @transform_7(%arg0: i32) -> (i32, i32) {
    %c0_i32 = arith.constant 0 : i32
    %c0_i32_0 = arith.constant 0 : i32
    %c0_i32_1 = arith.constant 0 : i32
    return %c0_i32, %c0_i32_0 : i32, i32
  }
  func.func @transform_8(%arg0: i32) -> (i32, i32) {
    %c0_i32 = arith.constant 0 : i32
    %c0_i32_0 = arith.constant 0 : i32
    %c0_i32_1 = arith.constant 0 : i32
    return %c0_i32, %c0_i32_0 : i32, i32
  }
  func.func @transform_9(%arg0: i32) -> (i32, i32) {
    %c0_i32 = arith.constant 0 : i32
    %c0_i32_0 = arith.constant 0 : i32
    %c0_i32_1 = arith.constant 0 : i32
    return %c0_i32, %c0_i32_0 : i32, i32
  }
  func.func @transform_10(%arg0: i32) -> (i32, i32) {
    %c0_i32 = arith.constant 0 : i32
    %c0_i32_0 = arith.constant 0 : i32
    %c0_i32_1 = arith.constant 0 : i32
    return %c0_i32, %c0_i32_0 : i32, i32
  }
  func.func @transform_11(%arg0: i32) -> (i32, i32) {
    %c0_i32 = arith.constant 0 : i32
    %c0_i32_0 = arith.constant 0 : i32
    %c0_i32_1 = arith.constant 0 : i32
    return %c0_i32, %c0_i32_0 : i32, i32
  }
  func.func @transform_12(%arg0: i32) -> (i32, i32) {
    %c0_i32 = arith.constant 0 : i32
    %c0_i32_0 = arith.constant 0 : i32
    %c0_i32_1 = arith.constant 0 : i32
    return %c0_i32, %c0_i32_0 : i32, i32
  }
  func.func @transform_13(%arg0: i32) -> (i32, i32, i32) {
    %c0_i32 = arith.constant 0 : i32
    %c0_i32_0 = arith.constant 0 : i32
    %c0_i32_1 = arith.constant 0 : i32
    %c0_i32_2 = arith.constant 0 : i32
    return %c0_i32, %c0_i32_0, %c0_i32_1 : i32, i32, i32
  }
  func.func @transform_14(%arg0: i32) -> (i32, i32, i32) {
    %c0_i32 = arith.constant 0 : i32
    %c0_i32_0 = arith.constant 0 : i32
    %c0_i32_1 = arith.constant 0 : i32
    return %arg0, %c0_i32, %c0_i32_0 : i32, i32, i32
  }
  func.func @transform_15(%arg0: i32) -> (i32, i32, i32) {
    %c0_i32 = arith.constant 0 : i32
    %c0_i32_0 = arith.constant 0 : i32
    %c0_i32_1 = arith.constant 0 : i32
    return %arg0, %c0_i32, %c0_i32_0 : i32, i32, i32
  }
  func.func @transform_16(%arg0: i32) -> (i32, i32, i32) {
    %c0_i32 = arith.constant 0 : i32
    %c0_i32_0 = arith.constant 0 : i32
    %c0_i32_1 = arith.constant 0 : i32
    return %arg0, %c0_i32, %c0_i32_0 : i32, i32, i32
  }
}

</mosaic_0001>

<bundles_post_ra>
// kernel: tpu_custom_call.1
= control target key start
LH: loop header
LB: loop body
LE: loop exit
PB: predicated region body
PF: predicated region fallthrough
CT: control target
= control target key end

     0   :  { %s7063_s0 = inlined_call_operand.vmem [shape: f32[2,32,256], index: 0, kind: input, shape index: {}]   ;;  %s7064_s1 = inlined_call_operand.vmem [shape: f32[64,288], index: 1, kind: input, shape index: {}]   ;;  %s7065_s2 = inlined_call_operand.vmem [shape: f32[64,1], index: 2, kind: input, shape index: {}]   ;;  %s7066_s3 = inlined_call_operand.vmem [shape: f32[64,1], index: 3, kind: input, shape index: {}]   ;;  %s7067_s4 = inlined_call_operand.vmem [shape: f32[64,1], index: 4, kind: input, shape index: {}]   ;;  %s7068_s5 = inlined_call_operand.hbm [shape: f32[64,576], index: 5, kind: input, shape index: {}]   ;;  %s7069_s6 = inlined_call_operand.vmem [shape: f32[64,1], index: 6, kind: input, shape index: {}]   ;;  %s7070_s7 = inlined_call_operand.vmem [shape: f32[64,1], index: 7, kind: input, shape index: {}]   ;;  %s7071_s8 = inlined_call_operand.vmem [shape: f32[64,1], index: 8, kind: input, shape index: {}]   ;;  %s7072_s9 = inlined_call_operand.vmem [shape: f32[64,32], index: 9, kind: input, shape index: {}]   ;;  %s7073_s10 = inlined_call_operand.vmem [shape: f32[64,1], index: 10, kind: input, shape index: {}]   ;;  %s7074_s11 = inlined_call_operand.vmem [shape: f32[8,64], index: 11, kind: input, shape index: {}]   ;;  %s7075_s12 = inlined_call_operand.vmem [shape: f32[64,8], index: 12, kind: input, shape index: {}]   ;;  %s7076_s13 = inlined_call_operand.vmem [shape: f32[9,1,256], index: 13, kind: input, shape index: {}]   ;;  %s7077_s14 = inlined_call_operand.vmem [shape: f32[2,64,1], index: 14, kind: input, shape index: {}]   ;;  %s7078_s15 = inlined_call_operand.vmem [shape: f32[2,64,1], index: 15, kind: input, shape index: {}]   ;;  %s7079_s16 = inlined_call_operand.hbm [shape: f32[2,64,256], index: 16, kind: output, shape index: {}]  }
   0x1   :  { %7190 = sst [smem:[#allocation98_spill]] %s7063_s0 }
   0x2   :  { %7191 = sst [smem:[#allocation99_spill]] %s7064_s1 }
   0x3   :  { %7192 = sst [smem:[#allocation100_spill]] %s7065_s2 }
   0x4   :  { %7193 = sst [smem:[#allocation101_spill]] %s7068_s5 }
   0x5   :  { %21 = vsyncpa [#allocation3], 0 }
   0x6   :  { %22 = vsyncpa [#allocation4], 0 }
   0x7   :  { %24 = vsyncpa [#allocation4 + $0x1], 0  ;;  %s4053_s21 = smov 0   ;;  %s4055_s22 = smov 0  }
   0x8   :  { %s4057_s23 = smov 0   ;;  %s4059_s24 = smov 0  }
   0x9 LB: > { %7194 = sst [smem:[#allocation8_spill]] %s3948_s23  ;;  %s4074_s25 = sadd.s32 4294967295, %s3952_s24   ;;  %s3952_s24 = sphi %s4059_s24, %s7421_s24   ;;  %s3948_s23 = sphi %s4057_s23, %s7423_s23   ;;  %s3944_s22 = sphi %s4055_s22, %s7425_s22   ;;  %s3940_s21 = sphi %s4053_s21, %s7424_s21  }
   0xa   : > { %s3650_s26 = sadd.s32 4294967294, %s3952_s24   ;;  %s4078_s27 = sadd.s32 1, %s3952_s24  }
   0xb   : > { %7195 = sst [smem:[#allocation9_spill]] %s4078_s27  ;;  %s388_s28 = sadd.s32 1, %s3948_s23 }
   0xc   : > { %s385_s29 = ssub.s32 %s3952_s24, %s4078_s27  ;;  %p398_p0 = scmp.ne.s32.totalorder %s3948_s23, %s3944_s22 }
   0xd   : > { %p386_p1 = scmp.eq.s32.totalorder %s385_s29, 0  ;;  %p399_p2 = scmp.eq.s32.totalorder %s4074_s25, 1 }
   0xe   : > { %p404_p3 = scmp.ne.s32.totalorder %s3944_s22, %s3940_s21  ;;  %p405_p4 = scmp.eq.s32.totalorder %s3650_s26, 1 }
   0xf   : > { %s4089_s30 = scalar_select %p386_p1, %s3948_s23, %s388_s28  }
  0x10   : > { %p4091_p5 = por %p399_p2, %p398_p0  ;;  %p4095_p6 = por %p405_p4, %p404_p3 }
  0x11   : > { %7196 = sst [smem:[#allocation10_spill]] %s4089_s30  ;;  %p3651_p7 = scmp.ge.s32.totalorder %s3952_s24, 1 }
  0x12   : > { %p412_p8 = scmp.lt.s32.totalorder %s3952_s24, 3  ;;  %p3781_p9 = scmp.eq.s32.totalorder %s4074_s25, 0 }
  0x13   : > { %s7199_s5 = sld [smem:[#allocation101_spill]]  ;;  %s3954_s26 = smov [#allocation2]  }
  0x14   : > { %p413_p10 = pnand %p3651_p7, %p412_p8  ;;  %s437_s28 = sshll.u32 %s3954_s26, 4  ;;  %s438_s28 = int_to_ptr.vmem [resolvable:$true] %s437_s28 }
  0x15   : > { %s3955_s29 = smov 640   ;;  %s3956_s30 = smov 40  }
  0x16   : > { %p3773_p11 = pneg %p413_p10  ;;  %501 = sbr.rel (%p413_p10) target bundleno = 3480 (0xd98), region = 84 }
  0x18   : > { %p3774_p12 = pnand %p3781_p9, %p3773_p11 }
  0x19   : > { %s435_s20 = sshll.u32 %s7199_s5, 4  ;;  %s436_s20 = int_to_ptr.hbm [resolvable:$true] %s435_s20 }
  0x1a   : > { %3776 = dma.hbm_to_vmem [thread:$0]  (!%p3774_p12), %s436_s20, 5120, %s438_s28, [#allocation3], %s3955_s29, %s3955_s29, %s3956_s30  }
  0x1b   : > { %3931 = dma.done.wait (%p3781_p9), [#allocation3], 5120  }
  0x1c   : > { %3933 = vsyncadd (%p3781_p9), [#allocation3], 4294962176  ;;  %p562_p13 = scmp.lt.s32.totalorder %s4074_s25, 1  ;;  %s7200_s23 = sld [smem:[#allocation98_spill]]  ;;  %v609_v11 = vlaneseq  ;;  %v4248_v16 = vld [vmem:[%s7076_s13 + $0x10] sm:$0x3] }
  0x1d   : > { %s7083_s30 = smov 111   ;;  %s7093_s5 = smov 1   ;;  %v4256_v17 = vperm.slane %v4248_v16, 0  ;;  %v3665_v32 = vld [vmem:[%s7076_s13 + $0x6] sm:$0x3]  ;;  %vm978_vm4 = vcmask 261120  }
  0x1e   : > { %s563_s18 = scalar_select %p562_p13, %s4074_s25, 1  ;;  %v4243_v14 = vand.u32 127, %v609_v11  ;;  %v4302_v33 = vperm.slane %v3665_v32, 0  ;;  %v4304_v34 = vperm.slane %v3665_v32, 1  ;;  %v3664_v53 = vld [vmem:[%s7076_s13 + $0x4] sm:$0x3] }
  0x1f   : > { %s7097_s20 = smov 16   ;;  %s7095_s28 = smov 17   ;;  %7201 = vst [vmem:[#allocation11_spill] sm:$0xff] %v4256_v17  ;;  %v4340_v54 = vperm.slane %v3664_v53, 0  ;;  %v4344_v55 = vperm.slane %v3664_v53, 1  ;;  %vm1290_vm9 = vcmask 523264  }
  0x20   : > { %s4113_s19 = sshll.u32 %s563_s18, 6  ;;  %s7087_s29 = smov 112   ;;  %vm890_vm0 = vcmp.lt.s32.totalorder %v4243_v14, 111  ;;  %vm730_vm1 = vcmp.lt.s32.totalorder %v4243_v14, 1  ;;  %7202 = vst [vmem:[#allocation12_spill] sm:$0xff] %v4304_v34  ;;  %vm690_vm2 = vcmp.lt.s32.totalorder %v4243_v14, 15 }
  0x21   : > { %s7085_s18 = smov 113   ;;  %7203 = vst [vmem:[#allocation13_spill] sm:$0xff] %v4344_v55  ;;  %vm650_vm3 = vcmp.lt.s32.totalorder %v4243_v14, 16  ;;  %s7205_s1 = sld [smem:[#allocation99_spill]]  ;;  %vm611_vm5 = vcmp.lt.s32.totalorder %v4243_v14, 17  ;;  %vm850_vm6 = vcmp.lt.s32.totalorder %v4243_v14, 112 }
  0x22   : > { %s4119_s27 = scalar_lea.vmem %s7200_s23, %s4113_s19  ;;  %s7089_s23 = smov 15   ;;  %vm810_vm7 = vcmp.lt.s32.totalorder %v4243_v14, 113  ;;  %vm770_vm8 = vcmp.lt.s32.totalorder %v4243_v14, 127  ;;  %vm1330_vm11 = vcmask 64512  }
  0x23   : > { %v4122_v0 = vld [vmem:[%s4119_s27 + $0x30] sm:$0xff]  ;;  %v4125_v1 = vld [vmem:[%s4119_s27 + $0x20] sm:$0xff]  ;;  %v4137_v3 = vld [vmem:[%s4119_s27 + $0x38] sm:$0xff]  ;;  %s7212_s2 = sld [smem:[#allocation100_spill]]  ;;  %s7219_s26 = smov 17  }
  0x24   : > { %880 = vrot.lane.b32.xlu0 %v4122_v0, %s7083_s30  ;;  %878 = vrot.lane.b32.xlu1 %v4125_v1, %s7083_s30  ;;  %v4132_v2 = vld [vmem:[%s4119_s27 + $0x10] sm:$0xff]  ;;  %v4140_v4 = vld [vmem:[%s4119_s27 + $0x28] sm:$0xff] }
  0x25   : > { %876 = vrot.lane.b32.xlu2 %v4132_v2, %s7083_s30  ;;  %v4143_v5 = vld [vmem:[%s4119_s27 + $0x18] sm:$0xff]  ;;  %v4152_v6 = vld [vmem:[%s4119_s27 + $0x8] sm:$0xff]  ;;  %v4155_v7 = vld [vmem:[%s4119_s27] sm:$0xff] }
  0x2c   : > { %888 = vrot.lane.b32.xlu0 %v4137_v3, %s7083_s30  ;;  %886 = vrot.lane.b32.xlu1 %v4140_v4, %s7083_s30 }
  0x2d   : > { %884 = vrot.lane.b32.xlu2 %v4143_v5, %s7083_s30 }
  0x34   : > { %882 = vrot.lane.b32.xlu1 %v4152_v6, %s7083_s30  ;;  %874 = vrot.lane.b32.xlu0 %v4155_v7, %s7083_s30  ;;  %s7091_s30 = smov 127  }
  0x35   : > { %720 = vrot.lane.b32.xlu2 %v4122_v0, %s7093_s5 }
  0x3c   : > { %718 = vrot.lane.b32.xlu1 %v4125_v1, %s7093_s5  ;;  %728 = vrot.lane.b32.xlu0 %v4137_v3, %s7093_s5 }
  0x3d   : > { %726 = vrot.lane.b32.xlu2 %v4140_v4, %s7093_s5 }
  0x44   : > { %724 = vrot.lane.b32.xlu1 %v4143_v5, %s7093_s5  ;;  %716 = vrot.lane.b32.xlu0 %v4132_v2, %s7093_s5 }
  0x45   : > { %714 = vrot.lane.b32.xlu2 %v4155_v7, %s7093_s5 }
  0x4c   : > { %680 = vrot.lane.b32.xlu1 %v4122_v0, %s7089_s23  ;;  %722 = vrot.lane.b32.xlu0 %v4152_v6, %s7093_s5  ;;  %s7223_s5 = smov 112  }
  0x4d   : > { %688 = vrot.lane.b32.xlu2 %v4137_v3, %s7089_s23 }
  0x54   : > { %686 = vrot.lane.b32.xlu1 %v4140_v4, %s7089_s23  ;;  %678 = vrot.lane.b32.xlu0 %v4125_v1, %s7089_s23 }
  0x55   : > { %676 = vrot.lane.b32.xlu2 %v4132_v2, %s7089_s23 }
  0x5c   : > { %674 = vrot.lane.b32.xlu1 %v4155_v7, %s7089_s23  ;;  %684 = vrot.lane.b32.xlu0 %v4143_v5, %s7089_s23 }
  0x5d   : > { %682 = vrot.lane.b32.xlu2 %v4152_v6, %s7089_s23  ;;  %s7220_s23 = smov 1  }
  0x64   : > { %648 = vrot.lane.b32.xlu1 %v4137_v3, %s7097_s20  ;;  %640 = vrot.lane.b32.xlu0 %v4122_v0, %s7097_s20 }
  0x65   : > { %638 = vrot.lane.b32.xlu2 %v4125_v1, %s7097_s20 }
  0x6c   : > { %636 = vrot.lane.b32.xlu1 %v4132_v2, %s7097_s20  ;;  %646 = vrot.lane.b32.xlu0 %v4140_v4, %s7097_s20 }
  0x6d   : > { %644 = vrot.lane.b32.xlu2 %v4143_v5, %s7097_s20 }
  0x74   : > { %642 = vrot.lane.b32.xlu1 %v4152_v6, %s7097_s20  ;;  %634 = vrot.lane.b32.xlu0 %v4155_v7, %s7097_s20 }
  0x75   : > { %599 = vrot.lane.b32.xlu2 %v4122_v0, %s7095_s28 }
  0x7c   : > { %597 = vrot.lane.b32.xlu1 %v4125_v1, %s7095_s28  ;;  %607 = vrot.lane.b32.xlu0 %v4137_v3, %s7095_s28 }
  0x7d   : > { %605 = vrot.lane.b32.xlu2 %v4140_v4, %s7095_s28 }
  0x7f   : > { %v4217_v8 = vpop.permute.xlu2 %876 }
  0x84   : > { %603 = vrot.lane.b32.xlu1 %v4143_v5, %s7095_s28  ;;  %595 = vrot.lane.b32.xlu0 %v4132_v2, %s7095_s28 }
  0x85   : > { %593 = vrot.lane.b32.xlu2 %v4155_v7, %s7095_s28 }
  0x87   : > { %v4225_v9 = vpop.permute.xlu2 %884 }
  0x88   : > { %v892_v24 = vsel %vm890_vm0, %v4217_v8, %v4225_v9 }
  0x89   : > { %v908_v26 = vmul.f32 %v4256_v17, %v892_v24 }
  0x8c   : > { %840 = vrot.lane.b32.xlu1 %v4122_v0, %s7087_s29  ;;  %601 = vrot.lane.b32.xlu0 %v4152_v6, %s7095_s28  ;;  %s6799_s28 = scalar_lea.vmem %s7078_s15, %s4113_s19 }
  0x8d   : > { %848 = vrot.lane.b32.xlu2 %v4137_v3, %s7087_s29 }
  0x8f   : > { %v721_v10 = vpop.permute.xlu2 %720 }
  0x94   : > { %846 = vrot.lane.b32.xlu1 %v4140_v4, %s7087_s29  ;;  %838 = vrot.lane.b32.xlu0 %v4125_v1, %s7087_s29 }
  0x95   : > { %836 = vrot.lane.b32.xlu2 %v4132_v2, %s7087_s29 }
  0x96   : > { %v4237_v12 = vpop.permute.xlu0 %880  ;;  %v4239_v13 = vpop.permute.xlu1 %878 }
  0x97   : > { %v727_v15 = vpop.permute.xlu2 %726 }
  0x9c   : > { %834 = vrot.lane.b32.xlu1 %v4155_v7, %s7087_s29  ;;  %844 = vrot.lane.b32.xlu0 %v4143_v5, %s7087_s29 }
  0x9d   : > { %842 = vrot.lane.b32.xlu2 %v4152_v6, %s7087_s29  ;;  %s7221_s29 = smov 127  }
  0x9e   : > { %v4258_v18 = vpop.permute.xlu0 %888  ;;  %v4260_v19 = vpop.permute.xlu1 %886 }
  0x9f   : > { %v894_v20 = vsel %vm890_vm0, %v4237_v12, %v4258_v18  ;;  %v893_v21 = vsel %vm890_vm0, %v4239_v13, %v4260_v19  ;;  %v4273_v23 = vpop.permute.xlu2 %714 }
  0xa0   : > { %v912_v22 = vmul.f32 %v4256_v17, %v894_v20  ;;  %v910_v25 = vmul.f32 %v4256_v17, %v893_v21 }
  0xa2   : > { %1097 = vmatpush.msra.mxu2 %v912_v22 }
  0xa4   : > { %1098 = vmatpush.msra.mxu2 %v910_v25  ;;  %808 = vrot.lane.b32.xlu1 %v4137_v3, %s7085_s18 }
  0xa5   : > { %800 = vrot.lane.b32.xlu0 %v4122_v0, %s7085_s18  ;;  %798 = vrot.lane.b32.xlu2 %v4125_v1, %s7085_s18 }
  0xa6   : > { %1099 = vmatpush.msra.mxu2 %v908_v26  ;;  %v4285_v27 = vpop.permute.xlu1 %882  ;;  %v4287_v28 = vpop.permute.xlu0 %874 }
  0xa7   : > { %v891_v29 = vsel %vm890_vm0, %v4287_v28, %v4285_v27  ;;  %v689_v31 = vpop.permute.xlu2 %688 }
  0xa8   : > { %v906_v30 = vmul.f32 %v4256_v17, %v891_v29 }
  0xaa   : > { %1100 = vmatpush.msra.mxu2 %v906_v30 }
  0xac   : > { %796 = vrot.lane.b32.xlu1 %v4132_v2, %s7085_s18 }
  0xad   : > { %806 = vrot.lane.b32.xlu0 %v4140_v4, %s7085_s18  ;;  %804 = vrot.lane.b32.xlu2 %v4143_v5, %s7085_s18 }
  0xae   : > { %v719_v35 = vpop.permute.xlu1 %718  ;;  %v729_v36 = vpop.permute.xlu0 %728 }
  0xaf   : > { %v738_v37 = vsel %vm730_vm1, %v729_v36, %v721_v10  ;;  %v734_v38 = vsel %vm730_vm1, %v721_v10, %v729_v36  ;;  %v737_v39 = vsel %vm730_vm1, %v727_v15, %v719_v35  ;;  %v733_v40 = vsel %vm730_vm1, %v719_v35, %v727_v15  ;;  %v677_v44 = vpop.permute.xlu2 %676 }
  0xb0   : > { %v752_v41 = vmul.f32 %v4302_v33, %v738_v37  ;;  %v753_v42 = vmul.f32 %v4304_v34, %v734_v38  ;;  %v750_v43 = vmul.f32 %v4302_v33, %v737_v39  ;;  %v751_v45 = vmul.f32 %v4304_v34, %v733_v40 }
  0xb2   : > { %1003 = vmatpush.msra.mxu0 %v752_v41  ;;  %1126 = vmatpush.msra.mxu3 %v753_v42  ;;  %v3663_v41 = vld [vmem:[%s7076_s13 + $0x2] sm:$0x3] }
  0xb4   : > { %802 = vrot.lane.b32.xlu1 %v4152_v6, %s7085_s18  ;;  %1004 = vmatpush.msra.mxu0 %v750_v43  ;;  %v4392_v43 = vperm.slane %v3663_v41, 0 }
  0xb5   : > { %794 = vrot.lane.b32.xlu0 %v4155_v7, %s7085_s18  ;;  %1127 = vmatpush.msra.mxu3 %v751_v45  ;;  %s7222_s18 = smov 15  }
  0xb6   : > { %v725_v46 = vpop.permute.xlu1 %724  ;;  %v717_v47 = vpop.permute.xlu0 %716  ;;  %760 = vrot.lane.b32.xlu2 %v4122_v0, %s7091_s30 }
  0xb7   : > { %v736_v48 = vsel %vm730_vm1, %v725_v46, %v717_v47  ;;  %v732_v49 = vsel %vm730_vm1, %v717_v47, %v725_v46  ;;  %v683_v52 = vpop.permute.xlu2 %682 }
  0xb8   : > { %v748_v50 = vmul.f32 %v4302_v33, %v736_v48  ;;  %v749_v51 = vmul.f32 %v4304_v34, %v732_v49 }
  0xba   : > { %1005 = vmatpush.msra.mxu0 %v748_v50  ;;  %1128 = vmatpush.msra.mxu3 %v749_v51 }
  0xbc   : > { %758 = vrot.lane.b32.xlu1 %v4125_v1, %s7091_s30 }
  0xbd   : > { %768 = vrot.lane.b32.xlu0 %v4137_v3, %s7091_s30 }
  0xbe   : > { %v681_v56 = vpop.permute.xlu1 %680  ;;  %v723_v57 = vpop.permute.xlu0 %722  ;;  %766 = vrot.lane.b32.xlu2 %v4140_v4, %s7091_s30 }
  0xbf   : > { %v735_v58 = vsel %vm730_vm1, %v723_v57, %v4273_v23  ;;  %v731_v59 = vsel %vm730_vm1, %v4273_v23, %v723_v57  ;;  %v698_v60 = vsel %vm690_vm2, %v689_v31, %v681_v56  ;;  %v694_v61 = vsel %vm690_vm2, %v681_v56, %v689_v31  ;;  %v639_v11 = vpop.permute.xlu2 %638 }
  0xc0   : > { %v746_v62 = vmul.f32 %v4302_v33, %v735_v58  ;;  %v747_v63 = vmul.f32 %v4304_v34, %v731_v59  ;;  %v712_v10 = vmul.f32 %v4340_v54, %v698_v60  ;;  %v713_v15 = vmul.f32 %v4344_v55, %v694_v61 }
  0xc2   : > { %1006 = vmatpush.msra.mxu0 %v746_v62  ;;  %1129 = vmatpush.msra.mxu3 %v747_v63 }
  0xc4   : > { %764 = vrot.lane.b32.xlu1 %v4143_v5, %s7091_s30  ;;  %1007 = vmatpush.msra.mxu0 %v712_v10 }
  0xc5   : > { %756 = vrot.lane.b32.xlu0 %v4132_v2, %s7091_s30  ;;  %1130 = vmatpush.msra.mxu3 %v713_v15 }
  0xc6   : > { %v687_v20 = vpop.permute.xlu1 %686  ;;  %v679_v21 = vpop.permute.xlu0 %678  ;;  %754 = vrot.lane.b32.xlu2 %v4155_v7, %s7091_s30 }
  0xc7   : > { %v697_v22 = vsel %vm690_vm2, %v687_v20, %v679_v21  ;;  %v693_v23 = vsel %vm690_vm2, %v679_v21, %v687_v20  ;;  %v645_v26 = vpop.permute.xlu2 %644 }
  0xc8   : > { %v710_v24 = vmul.f32 %v4340_v54, %v697_v22  ;;  %v711_v25 = vmul.f32 %v4344_v55, %v693_v23 }
  0xca   : > { %1008 = vmatpush.msra.mxu0 %v710_v24  ;;  %1131 = vmatpush.msra.mxu3 %v711_v25  ;;  %v620_v24 = vld [vmem:[%s7076_s13] sm:$0x3]  ;;  %v4426_v25 = vld [vmem:[%s7205_s1 + $0x10] sm:$0xff] }
  0xcb   : > { %3670 = vmatmul.msk.f32.vlgmr.msra.gmra.mxu2 %vm978_vm4, %v4426_v25 }
  0xcd   : > { %762 = vrot.lane.b32.xlu0 %v4152_v6, %s7091_s30  ;;  %s7218_s30 = smov 16  }
  0xce   : > { %v675_v29 = vpop.permute.xlu1 %674  ;;  %v685_v30 = vpop.permute.xlu0 %684 }
  0xcf   : > { %v696_v31 = vsel %vm690_vm2, %v685_v30, %v677_v44  ;;  %v692_v32 = vsel %vm690_vm2, %v677_v44, %v685_v30  ;;  %v695_v35 = vsel %vm690_vm2, %v683_v52, %v675_v29  ;;  %v691_v36 = vsel %vm690_vm2, %v675_v29, %v683_v52  ;;  %v600_v42 = vpop.permute.xlu2 %599 }
  0xd0   : > { %v708_v37 = vmul.f32 %v4340_v54, %v696_v31  ;;  %v709_v38 = vmul.f32 %v4344_v55, %v692_v32  ;;  %v706_v39 = vmul.f32 %v4340_v54, %v695_v35  ;;  %v707_v40 = vmul.f32 %v4344_v55, %v691_v36 }
  0xd1   : > { %v4394_v44 = vperm.slane %v3663_v41, 1  ;;  %v4433_v29 = vperm.slane %v620_v24, 1 }
  0xd2   : > { %1009 = vmatpush.msra.mxu0 %v708_v37  ;;  %1132 = vmatpush.msra.mxu3 %v709_v38 }
  0xd3   : > { %7204 = vst [vmem:[#allocation14_spill] sm:$0xff] %v4394_v44 }
  0xd4   : > { %1010 = vmatpush.msra.mxu0 %v706_v39  ;;  %1133 = vmatpush.msra.mxu3 %v707_v40  ;;  %7206 = vst [vmem:[#allocation15_spill] sm:$0xff] %v4433_v29 }
  0xd6   : > { %v649_v45 = vpop.permute.xlu1 %648  ;;  %v641_v46 = vpop.permute.xlu0 %640 }
  0xd7   : > { %v658_v47 = vsel %vm650_vm3, %v649_v45, %v641_v46  ;;  %v654_v48 = vsel %vm650_vm3, %v641_v46, %v649_v45  ;;  %v606_v51 = vpop.permute.xlu2 %605 }
  0xd8   : > { %v672_v49 = vmul.f32 %v4392_v43, %v658_v47  ;;  %v673_v50 = vmul.f32 %v4394_v44, %v654_v48 }
  0xda   : > { %1011 = vmatpush.msra.mxu0 %v672_v49  ;;  %1134 = vmatpush.msra.mxu3 %v673_v50 }
  0xde   : > { %v637_v52 = vpop.permute.xlu1 %636  ;;  %v647_v53 = vpop.permute.xlu0 %646 }
  0xdf   : > { %v657_v56 = vsel %vm650_vm3, %v647_v53, %v639_v11  ;;  %v653_v57 = vsel %vm650_vm3, %v639_v11, %v647_v53  ;;  %v656_v58 = vsel %vm650_vm3, %v645_v26, %v637_v52  ;;  %v652_v59 = vsel %vm650_vm3, %v637_v52, %v645_v26  ;;  %v594_v10 = vpop.permute.xlu2 %593  ;;  %v3668_v52 = vld [vmem:[%s7076_s13 + $0xe] sm:$0x3] }
  0xe0   : > { %v670_v60 = vmul.f32 %v4392_v43, %v657_v56  ;;  %v671_v61 = vmul.f32 %v4394_v44, %v653_v57  ;;  %v668_v62 = vmul.f32 %v4392_v43, %v656_v58  ;;  %v669_v63 = vmul.f32 %v4394_v44, %v652_v59  ;;  %v4466_v56 = vld [vmem:[%s7205_s1 + $0x40] sm:$0xff] }
  0xe1   : > { %v4431_v26 = vperm.slane %v620_v24, 0  ;;  %v4469_v57 = vperm.slane %v3668_v52, 0  ;;  %v4471_v58 = vperm.slane %v3668_v52, 1  ;;  %v4476_v59 = vperm.slane %v4248_v16, 1 }
  0xe2   : > { %1012 = vmatpush.msra.mxu0 %v670_v60  ;;  %1135 = vmatpush.msra.mxu3 %v671_v61 }
  0xe3   : > { %7207 = vst [vmem:[#allocation16_spill] sm:$0xff] %v4469_v57 }
  0xe4   : > { %1013 = vmatpush.msra.mxu0 %v668_v62  ;;  %1136 = vmatpush.msra.mxu3 %v669_v63  ;;  %7208 = vst [vmem:[#allocation17_spill] sm:$0xff] %v4471_v58  ;;  %v898_v62 = vsel %vm890_vm0, %v4258_v18, %v4237_v12  ;;  %v897_v63 = vsel %vm890_vm0, %v4260_v19, %v4239_v13 }
  0xe5   : > { %7209 = vst [vmem:[#allocation18_spill] sm:$0xff] %v4476_v59  ;;  %v913_v19 = vmul.f32 %v4476_v59, %v898_v62  ;;  %v4557_v62 = vld [vmem:[%s7205_s1 + $0x88] sm:$0xff] }
  0xe6   : > { %v643_v11 = vpop.permute.xlu1 %642  ;;  %v635_v15 = vpop.permute.xlu0 %634 }
  0xe7   : > { %v655_v20 = vsel %vm650_vm3, %v643_v11, %v635_v15  ;;  %v651_v21 = vsel %vm650_vm3, %v635_v15, %v643_v11  ;;  %v849_v38 = vpop.permute.xlu2 %848 }
  0xe8   : > { %v666_v22 = vmul.f32 %v4392_v43, %v655_v20  ;;  %v667_v23 = vmul.f32 %v4394_v44, %v651_v21 }
  0xea   : > { %1014 = vmatpush.msra.mxu0 %v666_v22  ;;  %1137 = vmatpush.msra.mxu3 %v667_v23  ;;  %v911_v22 = vmul.f32 %v4476_v59, %v897_v63  ;;  %v914_v23 = vld [vmem:[%s7205_s1] sm:$0xff] }
  0xee   : > { %v598_v30 = vpop.permute.xlu1 %597  ;;  %v608_v31 = vpop.permute.xlu0 %607 }
  0xef   : > { %v619_v32 = vsel %vm611_vm5, %v608_v31, %v600_v42  ;;  %v615_v35 = vsel %vm611_vm5, %v600_v42, %v608_v31  ;;  %v618_v36 = vsel %vm611_vm5, %v606_v51, %v598_v30  ;;  %v614_v37 = vsel %vm611_vm5, %v598_v30, %v606_v51  ;;  %v4450_v42 = vld [vmem:[%s7205_s1 + $0x28] sm:$0xff]  ;;  %v837_v53 = vpop.permute.xlu2 %836  ;;  %v4510_v30 = vld [vmem:[%s7205_s1 + $0x58] sm:$0xff] }
  0xf0   : > { %v632_v39 = vmul.f32 %v4431_v26, %v619_v32  ;;  %v633_v40 = vmul.f32 %v4433_v29, %v615_v35  ;;  %v630_v41 = vmul.f32 %v4431_v26, %v618_v36  ;;  %v631_v45 = vmul.f32 %v4433_v29, %v614_v37  ;;  %3671 = vmatmul.msk.f32.gmra.mxu2 %vm978_vm4, %v4450_v42 }
  0xf2   : > { %1015 = vmatpush.msra.mxu0 %v632_v39  ;;  %1138 = vmatpush.msra.mxu3 %v633_v40  ;;  %v4532_v39 = vld [vmem:[%s7205_s1 + $0x70] sm:$0xff] }
  0xf4   : > { %1016 = vmatpush.msra.mxu0 %v630_v41  ;;  %1139 = vmatpush.msra.mxu3 %v631_v45 }
  0xf6   : > { %v604_v46 = vpop.permute.xlu1 %603  ;;  %v596_v47 = vpop.permute.xlu0 %595 }
  0xf7   : > { %v617_v48 = vsel %vm611_vm5, %v604_v46, %v596_v47  ;;  %v613_v49 = vsel %vm611_vm5, %v596_v47, %v604_v46  ;;  %v843_v24 = vpop.permute.xlu2 %842 }
  0xf8   : > { %v628_v50 = vmul.f32 %v4431_v26, %v617_v48  ;;  %v629_v51 = vmul.f32 %v4433_v29, %v613_v49  ;;  %3672 = vmatmul.msk.f32.gmra.mxu2 %vm978_vm4, %v4466_v56 }
  0xfa   : > { %1017 = vmatpush.msra.mxu0 %v628_v50  ;;  %1140 = vmatpush.msra.mxu3 %v629_v51 }
  0xfe   : > { %v841_v60 = vpop.permute.xlu1 %840  ;;  %v602_v61 = vpop.permute.xlu0 %601 }
  0xff   : > { %v616_v11 = vsel %vm611_vm5, %v602_v61, %v594_v10  ;;  %v612_v15 = vsel %vm611_vm5, %v594_v10, %v602_v61  ;;  %v854_v16 = vsel %vm850_vm6, %v841_v60, %v849_v38  ;;  %v858_v20 = vsel %vm850_vm6, %v849_v38, %v841_v60  ;;  %v917_v38 = vld [vmem:[%s7205_s1 + $0x18] sm:$0xff]  ;;  %v799_v40 = vpop.permute.xlu2 %798  ;;  %v920_v61 = vld [vmem:[%s7205_s1 + $0x30] sm:$0xff] }
 0x100   : > { %v626_v21 = vmul.f32 %v4431_v26, %v616_v11  ;;  %v627_v12 = vmul.f32 %v4433_v29, %v612_v15  ;;  %v872_v18 = vmul.f32 %v4469_v57, %v854_v16  ;;  %v873_v13 = vmul.f32 %v4471_v58, %v858_v20  ;;  %3673 = vmatmul.msk.f32.gmra.mxu2 %vm978_vm4, %v4510_v30  ;;  %v590_v20 = vld [vmem:[%s7212_s2 + $0x28] sm:$0xff] }
 0x101   : > { %v896_v10 = vsel %vm890_vm0, %v4225_v9, %v4217_v8  ;;  %v895_v8 = vsel %vm890_vm0, %v4285_v27, %v4287_v28  ;;  %v3965_v15 = vmov 0  }
 0x102   : > { %1018 = vmatpush.msra.mxu0 %v626_v21  ;;  %1141 = vmatpush.msra.mxu3 %v627_v12  ;;  %v909_v9 = vmul.f32 %v4476_v59, %v896_v10  ;;  %v907_v35 = vmul.f32 %v4476_v59, %v895_v8  ;;  %v585_v8 = vld [vmem:[%s7212_s2] sm:$0xff] }
 0x103   : > { %1044 = vmatpush.msra.mxu1 %v872_v18  ;;  %1167 = vmatpush.msrb.mxu2 %v873_v13 }
 0x104   : > { %1220 = vmatpush.msrb.mxu0 %v913_v19  ;;  %3763 = vmatpush.msrb.mxu3 %v913_v19 }
 0x105   : > { %1019 = vmatmul.f32.vlgmr.msra.gmra.mxu0 %v914_v23  ;;  %1142 = vmatmul.f32.vlgmr.msra.gmra.mxu3 %v914_v23  ;;  %v4581_v23 = vld [vmem:[%s7205_s1 + $0xa0] sm:$0xff] }
 0x106   : > { %1221 = vmatpush.msrb.mxu0 %v911_v22  ;;  %3764 = vmatpush.msrb.mxu3 %v911_v22  ;;  %v847_v31 = vpop.permute.xlu1 %846  ;;  %v839_v32 = vpop.permute.xlu0 %838  ;;  %v923_v22 = vld [vmem:[%s7205_s1 + $0x48] sm:$0xff] }
 0x107   : > { %v853_v36 = vsel %vm850_vm6, %v839_v32, %v847_v31  ;;  %v857_v27 = vsel %vm850_vm6, %v847_v31, %v839_v32  ;;  %3832 = vset.pattern.permute.xlu0 %v3965_v15  ;;  %3830 = vset.pattern.permute.xlu1 %v3965_v15  ;;  %v805_v13 = vpop.permute.xlu2 %804 }
 0x108   : > { %1222 = vmatpush.msrb.mxu0 %v909_v9  ;;  %3765 = vmatpush.msrb.mxu3 %v909_v9  ;;  %v870_v28 = vmul.f32 %v4469_v57, %v853_v36  ;;  %v871_v37 = vmul.f32 %v4471_v58, %v857_v27 }
 0x109   : > { %3674 = vmatmul.msk.f32.gmra.mxu2 %vm978_vm4, %v4532_v39  ;;  %965 = vperm.xlu0 %3832, %v590_v20   ;;  %v591_v20 = vld [vmem:[%s7212_s2 + $0x30] sm:$0xff] }
 0x10a   : > { %1223 = vmatpush.msrb.mxu0 %v907_v35  ;;  %3766 = vmatpush.msrb.mxu3 %v907_v35 }
 0x10b   : > { %1045 = vmatpush.msra.mxu1 %v870_v28  ;;  %1168 = vmatpush.msrb.mxu2 %v871_v37 }
 0x10c   : > { %3831 = vset.pattern.permute.xlu2 %v3965_v15 }
 0x10d   : > { %1022 = vmatmul.f32.gmra.mxu0 %v917_v38  ;;  %1145 = vmatmul.f32.gmra.mxu3 %v917_v38 }
 0x10e   : > { %v835_v41 = vpop.permute.xlu1 %834  ;;  %v845_v45 = vpop.permute.xlu0 %844  ;;  %970 = vperm.xlu2 %3831, %v591_v20  }
 0x10f   : > { %v852_v46 = vsel %vm850_vm6, %v837_v53, %v845_v45  ;;  %v856_v47 = vsel %vm850_vm6, %v845_v45, %v837_v53  ;;  %v851_v48 = vsel %vm850_vm6, %v835_v41, %v843_v24  ;;  %v855_v49 = vsel %vm850_vm6, %v843_v24, %v835_v41  ;;  %v3667_v53 = vld [vmem:[%s7076_s13 + $0xc] sm:$0x3]  ;;  %v592_v24 = vld [vmem:[%s7212_s2 + $0x38] sm:$0xff] }
 0x110   : > { %v868_v50 = vmul.f32 %v4469_v57, %v852_v46  ;;  %v869_v51 = vmul.f32 %v4471_v58, %v856_v47  ;;  %v866_v52 = vmul.f32 %v4469_v57, %v851_v48  ;;  %v867_v60 = vmul.f32 %v4471_v58, %v855_v49  ;;  %975 = vperm.xlu1 %3830, %v592_v24   ;;  %v761_v45 = vpop.permute.xlu2 %760  ;;  %v926_v46 = vld [vmem:[%s7205_s1 + $0x60] sm:$0xff] }
 0x111   : > { %v4560_v63 = vperm.slane %v3667_v53, 0  ;;  %v4562_v11 = vperm.slane %v3667_v53, 1  ;;  %3675 = vmatmul.msk.f32.gmra.mxu2 %vm978_vm4, %v4557_v62  ;;  %940 = vperm.xlu0 %3832, %v585_v8   ;;  %v589_v47 = vld [vmem:[%s7212_s2 + $0x20] sm:$0xff]  ;;  %v3666_v53 = vld [vmem:[%s7076_s13 + $0xa] sm:$0x3] }
 0x112   : > { %1046 = vmatpush.msra.mxu1 %v868_v50  ;;  %1169 = vmatpush.msrb.mxu2 %v869_v51 }
 0x113   : > { %7210 = vst [vmem:[#allocation19_spill] sm:$0xff] %v4560_v63 }
 0x114   : > { %1047 = vmatpush.msra.mxu1 %v866_v52  ;;  %1170 = vmatpush.msrb.mxu2 %v867_v60  ;;  %7211 = vst [vmem:[#allocation20_spill] sm:$0xff] %v4562_v11 }
 0x115   : > { %1025 = vmatmul.f32.gmra.mxu0 %v920_v61  ;;  %1148 = vmatmul.f32.gmra.mxu3 %v920_v61  ;;  %v929_v61 = vld [vmem:[%s7205_s1 + $0x78] sm:$0xff] }
 0x116   : > { %v809_v16 = vpop.permute.xlu1 %808 }
 0x117   : > { %v801_v21 = vpop.permute.xlu0 %800 }
 0x118   : > { %v814_v12 = vsel %vm810_vm7, %v801_v21, %v809_v16  ;;  %v818_v18 = vsel %vm810_vm7, %v809_v16, %v801_v21  ;;  %960 = vperm.xlu1 %3830, %v589_v47   ;;  %v767_v15 = vpop.permute.xlu2 %766  ;;  %v587_v16 = vld [vmem:[%s7212_s2 + $0x10] sm:$0xff]  ;;  %v4635_v21 = vperm.slane %v3666_v53, 0  ;;  %v586_v47 = vld [vmem:[%s7212_s2 + $0x8] sm:$0xff] }
 0x119   : > { %v832_v19 = vmul.f32 %v4560_v63, %v814_v12  ;;  %v833_v10 = vmul.f32 %v4562_v11, %v818_v18  ;;  %3676 = vmatmul.msk.f32.gmra.mxu2 %vm978_vm4, %v4581_v23  ;;  %v4637_v12 = vperm.slane %v3666_v53, 1 }
 0x11a   : > { %7213 = vst [vmem:[#allocation21_spill] sm:$0xff] %v4635_v21 }
 0x11b   : > { %1048 = vmatpush.msra.mxu1 %v832_v19  ;;  %1171 = vmatpush.msrb.mxu2 %v833_v10  ;;  %7214 = vst [vmem:[#allocation22_spill] sm:$0xff] %v4637_v12 }
 0x11d   : > { %1028 = vmatmul.f32.gmra.mxu0 %v923_v22  ;;  %1151 = vmatmul.f32.gmra.mxu3 %v923_v22 }
 0x11e   : > { %v797_v9 = vpop.permute.xlu1 %796 }
 0x11f   : > { %v807_v31 = vpop.permute.xlu0 %806  ;;  %v812_v32 = vsel %vm810_vm7, %v797_v9, %v805_v13  ;;  %v816_v35 = vsel %vm810_vm7, %v805_v13, %v797_v9 }
 0x120   : > { %v813_v36 = vsel %vm810_vm7, %v799_v40, %v807_v31  ;;  %v817_v27 = vsel %vm810_vm7, %v807_v31, %v799_v40  ;;  %v828_v38 = vmul.f32 %v4560_v63, %v812_v32  ;;  %v829_v41 = vmul.f32 %v4562_v11, %v816_v35  ;;  %v4609_v40 = vld [vmem:[%s7205_s1 + $0xb8] sm:$0xff]  ;;  %950 = vperm.xlu1 %3830, %v587_v16   ;;  %v932_v35 = vld [vmem:[%s7205_s1 + $0x90] sm:$0xff] }
 0x121   : > { %v830_v28 = vmul.f32 %v4560_v63, %v813_v36  ;;  %v831_v37 = vmul.f32 %v4562_v11, %v817_v27  ;;  %3677 = vmatmul.msk.f32.gmra.mxu2 %vm978_vm4, %v4609_v40  ;;  %v588_v36 = vld [vmem:[%s7212_s2 + $0x18] sm:$0xff]  ;;  %s7265_s2 = smov 113  }
 0x122   : > { %955 = vperm.xlu2 %3831, %v588_v36  }
 0x123   : > { %1049 = vmatpush.msra.mxu1 %v830_v28  ;;  %1172 = vmatpush.msrb.mxu2 %v831_v37 }
 0x125   : > { %1050 = vmatpush.msra.mxu1 %v828_v38  ;;  %1173 = vmatpush.msrb.mxu2 %v829_v41 }
 0x126   : > { %v803_v48 = vpop.permute.xlu1 %802  ;;  %1031 = vmatmul.f32.gmra.mxu0 %v926_v46  ;;  %1154 = vmatmul.f32.gmra.mxu3 %v926_v46  ;;  %v935_v46 = vld [vmem:[%s7205_s1 + $0xa8] sm:$0xff] }
 0x127   : > { %v795_v49 = vpop.permute.xlu0 %794 }
 0x128   : > { %v811_v50 = vsel %vm810_vm7, %v795_v49, %v803_v48  ;;  %v815_v51 = vsel %vm810_vm7, %v803_v48, %v795_v49  ;;  %v755_v48 = vpop.permute.xlu2 %754 }
 0x129   : > { %v826_v52 = vmul.f32 %v4560_v63, %v811_v50  ;;  %v827_v60 = vmul.f32 %v4562_v11, %v815_v51 }
 0x12a   : > { %945 = vperm.xlu2 %3831, %v586_v47  }
 0x12b   : > { %1051 = vmatpush.msra.mxu1 %v826_v52  ;;  %1174 = vmatpush.msrb.mxu2 %v827_v60 }
 0x12e   : > { %v759_v18 = vpop.permute.xlu1 %758  ;;  %1034 = vmatmul.f32.gmra.mxu0 %v929_v61  ;;  %1157 = vmatmul.f32.gmra.mxu3 %v929_v61 }
 0x12f   : > { %v769_v13 = vpop.permute.xlu0 %768  ;;  %v773_v19 = vsel %vm770_vm8, %v759_v18, %v767_v15  ;;  %v777_v10 = vsel %vm770_vm8, %v767_v15, %v759_v18 }
 0x130   : > { %v774_v22 = vsel %vm770_vm8, %v761_v45, %v769_v13  ;;  %v778_v24 = vsel %vm770_vm8, %v769_v13, %v761_v45  ;;  %v790_v31 = vmul.f32 %v4635_v21, %v773_v19  ;;  %v791_v32 = vmul.f32 %v4637_v12, %v777_v10 }
 0x131   : > { %v792_v8 = vmul.f32 %v4635_v21, %v774_v22  ;;  %v793_v9 = vmul.f32 %v4637_v12, %v778_v24 }
 0x133   : > { %1052 = vmatpush.msra.mxu1 %v792_v8  ;;  %1175 = vmatpush.msrb.mxu2 %v793_v9 }
 0x135   : > { %1053 = vmatpush.msra.mxu1 %v790_v31  ;;  %1176 = vmatpush.msrb.mxu2 %v791_v32 }
 0x136   : > { %v765_v27 = vpop.permute.xlu1 %764  ;;  %1037 = vmatmul.f32.gmra.mxu0 %v932_v35  ;;  %1160 = vmatmul.f32.gmra.mxu3 %v932_v35 }
 0x137   : > { %v757_v28 = vpop.permute.xlu0 %756 }
 0x138   : > { %v772_v37 = vsel %vm770_vm8, %v757_v28, %v765_v27  ;;  %v776_v38 = vsel %vm770_vm8, %v765_v27, %v757_v28 }
 0x139   : > { %v788_v41 = vmul.f32 %v4635_v21, %v772_v37  ;;  %v789_v45 = vmul.f32 %v4637_v12, %v776_v38 }
 0x13b   : > { %1054 = vmatpush.msra.mxu1 %v788_v41  ;;  %1177 = vmatpush.msrb.mxu2 %v789_v45 }
 0x13e   : > { %1040 = vmatmul.f32.gmra.mxu0 %v935_v46  ;;  %1163 = vmatmul.f32.gmra.mxu3 %v935_v46 }
 0x13f   : > { %v763_v49 = vpop.permute.xlu0 %762 }
 0x140   : > { %v771_v50 = vsel %vm770_vm8, %v755_v48, %v763_v49  ;;  %v775_v51 = vsel %vm770_vm8, %v763_v49, %v755_v48 }
 0x141   : > { %v786_v52 = vmul.f32 %v4635_v21, %v771_v50  ;;  %v787_v60 = vmul.f32 %v4637_v12, %v775_v51 }
 0x143   : > { %1055 = vmatpush.msra.mxu1 %v786_v52  ;;  %1178 = vmatpush.msrb.mxu2 %v787_v60 }
 0x145   : > { %1056 = vmatpush.msra.mxu1 %v4122_v0  ;;  %1179 = vmatpush.msrb.mxu2 %v4137_v3  ;;  %v915_v0 = vld [vmem:[%s7205_s1 + $0x8] sm:$0xff]  ;;  %v924_v3 = vld [vmem:[%s7205_s1 + $0x50] sm:$0xff] }
 0x146   : > { %3678 = vmatmul.msk.f32.vlgmr.msrb.gmra.mxu0 %vm978_vm4, %v4426_v25  ;;  %3682 = vmatmul.msk.f32.vlgmr.msrb.gmra.mxu3 %vm978_vm4, %v4532_v39  ;;  %v936_v25 = vld [vmem:[%s7205_s1 + $0xb0] sm:$0xff] }
 0x147   : > { %1057 = vmatpush.msra.mxu1 %v4125_v1  ;;  %1180 = vmatpush.msrb.mxu2 %v4140_v4  ;;  %v918_v1 = vld [vmem:[%s7205_s1 + $0x20] sm:$0xff]  ;;  %v927_v4 = vld [vmem:[%s7205_s1 + $0x68] sm:$0xff] }
 0x149   : > { %1058 = vmatpush.msra.mxu1 %v4132_v2  ;;  %1181 = vmatpush.msrb.mxu2 %v4143_v5  ;;  %v921_v2 = vld [vmem:[%s7205_s1 + $0x38] sm:$0xff]  ;;  %v930_v5 = vld [vmem:[%s7205_s1 + $0x80] sm:$0xff] }
 0x14b   : > { %1059 = vmatpush.msra.mxu1 %v4155_v7  ;;  %1182 = vmatpush.msrb.mxu2 %v4152_v6  ;;  %v933_v6 = vld [vmem:[%s7205_s1 + $0x98] sm:$0xff]  ;;  %s7260_s1 = smov 111  }
 0x14c   : > { %1060 = vmatmul.f32.vlgmr.msra.gmra.mxu1 %v915_v0  ;;  %1183 = vmatmul.f32.vlgmr.msrb.gmra.mxu2 %v915_v0 }
 0x14e   : > { %3679 = vmatmul.msk.f32.gmra.mxu0 %vm978_vm4, %v4450_v42  ;;  %3683 = vmatmul.msk.f32.gmra.mxu3 %vm978_vm4, %v4557_v62  ;;  %v4720_v7 = vpop.f32.mrf.mxu2 }
 0x154   : > { %1063 = vmatmul.f32.gmra.mxu1 %v918_v1  ;;  %1186 = vmatmul.f32.gmra.mxu2 %v918_v1 }
 0x156   : > { %3680 = vmatmul.msk.f32.gmra.mxu0 %vm978_vm4, %v4466_v56  ;;  %3684 = vmatmul.msk.f32.gmra.mxu3 %vm978_vm4, %v4581_v23 }
 0x15c   : > { %1066 = vmatmul.f32.gmra.mxu1 %v921_v2  ;;  %1189 = vmatmul.f32.gmra.mxu2 %v921_v2 }
 0x15e   : > { %3681 = vmatmul.msk.f32.gmra.mxu0 %vm978_vm4, %v4510_v30  ;;  %3685 = vmatmul.msk.f32.gmra.mxu3 %vm978_vm4, %v4609_v40 }
 0x164   : > { %1069 = vmatmul.f32.gmra.mxu1 %v924_v3  ;;  %1192 = vmatmul.f32.gmra.mxu2 %v924_v3 }
 0x168   : > { %v971_v46 = vpop.permute.xlu2 %970 }
 0x16c   : > { %1072 = vmatmul.f32.gmra.mxu1 %v927_v4  ;;  %1195 = vmatmul.f32.gmra.mxu2 %v927_v4 }
 0x173   : > { %v4725_v42 = vpop.f32.mrf.mxu2 }
 0x174   : > { %1075 = vmatmul.f32.gmra.mxu1 %v930_v5  ;;  %1198 = vmatmul.f32.gmra.mxu2 %v930_v5 }
 0x17b   : > { %v4727_v56 = vpop.f32.mrf.mxu2  ;;  %v966_v11 = vpop.permute.xlu0 %965 }
 0x17c   : > { %1078 = vmatmul.f32.gmra.mxu1 %v933_v6  ;;  %1201 = vmatmul.f32.gmra.mxu2 %v933_v6  ;;  %v956_v60 = vpop.permute.xlu2 %955 }
 0x182   : > { %v4733_v62 = vpop.f32.mrf.mxu0  ;;  %v976_v41 = vpop.permute.xlu1 %975 }
 0x183   : > { %v4731_v39 = vpop.f32.mrf.mxu2 }
 0x184   : > { %1081 = vmatmul.f32.gmra.mxu1 %v936_v25  ;;  %1204 = vmatmul.f32.gmra.mxu2 %v936_v25 }
 0x188   : > { %v4729_v30 = vpop.f32.mrf.mxu3 }
 0x18a   : > { %v1023_v53 = vpop.f32.mrf.mxu0  ;;  %v961_v51 = vpop.permute.xlu1 %960 }
 0x18c   : > { %v1114_v40 = vpop.f32.mrf.mxu2 }
 0x190   : > { %v1146_v23 = vpop.f32.mrf.mxu3 }
 0x192   : > { %v4737_v16 = vpop.f32.mrf.mxu0 }
 0x194   : > { %v1117_v15 = vpop.f32.mrf.mxu2 }
 0x198   : > { %v4735_v61 = vpop.f32.mrf.mxu3 }
 0x19a   : > { %v4743_v13 = vpop.f32.mrf.mxu0 }
 0x19c   : > { %v4741_v18 = vpop.f32.mrf.mxu2 }
 0x1a0   : > { %v4739_v20 = vpop.f32.mrf.mxu3 }
 0x1a3   : > { %v1032_v22 = vpop.f32.mrf.mxu0 }
 0x1a4   : > { %v4745_v10 = vpop.f32.mrf.mxu2  ;;  %v1033_v52 = vadd.f32 %v1032_v22, %v961_v51 }
 0x1a9   : > { %v1155_v19 = vpop.f32.mrf.mxu3 }
 0x1aa   : > { %v1156_v0 = vadd.f32 %v1155_v19, %v961_v51  ;;  %v946_v19 = vpop.permute.xlu2 %945 }
 0x1ab   : > { %v1035_v31 = vpop.f32.mrf.mxu0 }
 0x1ac   : > { %v1036_v55 = vadd.f32 %v1035_v31, %v966_v11 }
 0x1b1   : > { %v1158_v8 = vpop.f32.mrf.mxu3 }
 0x1b2   : > { %v1159_v63 = vadd.f32 %v1158_v8, %v966_v11  ;;  %v951_v8 = vpop.permute.xlu1 %950 }
 0x1b3   : > { %v1038_v28 = vpop.f32.mrf.mxu0 }
 0x1b9   : > { %v1161_v35 = vpop.f32.mrf.mxu3 }
 0x1bb   : > { %v1041_v47 = vpop.f32.mrf.mxu0 }
 0x1c1   : > { %v1164_v38 = vpop.f32.mrf.mxu3 }
 0x1c3   : > { %v4755_v2 = vpop.f32.mrf.mxu0 }
 0x1c9   : > { %v4747_v24 = vpop.f32.mrf.mxu1  ;;  %v1237_v50 = vpop.f32.mrf.mxu3 }
 0x1cf   : > { %v4749_v9 = vpop.f32.mrf.mxu2 }
 0x1d1   : > { %v1064_v32 = vpop.f32.mrf.mxu1  ;;  %v1240_v12 = vpop.f32.mrf.mxu3 }
 0x1d7   : > { %v1187_v36 = vpop.f32.mrf.mxu2 }
 0x1d9   : > { %v1067_v27 = vpop.f32.mrf.mxu1  ;;  %v1243_v59 = vpop.f32.mrf.mxu3 }
 0x1df   : > { %v1190_v37 = vpop.f32.mrf.mxu2 }
 0x1e1   : > { %v4751_v45 = vpop.f32.mrf.mxu1 }
 0x1e7   : > { %v4753_v48 = vpop.f32.mrf.mxu2 }
 0x1e9   : > { %v1073_v49 = vpop.f32.mrf.mxu1 }
 0x1ea   : > { %v1074_v1 = vadd.f32 %v1073_v49, %v1033_v52  ;;  %v1228_v52 = vpop.f32.mrf.mxu0 }
 0x1ec   : > { %v4759_v25 = vadd.f32 %v1114_v40, %v1074_v1  ;;  %v1024_v40 = vadd.f32 %v1023_v53, %v946_v19  ;;  %v1039_v1 = vadd.f32 %v1038_v28, %v971_v46  ;;  %v1042_v28 = vadd.f32 %v1041_v47, %v976_v41 }
 0x1ee   : > { %v1065_v11 = vadd.f32 %v1064_v32, %v1024_v40  ;;  %v1027_v32 = vadd.f32 %v4737_v16, %v951_v8 }
 0x1ef   : > { %v1196_v3 = vpop.f32.mrf.mxu2 }
 0x1f0   : > { %v1197_v4 = vadd.f32 %v1196_v3, %v1156_v0  ;;  %v1147_v0 = vadd.f32 %v1146_v23, %v946_v19  ;;  %v1165_v19 = vadd.f32 %v1164_v38, %v976_v41 }
 0x1f1   : > { %v1076_v5 = vpop.f32.mrf.mxu1 }
 0x1f2   : > { %v4757_v6 = vadd.f32 %v1237_v50, %v1197_v4  ;;  %v1077_v22 = vadd.f32 %v1076_v5, %v1036_v55  ;;  %v1188_v4 = vadd.f32 %v1187_v36, %v1147_v0  ;;  %v1162_v55 = vadd.f32 %v1161_v35, %v971_v46  ;;  %v1231_v35 = vpop.f32.mrf.mxu0 }
 0x1f3   : > { %v4778_v36 = vadd.f32 %v4725_v42, %v1065_v11  ;;  %v1246_v42 = vpop.f32.mrf.mxu3 }
 0x1f4   : > { %v1277_v58 = vadd.f32 %v4757_v6, %v4759_v25  ;;  %v4765_v50 = vadd.f32 %v1117_v15, %v1077_v22  ;;  %v4769_v5 = vadd.f32 %v1228_v52, %v1188_v4  ;;  %v1153_v52 = vadd.f32 %v4739_v20, %v956_v60 }
 0x1f6   : > { %1278 = vadd.xlane.f32.xlu2 %v1277_v58  ;;  %v1194_v38 = vadd.f32 %v4753_v48, %v1153_v52  ;;  %v4877_v52 = vld [vmem:[%s7075_s12 + $0x30] sm:$0xff] }
 0x1f7   : > { %v1199_v49 = vpop.f32.mrf.mxu2 }
 0x1f8   : > { %v1200_v51 = vadd.f32 %v1199_v49, %v1159_v63 }
 0x1f9   : > { %v1079_v34 = vpop.f32.mrf.mxu1 }
 0x1fa   : > { %v4763_v3 = vadd.f32 %v1240_v12, %v1200_v51  ;;  %v1080_v58 = vadd.f32 %v1079_v34, %v1039_v1  ;;  %v1150_v12 = vadd.f32 %v4735_v61, %v951_v8  ;;  %v1268_v61 = vadd.f32 %v4769_v5, %v4778_v36  ;;  %v1234_v1 = vpop.f32.mrf.mxu0 }
 0x1fb   : > { %v4803_v4 = vadd.f32 %v1234_v1, %v1194_v38 }
 0x1fc   : > { %v1280_v31 = vadd.f32 %v4763_v3, %v4765_v50  ;;  %v4775_v53 = vadd.f32 %v4741_v18, %v1080_v58  ;;  %v1191_v46 = vadd.f32 %v1190_v37, %v1150_v12 }
 0x1fe   : > { %1281 = vadd.xlane.f32.xlu0 %v1280_v31  ;;  %v4785_v51 = vadd.f32 %v1231_v35, %v1191_v46 }
 0x1ff   : > { %v1202_v63 = vpop.f32.mrf.mxu2 }
 0x200   : > { %v1203_v23 = vadd.f32 %v1202_v63, %v1162_v55 }
 0x201   : > { %v1082_v34 = vpop.f32.mrf.mxu1 }
 0x202   : > { %v4772_v15 = vadd.f32 %v1243_v59, %v1203_v23  ;;  %v1068_v59 = vadd.f32 %v1067_v27, %v1027_v32  ;;  %v1083_v49 = vadd.f32 %v1082_v34, %v1042_v28  ;;  %v1030_v27 = vadd.f32 %v4743_v13, %v956_v60 }
 0x203   : > { %v3966_v23 = vmov 2048.0  }
 0x204   : > { %v1283_v22 = vadd.f32 %v4772_v15, %v4775_v53  ;;  %v4791_v37 = vadd.f32 %v4745_v10, %v1083_v49  ;;  %v4794_v0 = vadd.f32 %v4727_v56, %v1068_v59  ;;  %v1071_v20 = vadd.f32 %v4751_v45, %v1030_v27  ;;  %v941_v10 = vpop.permute.xlu0 %940  ;;  %v4835_v59 = vld [vmem:[%s7075_s12] sm:$0xff]  ;;  %v4849_v49 = vld [vmem:[%s7075_s12 + $0x10] sm:$0xff]  ;;  %v4884_v27 = vld [vmem:[%s7075_s12 + $0x38] sm:$0xff] }
 0x205   : > { %v1144_v56 = vadd.f32 %v4729_v30, %v941_v10  ;;  %v1021_v48 = vadd.f32 %v4733_v62, %v941_v10  ;;  %3833 = vrcp.f32 %v3966_v23 }
 0x206   : > { %1284 = vadd.xlane.f32.xlu2 %v1283_v22  ;;  %1269 = vadd.xlane.f32.xlu0 %v1268_v61  ;;  %v1271_v40 = vadd.f32 %v4785_v51, %v4794_v0  ;;  %v4807_v13 = vadd.f32 %v4731_v39, %v1071_v20 }
 0x207   : > { %v1205_v18 = vpop.f32.mrf.mxu2  ;;  %v1185_v60 = vadd.f32 %v4749_v9, %v1144_v56  ;;  %v1062_v11 = vadd.f32 %v4747_v24, %v1021_v48 }
 0x208   : > { %v1206_v16 = vadd.f32 %v1205_v18, %v1165_v19  ;;  %v1274_v31 = vadd.f32 %v4803_v4, %v4807_v13  ;;  %v4842_v19 = vld [vmem:[%s7075_s12 + $0x8] sm:$0xff]  ;;  %v4856_v18 = vld [vmem:[%s7075_s12 + $0x18] sm:$0xff] }
 0x209   : > { %v4815_v45 = vadd.f32 %v4755_v2, %v1185_v60  ;;  %v4818_v55 = vadd.f32 %v4720_v7, %v1062_v11  ;;  %v4825_v7 = vld [vmem:[%s7074_s11] sm:$0xff] }
 0x20a   : > { %v4788_v47 = vadd.f32 %v1246_v42, %v1206_v16  ;;  %v4863_v42 = vld [vmem:[%s7075_s12 + $0x20] sm:$0xff]  ;;  %v4870_v16 = vld [vmem:[%s7075_s12 + $0x28] sm:$0xff] }
 0x20b   : > { %v1265_v30 = vadd.f32 %v4815_v45, %v4818_v55  ;;  %v3834_v12 = vpop.eup %3833 }
 0x20c   : > { %v1286_v41 = vadd.f32 %v4788_v47, %v4791_v37  ;;  %v1315_v32 = vmul.f32 2048.0, %v3834_v12  ;;  %vm1319_vm10 = vweird.f32 %v3834_v12 }
 0x20e   : > { %1287 = vadd.xlane.f32.xlu1 %v1286_v41  ;;  %1272 = vadd.xlane.f32.xlu2 %v1271_v40  ;;  %v1316_v35 = vsub.f32 1.0, %v1315_v32 }
 0x210   : > { %v1317_v34 = vmul.f32 %v3834_v12, %v1316_v35 }
 0x212   : > { %v1318_v28 = vadd.f32 %v3834_v12, %v1317_v34 }
 0x214   : > { %v4829_v46 = vsel %vm1319_vm10, %v3834_v12, %v1318_v28 }
 0x215   : > { %7215 = vst [vmem:[#allocation23_spill] sm:$0xff] %v4829_v46 }
 0x216   : > { %1275 = vadd.xlane.f32.xlu1 %v1274_v31 }
 0x21e   : > { %1266 = vadd.xlane.f32.xlu1 %v1265_v30 }
 0x269   : > { %v1279_v39 = vpop.xlane.xlu2 %1278 }
 0x271   : > { %v1282_v9 = vpop.xlane.xlu0 %1281 }
 0x279   : > { %v1285_v62 = vpop.xlane.xlu2 %1284  ;;  %v1270_v2 = vpop.xlane.xlu0 %1269 }
 0x281   : > { %v1288_v58 = vpop.xlane.xlu1 %1287  ;;  %v1273_v8 = vpop.xlane.xlu2 %1272 }
 0x282   : > { %1302 = vmatpush.msrb.mxu1 %v1288_v58 }
 0x284   : > { %1303 = vmatpush.msrb.mxu1 %v1285_v62 }
 0x286   : > { %1304 = vmatpush.msrb.mxu1 %v1282_v9 }
 0x288   : > { %1305 = vmatpush.msrb.mxu1 %v1279_v39 }
 0x289   : > { %v1276_v24 = vpop.xlane.xlu1 %1275 }
 0x28a   : > { %1306 = vmatpush.msrb.mxu1 %v1276_v24 }
 0x28c   : > { %1307 = vmatpush.msrb.mxu1 %v1273_v8 }
 0x28e   : > { %1308 = vmatpush.msrb.mxu1 %v1270_v2 }
 0x291   : > { %v1267_v63 = vpop.xlane.xlu1 %1266 }
 0x292   : > { %1309 = vmatpush.msrb.mxu1 %v1267_v63 }
 0x293   : > { %3686 = vmatmul.msk.f32.vlgmr.msrb.gmra.mxu1 %vm1290_vm9, %v4825_v7 }
 0x310   : > { %v1311_v22 = vpop.f32.mrf.mxu1 }
 0x311   : > { %v1321_v61 = vmul.f32 %v4829_v46, %v1311_v22 }
 0x313   : > { %1370 = vmatpush.msra.mxu3 %v1321_v61 }
 0x314   : > { %3687 = vmatmul.msk.f32.vlgmr.msra.gmra.mxu3 %vm1330_vm11, %v4835_v59 }
 0x31c   : > { %3688 = vmatmul.msk.f32.gmra.mxu3 %vm1330_vm11, %v4842_v19 }
 0x324   : > { %3689 = vmatmul.msk.f32.gmra.mxu3 %vm1330_vm11, %v4849_v49 }
 0x32c   : > { %3690 = vmatmul.msk.f32.gmra.mxu3 %vm1330_vm11, %v4856_v18 }
 0x334   : > { %3691 = vmatmul.msk.f32.gmra.mxu3 %vm1330_vm11, %v4863_v42 }
 0x33c   : > { %3692 = vmatmul.msk.f32.gmra.mxu3 %vm1330_vm11, %v4870_v16 }
 0x344   : > { %3693 = vmatmul.msk.f32.gmra.mxu3 %vm1330_vm11, %v4877_v52 }
 0x34c   : > { %3694 = vmatmul.msk.f32.gmra.mxu3 %vm1330_vm11, %v4884_v27 }
 0x397   : > { %v1372_v38 = vpop.f32.mrf.mxu3 }
 0x39f   : > { %v1375_v41 = vpop.f32.mrf.mxu3 }
 0x3a7   : > { %v1378_v40 = vpop.f32.mrf.mxu3 }
 0x3af   : > { %v1381_v1 = vpop.f32.mrf.mxu3 }
 0x3b7   : > { %v1384_v20 = vpop.f32.mrf.mxu3 }
 0x3bf   : > { %v1387_v10 = vpop.f32.mrf.mxu3 }
 0x3c0   : > { %1423 = vperm.xlu1 %3830, %v1387_v10  }
 0x3c7   : > { %v1390_v56 = vpop.f32.mrf.mxu3 }
 0x3c8   : > { %1408 = vperm.xlu1 %3830, %v1378_v40   ;;  %1428 = vperm.xlu0 %3832, %v1390_v56  }
 0x3cf   : > { %v1393_v48 = vpop.f32.mrf.mxu3 }
 0x3d0   : > { %1418 = vperm.xlu0 %3832, %v1384_v20   ;;  %1433 = vperm.xlu2 %3831, %v1393_v48  }
 0x3d8   : > { %1403 = vperm.xlu0 %3832, %v1375_v41   ;;  %1413 = vperm.xlu2 %3831, %v1381_v1  }
 0x3e0   : > { %1398 = vperm.xlu2 %3831, %v1372_v38  }
 0x42a   : > { %v1434_v60 = vpop.permute.xlu2 %1433 }
 0x42b   : > { %v4889_v31 = vsub.f32 %v4791_v37, %v1434_v60  ;;  %v4892_v11 = vsub.f32 %v4788_v47, %v1434_v60 }
 0x42d   : > { %v1466_v30 = vmul.f32 %v4889_v31, %v4889_v31  ;;  %v1467_v39 = vmul.f32 %v4892_v11, %v4892_v11 }
 0x42f   : > { %v1489_v62 = vadd.f32 %v1467_v39, %v1466_v30 }
 0x431   : > { %1490 = vadd.xlane.f32.xlu1 %v1489_v62 }
 0x432   : > { %v1424_v58 = vpop.permute.xlu1 %1423  ;;  %v1414_v2 = vpop.permute.xlu2 %1413 }
 0x433   : > { %v4899_v9 = vsub.f32 %v4765_v50, %v1424_v58  ;;  %v4902_v24 = vsub.f32 %v4763_v3, %v1424_v58 }
 0x435   : > { %v1462_v37 = vmul.f32 %v4899_v9, %v4899_v9  ;;  %v1463_v47 = vmul.f32 %v4902_v24, %v4902_v24 }
 0x437   : > { %v1483_v8 = vadd.f32 %v1463_v47, %v1462_v37  ;;  %v1264_v47 = vld [vmem:[%s7067_s4 + $0x38] sm:$0xff] }
 0x439   : > { %1484 = vadd.xlane.f32.xlu2 %v1483_v8  ;;  %v1255_v8 = vld [vmem:[%s7066_s3 + $0x30] sm:$0xff] }
 0x43a   : > { %v1409_v63 = vpop.permute.xlu1 %1408  ;;  %v1429_v23 = vpop.permute.xlu0 %1428 }
 0x43b   : > { %v4909_v12 = vsub.f32 %v4794_v0, %v1409_v63  ;;  %v4912_v50 = vsub.f32 %v4785_v51, %v1409_v63  ;;  %v4915_v3 = vsub.f32 %v4775_v53, %v1429_v23  ;;  %v4918_v32 = vsub.f32 %v4772_v15, %v1429_v23  ;;  %v1399_v1 = vpop.permute.xlu2 %1398  ;;  %v1254_v63 = vld [vmem:[%s7066_s3 + $0x28] sm:$0xff] }
 0x43c   : > { %v4929_v51 = vsub.f32 %v4807_v13, %v1414_v2  ;;  %v4932_v53 = vsub.f32 %v4803_v4, %v1414_v2  ;;  %v4949_v10 = vsub.f32 %v4818_v55, %v1399_v1  ;;  %v1263_v2 = vld [vmem:[%s7067_s4 + $0x30] sm:$0xff]  ;;  %v1262_v23 = vld [vmem:[%s7067_s4 + $0x28] sm:$0xff] }
 0x43d   : > { %v1464_v35 = vmul.f32 %v4915_v3, %v4915_v3  ;;  %v1465_v34 = vmul.f32 %v4918_v32, %v4918_v32  ;;  %v1456_v28 = vmul.f32 %v4909_v12, %v4909_v12  ;;  %v1457_v0 = vmul.f32 %v4912_v50, %v4912_v50 }
 0x43e   : > { %v1458_v40 = vmul.f32 %v4929_v51, %v4929_v51  ;;  %v1459_v13 = vmul.f32 %v4932_v53, %v4932_v53  ;;  %v1452_v39 = vmul.f32 %v4949_v10, %v4949_v10 }
 0x43f   : > { %v1486_v15 = vadd.f32 %v1465_v34, %v1464_v35  ;;  %v1474_v22 = vadd.f32 %v1457_v0, %v1456_v28  ;;  %v1253_v35 = vld [vmem:[%s7066_s3 + $0x20] sm:$0xff]  ;;  %v1252_v28 = vld [vmem:[%s7066_s3 + $0x18] sm:$0xff] }
 0x440   : > { %v1477_v56 = vadd.f32 %v1459_v13, %v1458_v40  ;;  %v1261_v34 = vld [vmem:[%s7067_s4 + $0x20] sm:$0xff]  ;;  %v1260_v0 = vld [vmem:[%s7067_s4 + $0x18] sm:$0xff]  ;;  %v1258_v13 = vld [vmem:[%s7067_s4 + $0x8] sm:$0xff] }
 0x441   : > { %1487 = vadd.xlane.f32.xlu0 %v1486_v15  ;;  %1475 = vadd.xlane.f32.xlu2 %v1474_v22  ;;  %v1251_v15 = vld [vmem:[%s7066_s3 + $0x10] sm:$0xff]  ;;  %v1257_v40 = vld [vmem:[%s7067_s4] sm:$0xff] }
 0x442   : > { %v1419_v61 = vpop.permute.xlu0 %1418  ;;  %v1259_v22 = vld [vmem:[%s7067_s4 + $0x10] sm:$0xff] }
 0x443   : > { %v4935_v38 = vsub.f32 %v4759_v25, %v1419_v61  ;;  %v4938_v41 = vsub.f32 %v4757_v6, %v1419_v61  ;;  %v4952_v25 = vsub.f32 %v4815_v45, %v1399_v1  ;;  %v1250_v61 = vld [vmem:[%s7066_s3 + $0x8] sm:$0xff] }
 0x445   : > { %v1460_v4 = vmul.f32 %v4935_v38, %v4935_v38  ;;  %v1461_v20 = vmul.f32 %v4938_v41, %v4938_v41  ;;  %v1453_v55 = vmul.f32 %v4952_v25, %v4952_v25 }
 0x447   : > { %v1480_v6 = vadd.f32 %v1461_v20, %v1460_v4  ;;  %v1468_v37 = vadd.f32 %v1453_v55, %v1452_v39 }
 0x449   : > { %1481 = vadd.xlane.f32.xlu1 %v1480_v6  ;;  %1478 = vadd.xlane.f32.xlu0 %v1477_v56 }
 0x44a   : > { %v1404_v48 = vpop.permute.xlu0 %1403 }
 0x44b   : > { %v4955_v60 = vsub.f32 %v4778_v36, %v1404_v48  ;;  %v4958_v30 = vsub.f32 %v4769_v5, %v1404_v48  ;;  %v1249_v5 = vld [vmem:[%s7066_s3] sm:$0xff]  ;;  %v1256_v36 = vld [vmem:[%s7066_s3 + $0x38] sm:$0xff] }
 0x44d   : > { %v1454_v45 = vmul.f32 %v4955_v60, %v4955_v60  ;;  %v1455_v62 = vmul.f32 %v4958_v30, %v4958_v30 }
 0x44f   : > { %v1471_v58 = vadd.f32 %v1455_v62, %v1454_v45 }
 0x451   : > { %1472 = vadd.xlane.f32.xlu1 %v1471_v58  ;;  %1469 = vadd.xlane.f32.xlu0 %v1468_v37 }
 0x459   : > { %1623 = vperm.xlu2 %3831, %v1249_v5  }
 0x465   : > { %1658 = vperm.xlu0 %3832, %v1256_v36  }
 0x46a   : > { %1714 = vperm.xlu1 %3830, %v1264_v47  }
 0x46d   : > { %1653 = vperm.xlu0 %3832, %v1255_v8  }
 0x472   : > { %1709 = vperm.xlu1 %3830, %v1263_v2  }
 0x475   : > { %1648 = vperm.xlu0 %3832, %v1254_v63  }
 0x47a   : > { %1704 = vperm.xlu1 %3830, %v1262_v23  }
 0x47d   : > { %1643 = vperm.xlu0 %3832, %v1253_v35  }
 0x482   : > { %1699 = vperm.xlu1 %3830, %v1261_v34  }
 0x485   : > { %1638 = vperm.xlu0 %3832, %v1252_v28  }
 0x48a   : > { %1694 = vperm.xlu1 %3830, %v1260_v0  }
 0x48d   : > { %1633 = vperm.xlu0 %3832, %v1251_v15  }
 0x492   : > { %1689 = vperm.xlu1 %3830, %v1259_v22  }
 0x495   : > { %1628 = vperm.xlu0 %3832, %v1250_v61  }
 0x49a   : > { %1679 = vperm.xlu1 %3830, %v1257_v40  }
 0x49d   : > { %1684 = vperm.xlu0 %3832, %v1258_v13  }
 0x4a4   : > { %v1491_v1 = vpop.xlane.xlu1 %1490 }
 0x4a5   : > { %1500 = vmatpush.msra.mxu1 %v1491_v1 }
 0x4ac   : > { %v1485_v20 = vpop.xlane.xlu2 %1484 }
 0x4b4   : > { %v1488_v4 = vpop.xlane.xlu0 %1487  ;;  %v1476_v48 = vpop.xlane.xlu2 %1475 }
 0x4b5   : > { %1501 = vmatpush.msra.mxu1 %v1488_v4 }
 0x4b7   : > { %1502 = vmatpush.msra.mxu1 %v1485_v20 }
 0x4bc   : > { %v1482_v6 = vpop.xlane.xlu1 %1481  ;;  %v1479_v56 = vpop.xlane.xlu0 %1478 }
 0x4bd   : > { %1503 = vmatpush.msra.mxu1 %v1482_v6  ;;  %v1624_v40 = vpop.permute.xlu2 %1623 }
 0x4bf   : > { %1504 = vmatpush.msra.mxu1 %v1479_v56 }
 0x4c1   : > { %1505 = vmatpush.msra.mxu1 %v1476_v48 }
 0x4c4   : > { %v1473_v39 = vpop.xlane.xlu1 %1472  ;;  %v1470_v55 = vpop.xlane.xlu0 %1469 }
 0x4c5   : > { %1506 = vmatpush.msra.mxu1 %v1473_v39 }
 0x4c7   : > { %1507 = vmatpush.msra.mxu1 %v1470_v55 }
 0x4c8   : > { %3695 = vmatmul.msk.f32.vlgmr.msra.gmra.mxu1 %vm1290_vm9, %v4825_v7 }
 0x4d7   : > { %v5039_v35 = vpop.permute.xlu0 %1658 }
 0x4df   : > { %v5043_v28 = vpop.permute.xlu0 %1653 }
 0x4e7   : > { %v5047_v15 = vpop.permute.xlu0 %1648 }
 0x4ef   : > { %v5051_v61 = vpop.permute.xlu0 %1643 }
 0x4f7   : > { %v5053_v1 = vpop.permute.xlu0 %1638 }
 0x545   : > { %v1509_v45 = vpop.f32.mrf.mxu1 }
 0x546   : > { %v1512_v62 = vmul.f32 %v1509_v45, %v4829_v46 }
 0x548   : > { %v1513_v58 = vadd.f32 1e-05, %v1512_v62  ;;  %v1634_v62 = vpop.permute.xlu0 %1633 }
 0x54a   : > { %3835 = vrsqrt.f32 %v1513_v58  ;;  %vm1520_vm13 = vweird.f32 %v1513_v58 }
 0x550   : > { %v3836_v37 = vpop.eup %3835 }
 0x551   : > { %v1515_v5 = vmul.f32 %v3836_v37, %v1513_v58  ;;  %vm1521_vm12 = vweird.f32 %v3836_v37 }
 0x552   : > { %vm1522_vm14 = vmor %vm1520_vm13, %vm1521_vm12 }
 0x553   : > { %v1516_v36 = vmul.f32 %v3836_v37, %v1515_v5 }
 0x555   : > { %v1517_v47 = vmul.f32 0.5, %v1516_v36 }
 0x557   : > { %v1518_v8 = vsub.f32 1.5, %v1517_v47 }
 0x559   : > { %v1519_v2 = vmul.f32 %v3836_v37, %v1518_v8 }
 0x55b   : > { %v1523_v63 = vsel %vm1522_vm14, %v3836_v37, %v1519_v2 }
 0x55c   : > { %1539 = vmatpush.msrb.mxu1 %v1523_v63 }
 0x55d   : > { %3696 = vmatmul.msk.f32.vlgmr.msrb.gmra.mxu1 %vm1330_vm11, %v4835_v59 }
 0x565   : > { %3697 = vmatmul.msk.f32.gmra.mxu1 %vm1330_vm11, %v4842_v19 }
 0x56d   : > { %3698 = vmatmul.msk.f32.gmra.mxu1 %vm1330_vm11, %v4849_v49 }
 0x575   : > { %3699 = vmatmul.msk.f32.gmra.mxu1 %vm1330_vm11, %v4856_v18 }
 0x57d   : > { %3700 = vmatmul.msk.f32.gmra.mxu1 %vm1330_vm11, %v4863_v42  ;;  %v5035_v42 = vpop.permute.xlu1 %1714 }
 0x585   : > { %3701 = vmatmul.msk.f32.gmra.mxu1 %vm1330_vm11, %v4870_v16  ;;  %v5037_v16 = vpop.permute.xlu1 %1709 }
 0x58d   : > { %3702 = vmatmul.msk.f32.gmra.mxu1 %vm1330_vm11, %v4877_v52 }
 0x595   : > { %3703 = vmatmul.msk.f32.gmra.mxu1 %vm1330_vm11, %v4884_v27  ;;  %v5041_v27 = vpop.permute.xlu1 %1704 }
 0x59d   : > { %v5045_v0 = vpop.permute.xlu1 %1699 }
 0x5a5   : > { %v5049_v22 = vpop.permute.xlu1 %1694 }
 0x5ad   : > { %v1690_v13 = vpop.permute.xlu1 %1689 }
 0x5b5   : > { %v1680_v39 = vpop.permute.xlu1 %1679 }
 0x5da   : > { %v1541_v7 = vpop.f32.mrf.mxu1 }
 0x5db   : > { %1567 = vperm.xlu2 %3831, %v1541_v7  }
 0x5e2   : > { %v1544_v59 = vpop.f32.mrf.mxu1 }
 0x5e3   : > { %1572 = vperm.xlu2 %3831, %v1544_v59  }
 0x5ea   : > { %v1547_v19 = vpop.f32.mrf.mxu1 }
 0x5eb   : > { %1577 = vperm.xlu2 %3831, %v1547_v19  }
 0x5f2   : > { %v1550_v49 = vpop.f32.mrf.mxu1 }
 0x5f3   : > { %1582 = vperm.xlu2 %3831, %v1550_v49  }
 0x5fa   : > { %v1553_v18 = vpop.f32.mrf.mxu1 }
 0x5fb   : > { %1587 = vperm.xlu2 %3831, %v1553_v18  }
 0x602   : > { %v1556_v23 = vpop.f32.mrf.mxu1 }
 0x603   : > { %1592 = vperm.xlu2 %3831, %v1556_v23  }
 0x60a   : > { %v1559_v52 = vpop.f32.mrf.mxu1 }
 0x60b   : > { %1597 = vperm.xlu1 %3830, %v1559_v52  }
 0x612   : > { %v1562_v34 = vpop.f32.mrf.mxu1 }
 0x613   : > { %1602 = vperm.xlu2 %3831, %v1562_v34  }
 0x635   : > { %v1568_v4 = vpop.permute.xlu2 %1567 }
 0x636   : > { %v1605_v20 = vmul.f32 %v1568_v4, %v4949_v10  ;;  %v1606_v6 = vmul.f32 %v1568_v4, %v4952_v25  ;;  %v1629_v10 = vpop.permute.xlu0 %1628 }
 0x638   : > { %v1661_v56 = vmul.f32 %v1624_v40, %v1605_v20  ;;  %v1662_v48 = vmul.f32 %v1624_v40, %v1606_v6 }
 0x63a   : > { %v5057_v55 = vadd.f32 %v1680_v39, %v1661_v56  ;;  %v5059_v45 = vadd.f32 %v1680_v39, %v1662_v48 }
 0x63c   : > { %7216 = vst [vmem:[#allocation24_spill] sm:$0xff] %v5057_v55  ;;  %1821 = vrot.lane.b32.xlu2 %v5059_v45, %s7218_s30  ;;  %1741 = vrot.lane.b32.xlu0 %v5057_v55, %s7219_s26 }
 0x63d   : > { %7217 = vst [vmem:[#allocation25_spill] sm:$0xff] %v5059_v45  ;;  %1805 = vrot.lane.b32.xlu1 %v5057_v55, %s7218_s30  ;;  %v1573_v25 = vpop.permute.xlu2 %1572 }
 0x63e   : > { %v1607_v58 = vmul.f32 %v1573_v25, %v4955_v60  ;;  %v1685_v5 = vpop.permute.xlu0 %1684  ;;  %v1608_v47 = vmul.f32 %v1573_v25, %v4958_v30 }
 0x640   : > { %v1663_v37 = vmul.f32 %v1629_v10, %v1607_v58  ;;  %v1664_v60 = vmul.f32 %v1629_v10, %v1608_v47 }
 0x642   : > { %v5080_v36 = vadd.f32 %v1685_v5, %v1663_v37  ;;  %v5089_v8 = vadd.f32 %v1685_v5, %v1664_v60 }
 0x644   : > { %1949 = vrot.lane.b32.xlu2 %v5059_v45, %s7220_s23  ;;  %2013 = vrot.lane.b32.xlu0 %v5059_v45, %s7221_s29  ;;  %7224 = vst [vmem:[#allocation26_spill] sm:$0xff] %v5080_v36 }
 0x645   : > { %1933 = vrot.lane.b32.xlu1 %v5057_v55, %s7220_s23  ;;  %7225 = vst [vmem:[#allocation27_spill] sm:$0xff] %v5089_v8  ;;  %v1578_v30 = vpop.permute.xlu2 %1577 }
 0x646   : > { %v1610_v2 = vmul.f32 %v1578_v30, %v4912_v50  ;;  %v1609_v19 = vmul.f32 %v1578_v30, %v4909_v12 }
 0x648   : > { %v1666_v63 = vmul.f32 %v1634_v62, %v1610_v2  ;;  %v1665_v50 = vmul.f32 %v1634_v62, %v1609_v19 }
 0x64a   : > { %v5110_v7 = vadd.f32 %v1690_v13, %v1666_v63  ;;  %v5119_v49 = vadd.f32 %v1690_v13, %v1665_v50 }
 0x64c   : > { %1885 = vrot.lane.b32.xlu2 %v5059_v45, %s7222_s18  ;;  %2141 = vrot.lane.b32.xlu0 %v5059_v45, %s7223_s5  ;;  %7226 = vst [vmem:[#allocation28_spill] sm:$0xff] %v5110_v7 }
 0x64d   : > { %1757 = vrot.lane.b32.xlu1 %v5059_v45, %s7219_s26  ;;  %v1583_v59 = vpop.permute.xlu2 %1582  ;;  %7227 = vst [vmem:[#allocation29_spill] sm:$0xff] %v5119_v49 }
 0x64e   : > { %v1611_v23 = vmul.f32 %v1583_v59, %v4929_v51  ;;  %v1612_v13 = vmul.f32 %v1583_v59, %v4932_v53 }
 0x650   : > { %v1667_v34 = vmul.f32 %v5053_v1, %v1611_v23  ;;  %v1668_v4 = vmul.f32 %v5053_v1, %v1612_v13 }
 0x652   : > { %v5144_v40 = vadd.f32 %v5049_v22, %v1667_v34  ;;  %v5165_v6 = vadd.f32 %v5049_v22, %v1668_v4 }
 0x654   : > { %1997 = vrot.lane.b32.xlu2 %v5057_v55, %s7221_s29  ;;  %1807 = vrot.lane.b32.xlu0 %v5080_v36, %s7218_s30  ;;  %7228 = vst [vmem:[#allocation30_spill] sm:$0xff] %v5144_v40 }
 0x655   : > { %1869 = vrot.lane.b32.xlu1 %v5057_v55, %s7222_s18  ;;  %v1588_v18 = vpop.permute.xlu2 %1587  ;;  %7229 = vst [vmem:[#allocation31_spill] sm:$0xff] %v5165_v6 }
 0x656   : > { %v1614_v1 = vmul.f32 %v1588_v18, %v4938_v41  ;;  %v1613_v10 = vmul.f32 %v1588_v18, %v4935_v38 }
 0x658   : > { %v1670_v22 = vmul.f32 %v5051_v61, %v1614_v1  ;;  %v1669_v25 = vmul.f32 %v5051_v61, %v1613_v10 }
 0x65a   : > { %v5193_v41 = vadd.f32 %v5045_v0, %v1670_v22  ;;  %v5209_v38 = vadd.f32 %v5045_v0, %v1669_v25 }
 0x65c   : > { %2125 = vrot.lane.b32.xlu2 %v5057_v55, %s7223_s5  ;;  %1935 = vrot.lane.b32.xlu0 %v5080_v36, %s7220_s23  ;;  %7232 = vst [vmem:[#allocation34_spill] sm:$0xff] %v5193_v41 }
 0x65d   : > { %1823 = vrot.lane.b32.xlu1 %v5089_v8, %s7218_s30  ;;  %v1593_v12 = vpop.permute.xlu2 %1592  ;;  %7235 = vst [vmem:[#allocation37_spill] sm:$0xff] %v5209_v38 }
 0x65e   : > { %v1616_v63 = vmul.f32 %v1593_v12, %v4902_v24  ;;  %v1615_v23 = vmul.f32 %v1593_v12, %v4899_v9 }
 0x660   : > { %v1672_v50 = vmul.f32 %v5047_v15, %v1616_v63  ;;  %v1671_v34 = vmul.f32 %v5047_v15, %v1615_v23 }
 0x662   : > { %v5251_v24 = vadd.f32 %v5041_v27, %v1672_v50  ;;  %v5267_v9 = vadd.f32 %v5041_v27, %v1671_v34 }
 0x664   : > { %1743 = vrot.lane.b32.xlu2 %v5080_v36, %s7219_s26  ;;  %1759 = vrot.lane.b32.xlu0 %v5089_v8, %s7219_s26  ;;  %7241 = vst [vmem:[#allocation43_spill] sm:$0xff] %v5251_v24 }
 0x665   : > { %1951 = vrot.lane.b32.xlu1 %v5089_v8, %s7220_s23  ;;  %7243 = vst [vmem:[#allocation45_spill] sm:$0xff] %v5267_v9 }
 0x66b   : > { %v7398_v14 = vld [vmem:[#allocation43_spill] sm:$0xff] }
 0x66c   : > { %1871 = vrot.lane.b32.xlu2 %v5080_v36, %s7222_s18  ;;  %1887 = vrot.lane.b32.xlu0 %v5089_v8, %s7222_s18 }
 0x66d   : > { %1999 = vrot.lane.b32.xlu1 %v5080_v36, %s7221_s29  ;;  %v5140_v52 = vpop.permute.xlu2 %1602 }
 0x674   : > { %2015 = vrot.lane.b32.xlu2 %v5089_v8, %s7221_s29  ;;  %1825 = vrot.lane.b32.xlu0 %v5110_v7, %s7218_s30 }
 0x675   : > { %2127 = vrot.lane.b32.xlu1 %v5080_v36, %s7223_s5 }
 0x67c   : > { %2143 = vrot.lane.b32.xlu2 %v5089_v8, %s7223_s5  ;;  %1953 = vrot.lane.b32.xlu0 %v5110_v7, %s7220_s23 }
 0x67d   : > { %1745 = vrot.lane.b32.xlu1 %v5119_v49, %s7219_s26  ;;  %v5175_v56 = vpop.permute.xlu1 %1597 }
 0x67e   : > { %v1617_v63 = vmul.f32 %v5175_v56, %v4915_v3 }
 0x680   : > { %v1673_v50 = vmul.f32 %v5043_v28, %v1617_v63 }
 0x682   : > { %v5309_v17 = vadd.f32 %v5037_v16, %v1673_v50 }
 0x684   : > { %1873 = vrot.lane.b32.xlu0 %v5119_v49, %s7222_s18  ;;  %1809 = vrot.lane.b32.xlu2 %v5119_v49, %s7218_s30  ;;  %7247 = vst [vmem:[#allocation49_spill] sm:$0xff] %v5309_v17 }
 0x685   : > { %1889 = vrot.lane.b32.xlu1 %v5110_v7, %s7222_s18 }
 0x68c   : > { %2001 = vrot.lane.b32.xlu0 %v5119_v49, %s7221_s29  ;;  %1937 = vrot.lane.b32.xlu2 %v5119_v49, %s7220_s23 }
 0x68d   : > { %2017 = vrot.lane.b32.xlu1 %v5110_v7, %s7221_s29 }
 0x694   : > { %2145 = vrot.lane.b32.xlu0 %v5110_v7, %s7223_s5  ;;  %1761 = vrot.lane.b32.xlu2 %v5110_v7, %s7219_s26 }
 0x695   : > { %1811 = vrot.lane.b32.xlu1 %v5144_v40, %s7218_s30 }
 0x696   : > { %v5152_v51 = vpop.permute.xlu2 %1821 }
 0x69c   : > { %2129 = vrot.lane.b32.xlu2 %v5119_v49, %s7223_s5  ;;  %1747 = vrot.lane.b32.xlu0 %v5144_v40, %s7219_s26 }
 0x69d   : > { %1939 = vrot.lane.b32.xlu1 %v5144_v40, %s7220_s23 }
 0x69e   : > { %v5162_v20 = vpop.permute.xlu2 %1949 }
 0x6a4   : > { %1827 = vrot.lane.b32.xlu2 %v5165_v6, %s7218_s30  ;;  %2019 = vrot.lane.b32.xlu0 %v5165_v6, %s7221_s29 }
 0x6a5   : > { %1763 = vrot.lane.b32.xlu1 %v5165_v6, %s7219_s26 }
 0x6a6   : > { %v5173_v53 = vpop.permute.xlu2 %1885 }
 0x6a7   : > { %7230 = vst [vmem:[#allocation32_spill] sm:$0xff] %v5173_v53 }
 0x6ac   : > { %1955 = vrot.lane.b32.xlu2 %v5165_v6, %s7220_s23  ;;  %2131 = vrot.lane.b32.xlu0 %v5144_v40, %s7223_s5 }
 0x6ad   : > { %1875 = vrot.lane.b32.xlu1 %v5144_v40, %s7222_s18 }
 0x6ae   : > { %v5185_v48 = vpop.permute.xlu0 %1741  ;;  %v5187_v39 = vpop.permute.xlu2 %1997 }
 0x6af   : > { %7231 = vst [vmem:[#allocation33_spill] sm:$0xff] %v5187_v39  ;;  %v5189_v62 = vpop.permute.xlu1 %1805 }
 0x6b4   : > { %1891 = vrot.lane.b32.xlu2 %v5165_v6, %s7222_s18  ;;  %1829 = vrot.lane.b32.xlu0 %v5193_v41, %s7218_s30 }
 0x6b5   : > { %2147 = vrot.lane.b32.xlu1 %v5165_v6, %s7223_s5 }
 0x6b6   : > { %v5202_v58 = vpop.permute.xlu0 %2013  ;;  %v5204_v37 = vpop.permute.xlu2 %2125 }
 0x6b7   : > { %7233 = vst [vmem:[#allocation35_spill] sm:$0xff] %v5202_v58  ;;  %v5206_v5 = vpop.permute.xlu1 %1933 }
 0x6b8   : > { %7234 = vst [vmem:[#allocation36_spill] sm:$0xff] %v5204_v37 }
 0x6bc   : > { %2003 = vrot.lane.b32.xlu2 %v5144_v40, %s7221_s29  ;;  %1941 = vrot.lane.b32.xlu0 %v5209_v38, %s7220_s23 }
 0x6bd   : > { %1957 = vrot.lane.b32.xlu1 %v5193_v41, %s7220_s23 }
 0x6be   : > { %v5217_v47 = vpop.permute.xlu0 %2141  ;;  %v5219_v61 = vpop.permute.xlu2 %1743 }
 0x6bf   : > { %7236 = vst [vmem:[#allocation38_spill] sm:$0xff] %v5217_v47  ;;  %v5221_v60 = vpop.permute.xlu1 %1757  ;;  %v1618_v47 = vmul.f32 %v5175_v56, %v4918_v32 }
 0x6c1   : > { %v1674_v50 = vmul.f32 %v5043_v28, %v1618_v47  ;;  %v1620_v47 = vmul.f32 %v5140_v52, %v4892_v11  ;;  %v1619_v11 = vmul.f32 %v5140_v52, %v4889_v31 }
 0x6c4   : > { %1765 = vrot.lane.b32.xlu0 %v5193_v41, %s7219_s26  ;;  %1813 = vrot.lane.b32.xlu2 %v5209_v38, %s7218_s30 }
 0x6c5   : > { %2021 = vrot.lane.b32.xlu1 %v5193_v41, %s7221_s29 }
 0x6c6   : > { %v5229_v0 = vpop.permute.xlu0 %1807  ;;  %v5231_v30 = vpop.permute.xlu2 %1871 }
 0x6c7   : > { %7237 = vst [vmem:[#allocation39_spill] sm:$0xff] %v5229_v0  ;;  %v5233_v2 = vpop.permute.xlu1 %1869 }
 0x6c8   : > { %7238 = vst [vmem:[#allocation40_spill] sm:$0xff] %v5231_v30 }
 0x6c9   : > { %7239 = vst [vmem:[#allocation41_spill] sm:$0xff] %v5233_v2 }
 0x6cc   : > { %1893 = vrot.lane.b32.xlu0 %v5193_v41, %s7222_s18  ;;  %1749 = vrot.lane.b32.xlu2 %v5209_v38, %s7219_s26 }
 0x6cd   : > { %2133 = vrot.lane.b32.xlu1 %v5209_v38, %s7223_s5 }
 0x6ce   : > { %v5242_v59 = vpop.permute.xlu0 %1935  ;;  %v5244_v19 = vpop.permute.xlu2 %2015 }
 0x6cf   : > { %7240 = vst [vmem:[#allocation42_spill] sm:$0xff] %v5244_v19  ;;  %v5247_v18 = vpop.permute.xlu1 %1823 }
 0x6d4   : > { %2005 = vrot.lane.b32.xlu0 %v5209_v38, %s7221_s29  ;;  %1877 = vrot.lane.b32.xlu2 %v5209_v38, %s7222_s18 }
 0x6d5   : > { %1831 = vrot.lane.b32.xlu1 %v5251_v24, %s7218_s30 }
 0x6d6   : > { %v5260_v13 = vpop.permute.xlu0 %1759  ;;  %v5262_v4 = vpop.permute.xlu2 %2143 }
 0x6d7   : > { %7242 = vst [vmem:[#allocation44_spill] sm:$0xff] %v5262_v4  ;;  %v5264_v1 = vpop.permute.xlu1 %1951  ;;  %v5339_v4 = vadd.f32 %v5037_v16, %v1674_v50  ;;  %v1676_v16 = vmul.f32 %v5039_v35, %v1620_v47  ;;  %v1675_v47 = vmul.f32 %v5039_v35, %v1619_v11 }
 0x6d9   : > { %7253 = vst [vmem:[#allocation55_spill] sm:$0xff] %v5339_v4  ;;  %v5387_v31 = vadd.f32 %v5035_v42, %v1675_v47 }
 0x6db   : > { %7259 = vst [vmem:[#allocation61_spill] sm:$0xff] %v5387_v31 }
 0x6dc   : > { %2149 = vrot.lane.b32.xlu2 %v5193_v41, %s7223_s5  ;;  %1815 = vrot.lane.b32.xlu0 %v5267_v9, %s7218_s30 }
 0x6dd   : > { %1751 = vrot.lane.b32.xlu1 %v5267_v9, %s7219_s26 }
 0x6de   : > { %v5275_v12 = vpop.permute.xlu0 %1887  ;;  %v5277_v15 = vpop.permute.xlu2 %1809 }
 0x6df   : > { %7244 = vst [vmem:[#allocation46_spill] sm:$0xff] %v5275_v12  ;;  %v5279_v22 = vpop.permute.xlu1 %1999 }
 0x6e0   : > { %7245 = vst [vmem:[#allocation47_spill] sm:$0xff] %v5279_v22 }
 0x6e4   : > { %1943 = vrot.lane.b32.xlu2 %v5267_v9, %s7220_s23  ;;  %1959 = vrot.lane.b32.xlu0 %v5251_v24, %s7220_s23 }
 0x6e5   : > { %1879 = vrot.lane.b32.xlu1 %v5267_v9, %s7222_s18 }
 0x6e6   : > { %v5287_v27 = vpop.permute.xlu0 %1825  ;;  %v5289_v10 = vpop.permute.xlu2 %1937 }
 0x6e7   : > { %v5291_v25 = vpop.permute.xlu1 %2127 }
 0x6e8   : > { %7246 = vst [vmem:[#allocation48_spill] sm:$0xff] %v5291_v25 }
 0x6ec   : > { %1767 = vrot.lane.b32.xlu2 %v5251_v24, %s7219_s26  ;;  %2135 = vrot.lane.b32.xlu0 %v5267_v9, %s7223_s5 }
 0x6ed   : > { %2007 = vrot.lane.b32.xlu1 %v5267_v9, %s7221_s29 }
 0x6ee   : > { %v5302_v23 = vpop.permute.xlu0 %1953  ;;  %v5304_v34 = vpop.permute.xlu2 %1761 }
 0x6ef   : > { %v5306_v46 = vpop.permute.xlu1 %1745 }
 0x6f4   : > { %1895 = vrot.lane.b32.xlu2 %v5251_v24, %s7222_s18  ;;  %1753 = vrot.lane.b32.xlu0 %v5309_v17, %s7219_s26 }
 0x6f5   : > { %2151 = vrot.lane.b32.xlu1 %v5251_v24, %s7223_s5 }
 0x6f6   : > { %v5317_v3 = vpop.permute.xlu0 %1873  ;;  %v5319_v63 = vpop.permute.xlu2 %2129 }
 0x6f7   : > { %7248 = vst [vmem:[#allocation50_spill] sm:$0xff] %v5317_v3  ;;  %v5321_v37 = vpop.permute.xlu1 %1889 }
 0x6f8   : > { %7249 = vst [vmem:[#allocation51_spill] sm:$0xff] %v5319_v63  ;;  %v5371_v63 = vadd.f32 %v5035_v42, %v1676_v16 }
 0x6f9   : > { %7250 = vst [vmem:[#allocation52_spill] sm:$0xff] %v5321_v37 }
 0x6fa   : > { %7256 = vst [vmem:[#allocation58_spill] sm:$0xff] %v5371_v63 }
 0x6fc   : > { %2023 = vrot.lane.b32.xlu2 %v5251_v24, %s7221_s29  ;;  %1881 = vrot.lane.b32.xlu0 %v5309_v17, %s7222_s18 }
 0x6fd   : > { %1817 = vrot.lane.b32.xlu1 %v5309_v17, %s7218_s30 }
 0x6fe   : > { %v5332_v39 = vpop.permute.xlu0 %2001  ;;  %v5334_v58 = vpop.permute.xlu2 %1827 }
 0x6ff   : > { %7251 = vst [vmem:[#allocation53_spill] sm:$0xff] %v5332_v39  ;;  %v5336_v25 = vpop.permute.xlu1 %2017 }
 0x700   : > { %7252 = vst [vmem:[#allocation54_spill] sm:$0xff] %v5336_v25 }
 0x704   : > { %1833 = vrot.lane.b32.xlu2 %v5339_v4, %s7218_s30  ;;  %2025 = vrot.lane.b32.xlu0 %v5339_v4, %s7221_s29 }
 0x705   : > { %1945 = vrot.lane.b32.xlu1 %v5309_v17, %s7220_s23 }
 0x706   : > { %v5347_v32 = vpop.permute.xlu0 %2145  ;;  %v5349_v28 = vpop.permute.xlu2 %1955 }
 0x707   : > { %7254 = vst [vmem:[#allocation56_spill] sm:$0xff] %v5347_v32  ;;  %v5351_v56 = vpop.permute.xlu1 %1811 }
 0x70c   : > { %1961 = vrot.lane.b32.xlu2 %v5339_v4, %s7220_s23  ;;  %2153 = vrot.lane.b32.xlu0 %v5339_v4, %s7223_s5 }
 0x70d   : > { %1769 = vrot.lane.b32.xlu1 %v5339_v4, %s7219_s26 }
 0x70e   : > { %v5362_v50 = vpop.permute.xlu0 %1747  ;;  %v5364_v22 = vpop.permute.xlu2 %1891 }
 0x70f   : > { %7255 = vst [vmem:[#allocation57_spill] sm:$0xff] %v5364_v22  ;;  %v5366_v19 = vpop.permute.xlu1 %1939 }
 0x714   : > { %2009 = vrot.lane.b32.xlu2 %v5309_v17, %s7221_s29  ;;  %1835 = vrot.lane.b32.xlu0 %v5371_v63, %s7218_s30 }
 0x715   : > { %1897 = vrot.lane.b32.xlu1 %v5339_v4, %s7222_s18 }
 0x716   : > { %v5380_v32 = vpop.permute.xlu0 %2019  ;;  %v5382_v39 = vpop.permute.xlu2 %2003 }
 0x717   : > { %7257 = vst [vmem:[#allocation59_spill] sm:$0xff] %v5380_v32  ;;  %v5384_v25 = vpop.permute.xlu1 %1763 }
 0x718   : > { %7258 = vst [vmem:[#allocation60_spill] sm:$0xff] %v5382_v39 }
 0x71c   : > { %2137 = vrot.lane.b32.xlu2 %v5309_v17, %s7223_s5  ;;  %1947 = vrot.lane.b32.xlu0 %v5387_v31, %s7220_s23 }
 0x71d   : > { %2201 = vrot.lane.b32.xlu1 %v5309_v17, %s7260_s1 }
 0x71e   : > { %v5395_v52 = vpop.permute.xlu0 %2131  ;;  %v5397_v35 = vpop.permute.xlu2 %1813 }
 0x71f   : > { %7261 = vst [vmem:[#allocation62_spill] sm:$0xff] %v5395_v52  ;;  %v5399_v16 = vpop.permute.xlu1 %1875 }
 0x720   : > { %7262 = vst [vmem:[#allocation63_spill] sm:$0xff] %v5397_v35 }
 0x721   : > { %7263 = vst [vmem:[#allocation64_spill] sm:$0xff] %v5399_v16 }
 0x724   : > { %1771 = vrot.lane.b32.xlu0 %v5371_v63, %s7219_s26  ;;  %1819 = vrot.lane.b32.xlu2 %v5387_v31, %s7218_s30 }
 0x725   : > { %1963 = vrot.lane.b32.xlu1 %v5371_v63, %s7220_s23 }
 0x726   : > { %v5407_v42 = vpop.permute.xlu0 %1829  ;;  %v5409_v11 = vpop.permute.xlu2 %1749 }
 0x727   : > { %v5411_v47 = vpop.permute.xlu1 %2147 }
 0x728   : > { %7264 = vst [vmem:[#allocation65_spill] sm:$0xff] %v5411_v47 }
 0x72c   : > { %2215 = vrot.lane.b32.xlu0 %v5251_v24, %s7260_s1  ;;  %2217 = vrot.lane.b32.xlu2 %v5339_v4, %s7260_s1 }
 0x72d   : > { %2073 = vrot.lane.b32.xlu1 %v5309_v17, %s7265_s2 }
 0x72e   : > { %v5419_v52 = vpop.permute.xlu0 %1941  ;;  %v5421_v39 = vpop.permute.xlu2 %1877 }
 0x72f   : > { %7266 = vst [vmem:[#allocation66_spill] sm:$0xff] %v5421_v39  ;;  %v5423_v32 = vpop.permute.xlu1 %1957 }
 0x734   : > { %2197 = vrot.lane.b32.xlu0 %v5209_v38, %s7260_s1  ;;  %1755 = vrot.lane.b32.xlu2 %v5387_v31, %s7219_s26 }
 0x735   : > { %2213 = vrot.lane.b32.xlu1 %v5193_v41, %s7260_s1 }
 0x736   : > { %v5431_v47 = vpop.permute.xlu0 %1765  ;;  %v5433_v57 = vpop.permute.xlu2 %2149 }
 0x737   : > { %7267 = vst [vmem:[#allocation67_spill] sm:$0xff] %v5433_v57  ;;  %v5435_v17 = vpop.permute.xlu1 %2021 }
 0x738   : > { %7268 = vst [vmem:[#allocation68_spill] sm:$0xff] %v5435_v17 }
 0x73c   : > { %1899 = vrot.lane.b32.xlu0 %v5371_v63, %s7222_s18  ;;  %1883 = vrot.lane.b32.xlu2 %v5387_v31, %s7222_s18  ;;  %s6768_s18 = scalar_lea.vmem %s7077_s14, %s4113_s19  ;;  %s559_s19 = sand.u32 1, %s3944_s22  }
 0x73d   : > { %2195 = vrot.lane.b32.xlu1 %v5144_v40, %s7260_s1 }
 0x73e   : > { %v5443_v21 = vpop.permute.xlu0 %1893  ;;  %v1944_v29 = vpop.permute.xlu2 %1943 }
 0x73f   : > { %7269 = vst [vmem:[#allocation69_spill] sm:$0xff] %v5443_v21  ;;  %v5445_v44 = vpop.permute.xlu1 %2133 }
 0x740   : > { %7270 = vst [vmem:[#allocation70_spill] sm:$0xff] %v5445_v44 }
 0x744   : > { %2087 = vrot.lane.b32.xlu0 %v5251_v24, %s7265_s2  ;;  %2199 = vrot.lane.b32.xlu2 %v5267_v9, %s7260_s1 }
 0x745   : > { %2085 = vrot.lane.b32.xlu1 %v5193_v41, %s7265_s2 }
 0x746   : > { %v5453_v17 = vpop.permute.xlu0 %2005  ;;  %v1768_v57 = vpop.permute.xlu2 %1767 }
 0x747   : > { %7271 = vst [vmem:[#allocation71_spill] sm:$0xff] %v5453_v17  ;;  %v5455_v53 = vpop.permute.xlu1 %1831 }
 0x74c   : > { %2069 = vrot.lane.b32.xlu0 %v5209_v38, %s7265_s2  ;;  %2089 = vrot.lane.b32.xlu2 %v5339_v4, %s7265_s2 }
 0x74d   : > { %2067 = vrot.lane.b32.xlu1 %v5144_v40, %s7265_s2 }
 0x74e   : > { %v5463_v24 = vpop.permute.xlu0 %1815  ;;  %v1896_v44 = vpop.permute.xlu2 %1895 }
 0x74f   : > { %7272 = vst [vmem:[#allocation72_spill] sm:$0xff] %v5463_v24  ;;  %v1752_v2 = vpop.permute.xlu1 %1751 }
 0x750   : > { %v5467_v41 = vsel %vm611_vm5, %v1752_v2, %v1768_v57  ;;  %v5471_v17 = vsel %vm611_vm5, %v1768_v57, %v1752_v2 }
 0x751   : > { %7273 = vst [vmem:[#allocation73_spill] sm:$0xff] %v5467_v41 }
 0x754   : > { %2209 = vrot.lane.b32.xlu0 %v5110_v7, %s7260_s1  ;;  %2071 = vrot.lane.b32.xlu2 %v5267_v9, %s7265_s2 }
 0x755   : > { %2027 = vrot.lane.b32.xlu1 %v5371_v63, %s7221_s29 }
 0x756   : > { %v1960_v4 = vpop.permute.xlu0 %1959  ;;  %v2024_v40 = vpop.permute.xlu2 %2023 }
 0x757   : > { %v1880_v38 = vpop.permute.xlu1 %1879  ;;  %v5481_v12 = vsel %vm730_vm1, %v1944_v29, %v1960_v4  ;;  %v5485_v57 = vsel %vm730_vm1, %v1960_v4, %v1944_v29 }
 0x758   : > { %7274 = vst [vmem:[#allocation74_spill] sm:$0xff] %v5481_v12  ;;  %v5489_v2 = vsel %vm690_vm2, %v1880_v38, %v1896_v44  ;;  %v5493_v9 = vsel %vm690_vm2, %v1896_v44, %v1880_v38 }
 0x759   : > { %7275 = vst [vmem:[#allocation75_spill] sm:$0xff] %v5489_v2 }
 0x75c   : > { %2011 = vrot.lane.b32.xlu0 %v5387_v31, %s7221_s29  ;;  %2211 = vrot.lane.b32.xlu2 %v5165_v6, %s7260_s1  ;;  %s3656_s29 = sshll.u32 %s559_s19, 7 }
 0x75d   : > { %2139 = vrot.lane.b32.xlu1 %v5387_v31, %s7223_s5 }
 0x75e   : > { %v2136_v12 = vpop.permute.xlu0 %2135  ;;  %v1834_v29 = vpop.permute.xlu2 %1833 }
 0x75f   : > { %v2008_v4 = vpop.permute.xlu1 %2007 }
 0x760   : > { %v5503_v41 = vsel %vm770_vm8, %v2008_v4, %v2024_v40  ;;  %v5507_v44 = vsel %vm770_vm8, %v2024_v40, %v2008_v4 }
 0x761   : > { %7276 = vst [vmem:[#allocation76_spill] sm:$0xff] %v5503_v41 }
 0x762   : > { %7277 = vst [vmem:[#allocation77_spill] sm:$0xff] %v5507_v44 }
 0x764   : > { %2191 = vrot.lane.b32.xlu0 %v5080_v36, %s7260_s1  ;;  %2193 = vrot.lane.b32.xlu2 %v5119_v49, %s7260_s1 }
 0x765   : > { %2207 = vrot.lane.b32.xlu1 %v5089_v8, %s7260_s1 }
 0x766   : > { %v5515_v38 = vpop.permute.xlu0 %1753  ;;  %v5517_v2 = vpop.permute.xlu2 %1961 }
 0x767   : > { %v2152_v30 = vpop.permute.xlu1 %2151 }
 0x768   : > { %v5521_v41 = vsel %vm850_vm6, %v2136_v12, %v2152_v30  ;;  %v5525_v40 = vsel %vm850_vm6, %v2152_v30, %v2136_v12 }
 0x769   : > { %7278 = vst [vmem:[#allocation78_spill] sm:$0xff] %v5521_v41 }
 0x76a   : > { %7279 = vst [vmem:[#allocation79_spill] sm:$0xff] %v5525_v40 }
 0x76c   : > { %2081 = vrot.lane.b32.xlu0 %v5110_v7, %s7265_s2  ;;  %2155 = vrot.lane.b32.xlu2 %v5371_v63, %s7223_s5  ;;  %s3762_s5 = sshll.u32 %s4074_s25, 7 }
 0x76d   : > { %2219 = vrot.lane.b32.xlu1 %v5371_v63, %s7260_s1 }
 0x76e   : > { %v5533_v4 = vpop.permute.xlu0 %1881  ;;  %v2010_v44 = vpop.permute.xlu2 %2009 }
 0x76f   : > { %v1818_v37 = vpop.permute.xlu1 %1817 }
 0x770   : > { %v5537_v41 = vsel %vm650_vm3, %v1818_v37, %v1834_v29 }
 0x771   : > { %7280 = vst [vmem:[#allocation80_spill] sm:$0xff] %v5537_v41 }
 0x774   : > { %2203 = vrot.lane.b32.xlu0 %v5387_v31, %s7260_s1  ;;  %2083 = vrot.lane.b32.xlu2 %v5165_v6, %s7265_s2 }
 0x775   : > { %2091 = vrot.lane.b32.xlu1 %v5371_v63, %s7265_s2 }
 0x776   : > { %v2026_v30 = vpop.permute.xlu0 %2025  ;;  %v2138_v12 = vpop.permute.xlu2 %2137 }
 0x777   : > { %v5545_v7 = vpop.permute.xlu1 %1945  ;;  %v5549_v40 = vsel %vm770_vm8, %v2010_v44, %v2026_v30  ;;  %v5553_v41 = vsel %vm770_vm8, %v2026_v30, %v2010_v44 }
 0x778   : > { %7281 = vst [vmem:[#allocation81_spill] sm:$0xff] %v5549_v40  ;;  %v5559_v6 = vsel %vm730_vm1, %v5545_v7, %v5517_v2 }
 0x779   : > { %7282 = vst [vmem:[#allocation82_spill] sm:$0xff] %v5553_v41 }
 0x77a   : > { %7283 = vst [vmem:[#allocation83_spill] sm:$0xff] %v5559_v6 }
 0x77c   : > { %2075 = vrot.lane.b32.xlu0 %v5387_v31, %s7265_s2  ;;  %2065 = vrot.lane.b32.xlu2 %v5119_v49, %s7265_s2 }
 0x77d   : > { %2189 = vrot.lane.b32.xlu1 %v5057_v55, %s7260_s1 }
 0x77e   : > { %v2154_v63 = vpop.permute.xlu0 %2153  ;;  %v5567_v40 = vpop.permute.xlu2 %1819 }
 0x77f   : > { %v1770_v44 = vpop.permute.xlu1 %1769  ;;  %v5571_v30 = vsel %vm850_vm6, %v2138_v12, %v2154_v63  ;;  %v5575_v41 = vsel %vm850_vm6, %v2154_v63, %v2138_v12  ;;  %v1851_v12 = vsel %vm650_vm3, %v1834_v29, %v1818_v37  ;;  %v1849_v29 = vsel %vm650_vm3, %v5407_v42, %v5397_v35 }
 0x780   : > { %7284 = vst [vmem:[#allocation84_spill] sm:$0xff] %v5571_v30  ;;  %v5580_v6 = vsel %vm611_vm5, %v5515_v38, %v1770_v44  ;;  %v1865_v37 = vmul.f32 %v1851_v12, %v4392_v43  ;;  %v1861_v35 = vmul.f32 %v1849_v29, %v4392_v43  ;;  %v1738_v29 = vld [vmem:[%s7069_s6 + $0x28] sm:$0xff] }
 0x781   : > { %7285 = vst [vmem:[#allocation85_spill] sm:$0xff] %v5575_v41 }
 0x782   : > { %7286 = vst [vmem:[#allocation86_spill] sm:$0xff] %v5580_v6  ;;  %v1740_v6 = vld [vmem:[%s7069_s6 + $0x38] sm:$0xff] }
 0x784   : > { %2063 = vrot.lane.b32.xlu0 %v5080_v36, %s7265_s2  ;;  %2205 = vrot.lane.b32.xlu2 %v5059_v45, %s7260_s1  ;;  %v1850_v36 = vsel %vm650_vm3, %v5455_v53, %v5463_v24 }
 0x785   : > { %2079 = vrot.lane.b32.xlu1 %v5089_v8, %s7265_s2 }
 0x786   : > { %v5588_v49 = vpop.permute.xlu0 %1835  ;;  %v2218_v31 = vpop.permute.xlu2 %2217 }
 0x787   : > { %v5590_v30 = vpop.permute.xlu1 %1897  ;;  %v1852_v63 = vsel %vm650_vm3, %v5588_v49, %v5567_v40 }
 0x788   : > { %v5602_v41 = vsel %vm690_vm2, %v5533_v4, %v5590_v30  ;;  %v1867_v8 = vmul.f32 %v1852_v63, %v4392_v43  ;;  %v1848_v63 = vsel %vm650_vm3, %v5334_v58, %v5351_v56 }
 0x789   : > { %7287 = vst [vmem:[#allocation87_spill] sm:$0xff] %v5602_v41 }
 0x78a   : > { %2357 = vmatpush.msra.mxu2 %v1867_v8  ;;  %v1863_v8 = vmul.f32 %v1850_v36, %v4392_v43 }
 0x78c   : > { %2077 = vrot.lane.b32.xlu0 %v5059_v45, %s7265_s2  ;;  %2061 = vrot.lane.b32.xlu2 %v5057_v55, %s7265_s2  ;;  %v1859_v45 = vmul.f32 %v1848_v63, %v4392_v43  ;;  %v1846_v55 = vsel %vm650_vm3, %v5247_v18, %v5229_v0  ;;  %s3548_s2 = scalar_lea.hbm %s7079_s16, %s3762_s5 }
 0x78d   : > { %2330 = vperm.xlu1 %3830, %v1740_v6   ;;  %2358 = vmatpush.msra.mxu2 %v1865_v37  ;;  %v1847_v6 = vsel %vm650_vm3, %v5287_v27, %v5277_v15  ;;  %v1855_v63 = vmul.f32 %v1846_v55, %v4392_v43  ;;  %s3551_s20 = sshll.u32 %s3548_s2, 4  ;;  %s3552_s20 = int_to_ptr.hbm [resolvable:$true] %s3551_s20 }
 0x78e   : > { %v1948_v12 = vpop.permute.xlu0 %1947  ;;  %v5626_v41 = vpop.permute.xlu2 %1755  ;;  %s3900_s26 = sshra.s32 %s3552_s20, 4  ;;  %s3901_s26 = int_to_ptr.hbm [resolvable:$true] %s3900_s26 }
 0x78f   : > { %v2202_v24 = vpop.permute.xlu1 %2201  ;;  %2359 = vmatpush.msra.mxu2 %v1863_v8  ;;  %v1739_v8 = vld [vmem:[%s7069_s6 + $0x30] sm:$0xff]  ;;  %s3902_s23 = scalar_lea.hbm %s3901_s26, 128  ;;  %p3907_p3 = scmp.lt.s32.totalorder %s3901_s26, %s7079_s16 }
 0x790   : > { %v5635_v36 = vsel %vm890_vm0, %v2202_v24, %v2218_v31  ;;  %v5639_v37 = vsel %vm890_vm0, %v2218_v31, %v2202_v24  ;;  %v1737_v24 = vld [vmem:[%s7069_s6 + $0x20] sm:$0xff]  ;;  %v1857_v31 = vmul.f32 %v1847_v6, %v4392_v43  ;;  %p3903_p0 = scmp.ne.s32.totalorder %s3901_s26, %s3902_s23 }
 0x791   : > { %7288 = vst [vmem:[#allocation88_spill] sm:$0xff] %v5635_v36  ;;  %2360 = vmatpush.msra.mxu2 %v1861_v35  ;;  %v1845_v35 = vsel %vm650_vm3, %v5152_v51, %v5189_v62 }
 0x792   : > { %7289 = vst [vmem:[#allocation89_spill] sm:$0xff] %v5639_v37  ;;  %v1853_v6 = vmul.f32 %v1845_v35, %v4392_v43  ;;  %v1977_v35 = vsel %vm730_vm1, %v5423_v32, %v5419_v52  ;;  %p3904_p1 = pnand %p3903_p0, %p4091_p5 }
 0x793   : > { %2361 = vmatpush.msra.mxu2 %v1859_v45 }
 0x794   : > { %2320 = vperm.xlu0 %3832, %v1738_v29   ;;  %2325 = vperm.xlu2 %3831, %v1739_v8   ;;  %v1787_v29 = vsel %vm611_vm5, %v1770_v44, %v5515_v38  ;;  %v1735_v38 = vld [vmem:[%s7069_s6 + $0x10] sm:$0xff]  ;;  %v1736_v44 = vld [vmem:[%s7069_s6 + $0x18] sm:$0xff]  ;;  %p3905_p2 = pneg %p3904_p1 }
 0x795   : > { %2315 = vperm.xlu1 %3830, %v1737_v24   ;;  %2362 = vmatpush.msra.mxu2 %v1857_v31  ;;  %v1979_v31 = vsel %vm730_vm1, %v5517_v2, %v5545_v7  ;;  %v1785_v7 = vsel %vm611_vm5, %v5431_v47, %v5409_v11 }
 0x796   : > { %v5661_v37 = vpop.permute.xlu0 %1771  ;;  %v5663_v36 = vpop.permute.xlu2 %1883  ;;  %v1993_v2 = vmul.f32 %v1979_v31, %v4302_v33 }
 0x797   : > { %v1964_v0 = vpop.permute.xlu1 %1963  ;;  %v1788_v45 = vsel %vm611_vm5, %v5661_v37, %v5626_v41  ;;  %2363 = vmatpush.msra.mxu2 %v1855_v63  ;;  %v1799_v63 = vmul.f32 %v5471_v17, %v4431_v26 }
 0x798   : > { %v5675_v55 = vsel %vm730_vm1, %v1948_v12, %v1964_v0  ;;  %v1980_v8 = vsel %vm730_vm1, %v1964_v0, %v1948_v12  ;;  %v1803_v24 = vmul.f32 %v1788_v45, %v4431_v26  ;;  %v1734_v0 = vld [vmem:[%s7069_s6 + $0x8] sm:$0xff]  ;;  %v1801_v12 = vmul.f32 %v1787_v29, %v4431_v26 }
 0x799   : > { %v1995_v43 = vmul.f32 %v1980_v8, %v4302_v33  ;;  %2364 = vmatpush.msra.mxu2 %v1853_v6  ;;  %v1784_v45 = vsel %vm611_vm5, %v5384_v25, %v5362_v50  ;;  %v1991_v6 = vmul.f32 %v5485_v57, %v4302_v33  ;;  %v1797_v57 = vmul.f32 %v1785_v7, %v4431_v26  ;;  %v1733_v7 = vld [vmem:[%s7069_s6] sm:$0xff] }
 0x79b   : > { %2365 = vmatpush.msra.mxu2 %v1803_v24  ;;  %2398 = vmatpush.msra.mxu0 %v1995_v43  ;;  %v1976_v24 = vsel %vm730_vm1, %v5349_v28, %v5366_v19 }
 0x79c   : > { %2305 = vperm.xlu0 %3832, %v1735_v38   ;;  %2310 = vperm.xlu2 %3831, %v1736_v44   ;;  %v1783_v38 = vsel %vm611_vm5, %v5304_v34, %v5306_v46  ;;  %v1989_v44 = vmul.f32 %v1977_v35, %v4302_v33  ;;  %v1987_v35 = vmul.f32 %v1976_v24, %v4302_v33 }
 0x79d   : > { %2300 = vperm.xlu1 %3830, %v1734_v0   ;;  %2366 = vmatpush.msra.mxu2 %v1801_v12  ;;  %v1975_v0 = vsel %vm730_vm1, %v5302_v23, %v5289_v10  ;;  %v1795_v12 = vmul.f32 %v1784_v45, %v4431_v26  ;;  %v1793_v45 = vmul.f32 %v1783_v38, %v4431_v26 }
 0x79e   : > { %2399 = vmatpush.msra.mxu0 %v1993_v2  ;;  %v2216_v29 = vpop.permute.xlu0 %2215  ;;  %v2200_v8 = vpop.permute.xlu2 %2199  ;;  %v1782_v2 = vsel %vm611_vm5, %v5260_v13, %v5219_v61 }
 0x79f   : > { %v2074_v31 = vpop.permute.xlu1 %2073  ;;  %2367 = vmatpush.msra.mxu2 %v1799_v63  ;;  %v5718_v17 = vsel %vm890_vm0, %v2200_v8, %v2216_v29  ;;  %v5722_v43 = vsel %vm890_vm0, %v2216_v29, %v2200_v8  ;;  %v1974_v63 = vsel %vm730_vm1, %v5264_v1, %v5242_v59  ;;  %v1985_v29 = vmul.f32 %v1975_v0, %v4302_v33 }
 0x7a0   : > { %2400 = vmatpush.msra.mxu0 %v1991_v6  ;;  %v1781_v6 = vsel %vm611_vm5, %v5221_v60, %v5185_v48  ;;  %v1973_v8 = vsel %vm730_vm1, %v5162_v20, %v5206_v5  ;;  %v1791_v24 = vmul.f32 %v1782_v2, %v4431_v26  ;;  %v1983_v38 = vmul.f32 %v1974_v63, %v4302_v33 }
 0x7a1   : > { %2368 = vmatpush.msra.mxu2 %v1797_v57 }
 0x7a2   : > { %2401 = vmatpush.msra.mxu0 %v1989_v44 }
 0x7a3   : > { %2369 = vmatpush.msra.mxu2 %v1795_v12 }
 0x7a4   : > { %2402 = vmatpush.msra.mxu0 %v1987_v35  ;;  %2295 = vperm.xlu2 %3831, %v1733_v7   ;;  %v1789_v35 = vmul.f32 %v1781_v6, %v4431_v26  ;;  %v1915_v26 = vsel %vm690_vm2, %v5590_v30, %v5533_v4  ;;  %v1913_v4 = vsel %vm690_vm2, %v5443_v21, %v5421_v39 }
 0x7a5   : > { %2370 = vmatpush.msra.mxu2 %v1793_v45  ;;  %v5768_v45 = vld [vmem:[#allocation2] sm:$0xff]  ;;  %v1927_v30 = vmul.f32 %v5493_v9, %v4340_v54 }
 0x7a6   : > { %2403 = vmatpush.msra.mxu0 %v1985_v29  ;;  %v2198_v57 = vpop.permute.xlu0 %2197  ;;  %v2090_v44 = vpop.permute.xlu2 %2089  ;;  %7291 = vst [vmem:[#allocation91_spill] sm:$0xff] %v5768_v45  ;;  %v1981_v29 = vmul.f32 %v1973_v8, %v4302_v33  ;;  %v5794_v8 = vld [vmem:[#allocation2 + $0x28] sm:$0xff] }
 0x7a7   : > { %v2214_v12 = vpop.permute.xlu1 %2213  ;;  %2371 = vmatpush.msra.mxu2 %v1791_v24  ;;  %v5761_v7 = vsel %vm810_vm7, %v2074_v31, %v2090_v44  ;;  %v5765_v0 = vsel %vm810_vm7, %v2090_v44, %v2074_v31  ;;  %7292 = vst [vmem:[#allocation92_spill] sm:$0xff] %v5794_v8  ;;  %v1929_v44 = vmul.f32 %v1915_v26, %v4340_v54 }
 0x7a8   : > { %7290 = vst [vmem:[#allocation90_spill] sm:$0xff] %v5765_v0  ;;  %v5772_v2 = vsel %vm890_vm0, %v2198_v57, %v2214_v12  ;;  %v5776_v63 = vsel %vm890_vm0, %v2214_v12, %v2198_v57  ;;  %2404 = vmatpush.msra.mxu0 %v1983_v38 }
 0x7a9   : > { %2372 = vmatpush.msra.mxu2 %v1789_v35  ;;  %v1925_v35 = vmul.f32 %v1913_v4, %v4340_v54  ;;  %v7297_v4 = vld [vmem:[#allocation46_spill] sm:$0xff] }
 0x7aa   : > { %2405 = vmatpush.msra.mxu0 %v1981_v29  ;;  %2373 = vmatmul.f32.vlgmr.msra.gmra.mxu2 %v5768_v45  ;;  %v7293_v29 = vld [vmem:[#allocation52_spill] sm:$0xff]  ;;  %v7336_v45 = vld [vmem:[#allocation47_spill] sm:$0xff] }
 0x7ae   : > { %v1900_v31 = vpop.permute.xlu0 %1899  ;;  %v5797_v38 = vpop.permute.xlu2 %2071 }
 0x7af   : > { %v5784_v6 = vpop.permute.xlu1 %2195  ;;  %v5789_v24 = vsel %vm690_vm2, %v5663_v36, %v1900_v31  ;;  %v1916_v33 = vsel %vm690_vm2, %v1900_v31, %v5663_v36  ;;  %v1912_v36 = vsel %vm690_vm2, %v5364_v22, %v5399_v16  ;;  %v1911_v31 = vsel %vm690_vm2, %v7293_v29, %v5317_v3  ;;  %v7299_v3 = vld [vmem:[#allocation32_spill] sm:$0xff]  ;;  %v7325_v16 = vld [vmem:[#allocation59_spill] sm:$0xff] }
 0x7b0   : > { %v1931_v57 = vmul.f32 %v1916_v33, %v4340_v54  ;;  %v5826_v33 = vld [vmem:[#allocation2 + $0x50] sm:$0xff]  ;;  %v1921_v0 = vmul.f32 %v1911_v31, %v4340_v54  ;;  %v7326_v22 = vld [vmem:[#allocation60_spill] sm:$0xff] }
 0x7b1   : > { %7295 = vst [vmem:[#allocation94_spill] sm:$0xff] %v5826_v33 }
 0x7b2   : > { %2376 = vmatmul.f32.gmra.mxu2 %v5794_v8  ;;  %2406 = vmatpush.msra.mxu0 %v1931_v57  ;;  %v1923_v57 = vmul.f32 %v1912_v36, %v4340_v54  ;;  %v7298_v8 = vld [vmem:[#allocation41_spill] sm:$0xff] }
 0x7b4   : > { %2407 = vmatpush.msra.mxu0 %v1929_v44  ;;  %v7296_v44 = vld [vmem:[#allocation40_spill] sm:$0xff] }
 0x7b6   : > { %v5811_v12 = vpop.permute.xlu0 %2087  ;;  %2408 = vmatpush.msra.mxu0 %v1927_v30  ;;  %v1910_v30 = vsel %vm690_vm2, %v7297_v4, %v7296_v44  ;;  %v5839_v29 = vpop.permute.xlu2 %2211 }
 0x7b7   : > { %v5818_v26 = vpop.permute.xlu1 %2085  ;;  %v5824_v9 = vsel %vm810_vm7, %v5811_v12, %v5797_v38  ;;  %v1919_v36 = vmul.f32 %v1910_v30, %v4340_v54  ;;  %v5859_v30 = vld [vmem:[#allocation2 + $0x78] sm:$0xff] }
 0x7b8   : > { %7294 = vst [vmem:[#allocation93_spill] sm:$0xff] %v5824_v9  ;;  %2409 = vmatpush.msra.mxu0 %v1925_v35  ;;  %v1909_v9 = vsel %vm690_vm2, %v7299_v3, %v7298_v8  ;;  %v1844_v35 = vsel %vm650_vm3, %v5567_v40, %v5588_v49  ;;  %v7303_v8 = vld [vmem:[#allocation14_spill] sm:$0xff]  ;;  %v7304_v49 = vld [vmem:[#allocation72_spill] sm:$0xff] }
 0x7b9   : > { %v1917_v31 = vmul.f32 %v1909_v9, %v4340_v54  ;;  %7302 = vst [vmem:[#allocation97_spill] sm:$0xff] %v5859_v30  ;;  %v1868_v3 = vmul.f32 %v1844_v35, %v7303_v8  ;;  %v1842_v54 = vsel %vm650_vm3, %v7304_v49, %v5455_v53  ;;  %v7305_v40 = vld [vmem:[#allocation80_spill] sm:$0xff]  ;;  %v1840_v53 = vsel %vm650_vm3, %v5351_v56, %v5334_v58  ;;  %v7309_v56 = vld [vmem:[#allocation39_spill] sm:$0xff] }
 0x7ba   : > { %2379 = vmatmul.f32.gmra.mxu2 %v5826_v33  ;;  %2410 = vmatpush.msra.mxu0 %v1923_v57  ;;  %v5849_v57 = vld [vmem:[#allocation2 + $0x8] sm:$0xff]  ;;  %v1866_v9 = vmul.f32 %v7305_v40, %v7303_v8  ;;  %v1864_v35 = vmul.f32 %v1842_v54, %v7303_v8  ;;  %v5884_v40 = vld [vmem:[#allocation2 + $0x30] sm:$0xff]  ;;  %v1860_v58 = vmul.f32 %v1840_v53, %v7303_v8 }
 0x7bb   : > { %7300 = vst [vmem:[#allocation95_spill] sm:$0xff] %v5849_v57 }
 0x7bc   : > { %2411 = vmatpush.msra.mxu0 %v1921_v0  ;;  %7307 = vst [vmem:[#allocation14_spill] sm:$0xff] %v5884_v40 }
 0x7be   : > { %v5846_v44 = vpop.permute.xlu0 %2069  ;;  %2412 = vmatpush.msra.mxu0 %v1919_v36  ;;  %v7306_v36 = vld [vmem:[#allocation63_spill] sm:$0xff] }
 0x7bf   : > { %v5851_v33 = vpop.permute.xlu1 %2067  ;;  %v5857_v0 = vsel %vm810_vm7, %v5818_v26, %v5846_v44 }
 0x7c0   : > { %7301 = vst [vmem:[#allocation96_spill] sm:$0xff] %v5857_v0  ;;  %2413 = vmatpush.msra.mxu0 %v1917_v31  ;;  %v1841_v0 = vsel %vm650_vm3, %v7306_v36, %v5407_v42  ;;  %v5879_v31 = vpop.permute.xlu2 %2193  ;;  %v1839_v42 = vsel %vm650_vm3, %v5277_v15, %v5287_v27  ;;  %v1838_v36 = vsel %vm650_vm3, %v7309_v56, %v5247_v18  ;;  %v7312_v56 = vld [vmem:[#allocation15_spill] sm:$0xff] }
 0x7c1   : > { %2414 = vmatmul.f32.vlgmr.msra.gmra.mxu0 %v5849_v57  ;;  %v1837_v15 = vsel %vm650_vm3, %v5189_v62, %v5152_v51  ;;  %v1856_v27 = vmul.f32 %v1838_v36, %v7303_v8  ;;  %v1780_v18 = vsel %vm611_vm5, %v5626_v41, %v5661_v37  ;;  %v5924_v62 = vld [vmem:[#allocation2 + $0xc8] sm:$0xff]  ;;  %v7316_v57 = vld [vmem:[#allocation81_spill] sm:$0xff] }
 0x7c2   : > { %2382 = vmatmul.f32.gmra.mxu2 %v5859_v30  ;;  %2562 = vmatpush.msrb.mxu0 %v1868_v3  ;;  %v1862_v3 = vmul.f32 %v1841_v0, %v7303_v8  ;;  %v1858_v0 = vmul.f32 %v1839_v42, %v7303_v8  ;;  %v1854_v53 = vmul.f32 %v1837_v15, %v7303_v8  ;;  %v7313_v8 = vld [vmem:[#allocation21_spill] sm:$0xff] }
 0x7c3   : > { %7311 = vst [vmem:[#allocation63_spill] sm:$0xff] %v5924_v62  ;;  %v1804_v41 = vmul.f32 %v1780_v18, %v7312_v56  ;;  %v1777_v18 = vsel %vm611_vm5, %v5409_v11, %v5431_v47  ;;  %v7322_v11 = vld [vmem:[#allocation73_spill] sm:$0xff] }
 0x7c4   : > { %2563 = vmatpush.msrb.mxu0 %v1866_v9  ;;  %v5892_v9 = vld [vmem:[#allocation2 + $0xa0] sm:$0xff]  ;;  %v1800_v47 = vmul.f32 %v7322_v11, %v7312_v56  ;;  %v1798_v11 = vmul.f32 %v1777_v18, %v7312_v56  ;;  %v1775_v18 = vsel %vm611_vm5, %v5306_v46, %v5304_v34  ;;  %v1774_v46 = vsel %vm611_vm5, %v5219_v61, %v5260_v13  ;;  %v7335_v34 = vld [vmem:[#allocation42_spill] sm:$0xff] }
 0x7c5   : > { %7308 = vst [vmem:[#allocation72_spill] sm:$0xff] %v5892_v9  ;;  %v1794_v61 = vmul.f32 %v1775_v18, %v7312_v56 }
 0x7c6   : > { %2564 = vmatpush.msrb.mxu0 %v1864_v35  ;;  %v5881_v49 = vpop.permute.xlu0 %2209 }
 0x7c7   : > { %v5890_v54 = vpop.permute.xlu1 %2027 }
 0x7c8   : > { %2565 = vmatpush.msrb.mxu0 %v1862_v3  ;;  %v5914_v3 = vld [vmem:[#allocation2 + $0x58] sm:$0xff]  ;;  %v5916_v42 = vpop.permute.xlu2 %2155 }
 0x7c9   : > { %2417 = vmatmul.f32.gmra.mxu0 %v5884_v40  ;;  %7310 = vst [vmem:[#allocation80_spill] sm:$0xff] %v5914_v3 }
 0x7ca   : > { %2385 = vmatmul.f32.gmra.mxu2 %v5892_v9  ;;  %2566 = vmatpush.msrb.mxu0 %v1860_v58  ;;  %v2057_v9 = vmul.f32 %v7316_v57, %v7313_v8  ;;  %v7323_v57 = vld [vmem:[#allocation76_spill] sm:$0xff] }
 0x7cb   : > { %v2055_v4 = vmul.f32 %v7323_v57, %v7313_v8  ;;  %v7327_v57 = vld [vmem:[#allocation65_spill] sm:$0xff] }
 0x7cc   : > { %2567 = vmatpush.msrb.mxu0 %v1858_v0  ;;  %v7314_v0 = vld [vmem:[#allocation16_spill] sm:$0xff] }
 0x7ce   : > { %2568 = vmatpush.msrb.mxu0 %v1856_v27  ;;  %v5911_v35 = vpop.permute.xlu0 %2011  ;;  %v7315_v27 = vld [vmem:[#allocation86_spill] sm:$0xff] }
 0x7cf   : > { %v5918_v58 = vpop.permute.xlu1 %2139  ;;  %v2036_v51 = vsel %vm770_vm8, %v5911_v35, %v5890_v54  ;;  %v1802_v40 = vmul.f32 %v7315_v27, %v7312_v56 }
 0x7d0   : > { %v2164_v37 = vsel %vm850_vm6, %v5918_v58, %v5916_v42  ;;  %v2059_v36 = vmul.f32 %v2036_v51, %v7313_v8  ;;  %2569 = vmatpush.msrb.mxu0 %v1854_v53  ;;  %v7317_v53 = vld [vmem:[#allocation84_spill] sm:$0xff] }
 0x7d1   : > { %v2187_v15 = vmul.f32 %v2164_v37, %v7314_v0  ;;  %2420 = vmatmul.f32.gmra.mxu0 %v5914_v3  ;;  %v2185_v51 = vmul.f32 %v7317_v53, %v7314_v0  ;;  %v7318_v37 = vld [vmem:[#allocation67_spill] sm:$0xff]  ;;  %v7319_v3 = vld [vmem:[#allocation70_spill] sm:$0xff]  ;;  %v1776_v53 = vsel %vm611_vm5, %v5362_v50, %v5384_v25 }
 0x7d2   : > { %2388 = vmatmul.f32.gmra.mxu2 %v5924_v62  ;;  %2570 = vmatpush.msrb.mxu0 %v1804_v41  ;;  %v2161_v27 = vsel %vm850_vm6, %v7319_v3, %v7318_v37  ;;  %v7320_v62 = vld [vmem:[#allocation68_spill] sm:$0xff]  ;;  %v7321_v41 = vld [vmem:[#allocation71_spill] sm:$0xff] }
 0x7d3   : > { %2439 = vmatpush.msrb.mxu3 %v2059_v36  ;;  %2480 = vmatpush.msra.mxu1 %v2187_v15  ;;  %v2033_v30 = vsel %vm770_vm8, %v7321_v41, %v7320_v62  ;;  %v7324_v36 = vld [vmem:[#allocation78_spill] sm:$0xff]  ;;  %v2032_v62 = vsel %vm770_vm8, %v7326_v22, %v7325_v16  ;;  %v2181_v50 = vmul.f32 %v2161_v27, %v7314_v0  ;;  %v7332_v22 = vld [vmem:[#allocation53_spill] sm:$0xff] }
 0x7d4   : > { %2571 = vmatpush.msrb.mxu0 %v1802_v40  ;;  %v2183_v15 = vmul.f32 %v7324_v36, %v7314_v0  ;;  %v7328_v41 = vld [vmem:[#allocation62_spill] sm:$0xff]  ;;  %v2053_v25 = vmul.f32 %v2033_v30, %v7313_v8  ;;  %v5978_v36 = vld [vmem:[#allocation2 + $0xf0] sm:$0xff]  ;;  %v1796_v27 = vmul.f32 %v1776_v53, %v7312_v56  ;;  %v2051_v21 = vmul.f32 %v2032_v62, %v7313_v8  ;;  %v7338_v53 = vld [vmem:[#allocation48_spill] sm:$0xff] }
 0x7d5   : > { %2440 = vmatpush.msrb.mxu3 %v2057_v9  ;;  %2481 = vmatpush.msra.mxu1 %v2185_v51  ;;  %v2160_v9 = vsel %vm850_vm6, %v7328_v41, %v7327_v57  ;;  %7329 = vst [vmem:[#allocation39_spill] sm:$0xff] %v5978_v36  ;;  %v7331_v16 = vld [vmem:[#allocation54_spill] sm:$0xff] }
 0x7d6   : > { %2572 = vmatpush.msrb.mxu0 %v1800_v47  ;;  %v5967_v40 = vpop.permute.xlu0 %2191  ;;  %v5980_v47 = vld [vmem:[#allocation2 + $0x80] sm:$0xff]  ;;  %v2031_v39 = vsel %vm770_vm8, %v7332_v22, %v7331_v16  ;;  %v7340_v22 = vld [vmem:[#allocation33_spill] sm:$0xff] }
 0x7d7   : > { %v5974_v51 = vpop.permute.xlu1 %2207  ;;  %2441 = vmatpush.msrb.mxu3 %v2055_v4  ;;  %2482 = vmatpush.msra.mxu1 %v2183_v15  ;;  %7330 = vst [vmem:[#allocation15_spill] sm:$0xff] %v5980_v47  ;;  %v7333_v4 = vld [vmem:[#allocation56_spill] sm:$0xff]  ;;  %v7334_v15 = vld [vmem:[#allocation51_spill] sm:$0xff]  ;;  %v2049_v13 = vmul.f32 %v2031_v39, %v7313_v8  ;;  %v1792_v39 = vmul.f32 %v1774_v46, %v7312_v56 }
 0x7d8   : > { %2573 = vmatpush.msrb.mxu0 %v1798_v11  ;;  %v2159_v30 = vsel %vm850_vm6, %v7334_v15, %v7333_v4  ;;  %v2030_v11 = vsel %vm770_vm8, %v7336_v45, %v7335_v34  ;;  %v7339_v16 = vld [vmem:[#allocation35_spill] sm:$0xff]  ;;  %v7341_v34 = vld [vmem:[#allocation38_spill] sm:$0xff] }
 0x7d9   : > { %2442 = vmatpush.msrb.mxu3 %v2053_v25  ;;  %2483 = vmatpush.msra.mxu1 %v2181_v50  ;;  %v2179_v25 = vmul.f32 %v2160_v9, %v7314_v0  ;;  %v7337_v50 = vld [vmem:[#allocation44_spill] sm:$0xff]  ;;  %v1773_v9 = vsel %vm611_vm5, %v5185_v48, %v5221_v60  ;;  %v2047_v18 = vmul.f32 %v2030_v11, %v7313_v8 }
 0x7da   : > { %2391 = vmatmul.f32.gmra.mxu2 %v5978_v36  ;;  %2423 = vmatmul.f32.gmra.mxu0 %v5980_v47  ;;  %v2158_v62 = vsel %vm850_vm6, %v7338_v53, %v7337_v50  ;;  %v2029_v36 = vsel %vm770_vm8, %v7340_v22, %v7339_v16  ;;  %v2177_v47 = vmul.f32 %v2159_v30, %v7314_v0  ;;  %v6038_v11 = vld [vmem:[#allocation2 + $0xa8] sm:$0xff] }
 0x7db   : > { %2574 = vmatpush.msrb.mxu0 %v1796_v27  ;;  %2443 = vmatpush.msrb.mxu3 %v2051_v21  ;;  %v7342_v27 = vld [vmem:[#allocation36_spill] sm:$0xff]  ;;  %v2175_v22 = vmul.f32 %v2158_v62, %v7314_v0  ;;  %v1790_v60 = vmul.f32 %v1773_v9, %v7312_v56  ;;  %v2045_v30 = vmul.f32 %v2029_v36, %v7313_v8  ;;  %v7345_v56 = vld [vmem:[#allocation49_spill] sm:$0xff] }
 0x7dc   : > { %2484 = vmatpush.msra.mxu1 %v2179_v25  ;;  %v2157_v21 = vsel %vm850_vm6, %v7342_v27, %v7341_v34  ;;  %v6033_v25 = vld [vmem:[#allocation2 + $0x118] sm:$0xff]  ;;  %7343 = vst [vmem:[#allocation21_spill] sm:$0xff] %v6038_v11  ;;  %v7346_v62 = vld [vmem:[#allocation45_spill] sm:$0xff] }
 0x7dd   : > { %2575 = vmatpush.msrb.mxu0 %v1794_v61  ;;  %2444 = vmatpush.msrb.mxu3 %v2049_v13  ;;  %v6035_v61 = vpop.permute.xlu2 %2083  ;;  %v2173_v46 = vmul.f32 %v2157_v21, %v7314_v0  ;;  %v7347_v13 = vld [vmem:[#allocation11_spill] sm:$0xff]  ;;  %v7348_v21 = vld [vmem:[#allocation18_spill] sm:$0xff] }
 0x7de   : > { %2485 = vmatpush.msra.mxu1 %v2177_v47  ;;  %v6028_v16 = vpop.permute.xlu0 %2081  ;;  %v7344_v47 = vld [vmem:[#allocation61_spill] sm:$0xff] }
 0x7df   : > { %2576 = vmatpush.msrb.mxu0 %v1792_v39  ;;  %v2220_v48 = vpop.permute.xlu1 %2219  ;;  %2445 = vmatpush.msrb.mxu3 %v2047_v18  ;;  %v6053_v18 = vld [vmem:[#allocation2 + $0xd0] sm:$0xff] }
 0x7e0   : > { %2486 = vmatpush.msra.mxu1 %v2175_v22  ;;  %7349 = vst [vmem:[#allocation16_spill] sm:$0xff] %v6053_v18 }
 0x7e1   : > { %2577 = vmatpush.msrb.mxu0 %v1790_v60  ;;  %2446 = vmatpush.msrb.mxu3 %v2045_v30  ;;  %v7350_v60 = vld [vmem:[#allocation37_spill] sm:$0xff]  ;;  %v7351_v30 = vld [vmem:[#allocation88_spill] sm:$0xff] }
 0x7e2   : > { %2487 = vmatpush.msra.mxu1 %v2173_v46  ;;  %2394 = vmatmul.f32.gmra.mxu2 %v6033_v25  ;;  %v2249_v46 = vmul.f32 %v7351_v30, %v7347_v13  ;;  %v7355_v30 = vld [vmem:[#allocation26_spill] sm:$0xff] }
 0x7e3   : > { %2426 = vmatmul.f32.gmra.mxu0 %v6038_v11  ;;  %2447 = vmatpush.msrb.mxu3 %v7344_v47  ;;  %v7352_v47 = vld [vmem:[#allocation89_spill] sm:$0xff] }
 0x7e5   : > { %2448 = vmatpush.msrb.mxu3 %v7345_v56  ;;  %v2250_v56 = vmul.f32 %v7352_v47, %v7348_v21  ;;  %v6060_v11 = vpop.permute.xlu2 %2065  ;;  %v7356_v47 = vld [vmem:[#allocation12_spill] sm:$0xff] }
 0x7e6   : > { %v2204_v8 = vpop.permute.xlu0 %2203 }
 0x7e7   : > { %v6044_v36 = vpop.permute.xlu1 %2091  ;;  %v2228_v22 = vsel %vm890_vm0, %v2204_v8, %v2220_v48  ;;  %v2236_v0 = vsel %vm890_vm0, %v2220_v48, %v2204_v8  ;;  %2449 = vmatpush.msrb.mxu3 %v7346_v62  ;;  %v7353_v48 = vld [vmem:[#allocation30_spill] sm:$0xff]  ;;  %v2247_v8 = vmul.f32 %v5718_v17, %v7347_v13  ;;  %v2245_v62 = vmul.f32 %v5772_v2, %v7347_v13 }
 0x7e8   : > { %v2251_v9 = vmul.f32 %v2228_v22, %v7347_v13  ;;  %v2252_v39 = vmul.f32 %v2236_v0, %v7348_v21  ;;  %v2248_v22 = vmul.f32 %v5722_v43, %v7348_v21  ;;  %v7354_v0 = vld [vmem:[#allocation29_spill] sm:$0xff]  ;;  %v2224_v17 = vsel %vm890_vm0, %v5784_v6, %v5839_v29 }
 0x7e9   : > { %2450 = vmatpush.msrb.mxu3 %v7350_v60  ;;  %v2232_v43 = vsel %vm890_vm0, %v5839_v29, %v5784_v6  ;;  %v7358_v6 = vld [vmem:[#allocation83_spill] sm:$0xff] }
 0x7ea   : > { %2529 = vmatpush.msrb.mxu2 %v2251_v9  ;;  %2734 = vmatpush.msra.mxu0 %v2252_v39  ;;  %v2246_v9 = vmul.f32 %v5776_v63, %v7348_v21  ;;  %v1969_v63 = vsel %vm730_vm1, %v5419_v52, %v5423_v32  ;;  %v1994_v29 = vmul.f32 %v7358_v6, %v7356_v47  ;;  %v7360_v52 = vld [vmem:[#allocation24_spill] sm:$0xff] }
 0x7eb   : > { %2429 = vmatmul.f32.gmra.mxu0 %v6053_v18  ;;  %2451 = vmatpush.msrb.mxu3 %v7353_v48  ;;  %v2223_v18 = vsel %vm890_vm0, %v5879_v31, %v5881_v49  ;;  %v2231_v32 = vsel %vm890_vm0, %v5881_v49, %v5879_v31  ;;  %v2222_v31 = vsel %vm890_vm0, %v5967_v40, %v5974_v51 }
 0x7ec   : > { %2530 = vmatpush.msrb.mxu2 %v2249_v46  ;;  %2735 = vmatpush.msra.mxu0 %v2250_v56  ;;  %v6088_v46 = vld [vmem:[#allocation2 + $0x10] sm:$0xff]  ;;  %v7357_v56 = vld [vmem:[#allocation74_spill] sm:$0xff]  ;;  %v2242_v49 = vmul.f32 %v2231_v32, %v7348_v21 }
 0x7ed   : > { %2452 = vmatpush.msrb.mxu3 %v7354_v0  ;;  %v1992_v48 = vmul.f32 %v7357_v56, %v7356_v47  ;;  %v6099_v0 = vld [vmem:[#allocation2 + $0xf8] sm:$0xff] }
 0x7ee   : > { %v6071_v60 = vpop.permute.xlu0 %2075  ;;  %2531 = vmatpush.msrb.mxu2 %v2247_v8  ;;  %2736 = vmatpush.msra.mxu0 %v2248_v22  ;;  %v7359_v8 = vld [vmem:[#allocation19_spill] sm:$0xff]  ;;  %v6163_v32 = vld [vmem:[#allocation2 + $0x38] sm:$0xff] }
 0x7ef   : > { %v2190_v39 = vpop.permute.xlu1 %2189  ;;  %v2100_v2 = vsel %vm810_vm7, %v6071_v60, %v6044_v36  ;;  %2453 = vmatpush.msrb.mxu3 %v7355_v30  ;;  %v1996_v30 = vmul.f32 %v5675_v55, %v7356_v47  ;;  %v2243_v55 = vmul.f32 %v2224_v17, %v7347_v13  ;;  %v2121_v56 = vmul.f32 %v5761_v7, %v7359_v8 }
 0x7f0   : > { %v2123_v22 = vmul.f32 %v2100_v2, %v7359_v8  ;;  %2532 = vmatpush.msrb.mxu2 %v2245_v62  ;;  %2737 = vmatpush.msra.mxu0 %v2246_v9  ;;  %v2098_v62 = vsel %vm810_vm7, %v5797_v38, %v5811_v12  ;;  %v2244_v2 = vmul.f32 %v2232_v43, %v7348_v21  ;;  %v2206_v9 = vpop.permute.xlu2 %2205 }
 0x7f1   : > { %2454 = vmatpush.msrb.mxu3 %v7360_v52  ;;  %v2230_v38 = vsel %vm890_vm0, %v5974_v51, %v5967_v40  ;;  %v2097_v12 = vsel %vm810_vm7, %v5846_v44, %v5818_v26  ;;  %v2241_v7 = vmul.f32 %v2223_v18, %v7347_v13  ;;  %v2119_v17 = vmul.f32 %v2098_v62, %v7359_v8  ;;  %v6177_v52 = vld [vmem:[#allocation2 + $0x20] sm:$0xff]  ;;  %v7362_v62 = vld [vmem:[#allocation85_spill] sm:$0xff] }
 0x7f2   : > { %2455 = vmatmul.f32.vlgmr.msrb.gmra.mxu3 %v6088_v46  ;;  %2488 = vmatpush.msra.mxu1 %v2123_v22  ;;  %v2221_v40 = vsel %vm890_vm0, %v2190_v39, %v2206_v9  ;;  %v2229_v51 = vsel %vm890_vm0, %v2206_v9, %v2190_v39  ;;  %v1968_v26 = vsel %vm730_vm1, %v5366_v19, %v5349_v28 }
 0x7f3   : > { %2432 = vmatmul.f32.gmra.mxu0 %v6099_v0  ;;  %2603 = vmatpush.msra.mxu3 %v1996_v30  ;;  %v2239_v44 = vmul.f32 %v2222_v31, %v7347_v13  ;;  %v2240_v18 = vmul.f32 %v2230_v38, %v7348_v21  ;;  %v2117_v6 = vmul.f32 %v2097_v12, %v7359_v8  ;;  %v6161_v30 = vld [vmem:[#allocation2 + $0x120] sm:$0xff] }
 0x7f4   : > { %2533 = vmatpush.msrb.mxu2 %v2243_v55  ;;  %2738 = vmatpush.msra.mxu0 %v2244_v2  ;;  %v2172_v39 = vsel %vm850_vm6, %v5916_v42, %v5918_v58  ;;  %v2096_v19 = vsel %vm810_vm7, %v5851_v33, %v6035_v61  ;;  %v2237_v28 = vmul.f32 %v2221_v40, %v7347_v13  ;;  %v7363_v38 = vld [vmem:[#allocation79_spill] sm:$0xff] }
 0x7f5   : > { %2604 = vmatpush.msra.mxu3 %v1994_v29  ;;  %2489 = vmatpush.msra.mxu1 %v2121_v56  ;;  %v1990_v29 = vmul.f32 %v1969_v63, %v7356_v47  ;;  %v2238_v22 = vmul.f32 %v2229_v51, %v7348_v21  ;;  %v1967_v42 = vsel %vm730_vm1, %v5289_v10, %v5302_v23  ;;  %v7361_v63 = vld [vmem:[#allocation17_spill] sm:$0xff]  ;;  %v6222_v40 = vld [vmem:[#allocation2 + $0x60] sm:$0xff] }
 0x7f6   : > { %2534 = vmatpush.msrb.mxu2 %v2241_v7  ;;  %2739 = vmatpush.msra.mxu0 %v2242_v49  ;;  %v6147_v43 = vpop.permute.xlu0 %2063  ;;  %v2095_v13 = vsel %vm810_vm7, %v6060_v11, %v6028_v16  ;;  %v1988_v21 = vmul.f32 %v1968_v26, %v7356_v47  ;;  %v1966_v10 = vsel %vm730_vm1, %v5242_v59, %v5264_v1  ;;  %v7364_v51 = vld [vmem:[#allocation13_spill] sm:$0xff] }
 0x7f7   : > { %2605 = vmatpush.msra.mxu3 %v1992_v48  ;;  %2490 = vmatpush.msra.mxu1 %v2119_v17  ;;  %v6169_v58 = vpop.permute.xlu1 %2079  ;;  %v2188_v48 = vmul.f32 %v2172_v39, %v7361_v63  ;;  %v2115_v23 = vmul.f32 %v2096_v19, %v7359_v8  ;;  %v2186_v55 = vmul.f32 %v7362_v62, %v7361_v63 }
 0x7f8   : > { %2535 = vmatpush.msrb.mxu2 %v2239_v44  ;;  %2740 = vmatpush.msra.mxu0 %v2240_v18  ;;  %v2094_v2 = vsel %vm810_vm7, %v6147_v43, %v6169_v58  ;;  %v1986_v56 = vmul.f32 %v1967_v42, %v7356_v47  ;;  %v1965_v59 = vsel %vm730_vm1, %v5206_v5, %v5162_v20  ;;  %v6206_v7 = vpop.permute.xlu2 %2061  ;;  %v6236_v18 = vld [vmem:[#allocation2 + $0x48] sm:$0xff]  ;;  %v7371_v42 = vld [vmem:[#allocation82_spill] sm:$0xff] }
 0x7f9   : > { %2606 = vmatpush.msra.mxu3 %v1990_v29  ;;  %2491 = vmatpush.msra.mxu1 %v2117_v6  ;;  %v2169_v1 = vsel %vm850_vm6, %v7318_v37, %v7319_v3  ;;  %v2113_v31 = vmul.f32 %v2095_v13, %v7359_v8  ;;  %v2184_v12 = vmul.f32 %v7363_v38, %v7361_v63  ;;  %v7368_v6 = vld [vmem:[#allocation66_spill] sm:$0xff]  ;;  %v6283_v38 = vld [vmem:[#allocation2 + $0x88] sm:$0xff] }
 0x7fa   : > { %2536 = vmatpush.msrb.mxu2 %v2237_v28  ;;  %2741 = vmatpush.msra.mxu0 %v2238_v22  ;;  %v1984_v20 = vmul.f32 %v1966_v10, %v7356_v47  ;;  %v2168_v3 = vsel %vm850_vm6, %v7327_v57, %v7328_v41  ;;  %v2111_v37 = vmul.f32 %v2094_v2, %v7359_v8  ;;  %v7369_v29 = vld [vmem:[#allocation22_spill] sm:$0xff]  ;;  %v7373_v10 = vld [vmem:[#allocation64_spill] sm:$0xff] }
 0x7fb   : > { %2435 = vmatmul.f32.gmra.mxu0 %v6161_v30  ;;  %2458 = vmatmul.f32.gmra.mxu3 %v6163_v32  ;;  %v1982_v9 = vmul.f32 %v1965_v59, %v7356_v47  ;;  %v2182_v17 = vmul.f32 %v2169_v1, %v7361_v63  ;;  %v2167_v41 = vsel %vm850_vm6, %v7333_v4, %v7334_v15  ;;  %v7365_v4 = vld [vmem:[#allocation91_spill] sm:$0xff]  ;;  %v6240_v15 = vld [vmem:[#allocation2 + $0x18] sm:$0xff] }
 0x7fc   : > { %2607 = vmatpush.msra.mxu3 %v1988_v21  ;;  %2685 = vmatpush.msra.mxu2 %v2188_v48  ;;  %v1932_v26 = vmul.f32 %v5789_v24, %v7364_v51  ;;  %v2044_v47 = vsel %vm770_vm8, %v5890_v54, %v5911_v35  ;;  %v2180_v44 = vmul.f32 %v2168_v3, %v7361_v63  ;;  %v7367_v35 = vld [vmem:[#allocation69_spill] sm:$0xff]  ;;  %v3839_v2 = vld [vmem:[%s4119_s27 + $0x38] sm:$0xff] }
 0x7fd   : > { %2492 = vmatpush.msra.mxu1 %v2115_v23  ;;  %3704 = vmatmul.msk.f32.vlgmr.msrb.gmra.mxu2 %vm1290_vm9, %v6177_v52  ;;  %v2166_v24 = vsel %vm850_vm6, %v7337_v50, %v7338_v53  ;;  %v1905_v39 = vsel %vm690_vm2, %v7368_v6, %v7367_v35  ;;  %v2060_v19 = vmul.f32 %v2044_v47, %v7369_v29  ;;  %v7370_v53 = vld [vmem:[#allocation75_spill] sm:$0xff]  ;;  %v7372_v21 = vld [vmem:[#allocation57_spill] sm:$0xff] }
 0x7fe   : > { %2608 = vmatpush.msra.mxu3 %v1986_v56  ;;  %2686 = vmatpush.msra.mxu2 %v2186_v55  ;;  %v6209_v5 = vpop.permute.xlu0 %2077  ;;  %v2178_v28 = vmul.f32 %v2167_v41, %v7361_v63  ;;  %v2165_v50 = vsel %vm850_vm6, %v7341_v34, %v7342_v27  ;;  %v1928_v22 = vmul.f32 %v7370_v53, %v7364_v51  ;;  %v7374_v34 = vld [vmem:[#allocation71_spill] sm:$0xff]  ;;  %v7375_v27 = vld [vmem:[#allocation68_spill] sm:$0xff]  ;;  %v7376_v56 = vld [vmem:[#allocation77_spill] sm:$0xff] }
 0x7ff   : > { %2493 = vmatpush.msra.mxu1 %v2113_v31  ;;  %v2093_v49 = vsel %vm810_vm7, %v6206_v7, %v6209_v5  ;;  %v2058_v48 = vmul.f32 %v7371_v42, %v7369_v29  ;;  %v2176_v13 = vmul.f32 %v2166_v24, %v7361_v63  ;;  %v1904_v23 = vsel %vm690_vm2, %v7373_v10, %v7372_v21  ;;  %v7381_v41 = vld [vmem:[#allocation46_spill] sm:$0xff]  ;;  %v7383_v47 = vld [vmem:[#allocation53_spill] sm:$0xff]  ;;  %v7385_v24 = vld [vmem:[#allocation20_spill] sm:$0xff] }
 0x800   : > { %2609 = vmatpush.msra.mxu3 %v1984_v20  ;;  %2687 = vmatpush.msra.mxu2 %v2184_v12  ;;  %v2109_v57 = vmul.f32 %v2093_v49, %v7359_v8  ;;  %v7366_v8 = vld [vmem:[#allocation87_spill] sm:$0xff]  ;;  %v2041_v62 = vsel %vm770_vm8, %v7375_v27, %v7374_v34  ;;  %v1926_v55 = vmul.f32 %v1905_v39, %v7364_v51  ;;  %v7377_v12 = vld [vmem:[#allocation52_spill] sm:$0xff]  ;;  %v7378_v20 = vld [vmem:[#allocation50_spill] sm:$0xff] }
 0x801   : > { %2494 = vmatpush.msra.mxu1 %v2111_v37  ;;  %v1930_v54 = vmul.f32 %v7366_v8, %v7364_v51  ;;  %v2056_v59 = vmul.f32 %v7376_v56, %v7369_v29  ;;  %v2108_v1 = vsel %vm810_vm7, %v6044_v36, %v6071_v60  ;;  %v2174_v31 = vmul.f32 %v2165_v50, %v7361_v63  ;;  %v7379_v37 = vld [vmem:[#allocation60_spill] sm:$0xff]  ;;  %v7380_v49 = vld [vmem:[#allocation59_spill] sm:$0xff]  ;;  %v7389_v50 = vld [vmem:[#allocation90_spill] sm:$0xff] }
 0x802   : > { %2610 = vmatpush.msra.mxu3 %v1982_v9  ;;  %2688 = vmatpush.msra.mxu2 %v2182_v17  ;;  %v1903_v3 = vsel %vm690_vm2, %v7378_v20, %v7377_v12  ;;  %v2040_v9 = vsel %vm770_vm8, %v7380_v49, %v7379_v37  ;;  %v3840_v17 = vld [vmem:[%s4119_s27 + $0x28] sm:$0xff]  ;;  %v1924_v36 = vmul.f32 %v1904_v23, %v7364_v51  ;;  %v6296_v63 = vld [vmem:[#allocation2 + $0x40] sm:$0xff]  ;;  %v7391_v21 = vld [vmem:[#allocation93_spill] sm:$0xff] }
 0x803   : > { %2461 = vmatmul.f32.gmra.mxu3 %v6222_v40  ;;  %2578 = vmatmul.f32.vlgmr.msrb.gmra.mxu0 %v7365_v4  ;;  %v2054_v60 = vmul.f32 %v2041_v62, %v7369_v29  ;;  %v2124_v8 = vmul.f32 %v2108_v1, %v7385_v24  ;;  %v1922_v35 = vmul.f32 %v1903_v3, %v7364_v51  ;;  %v7387_v39 = vld [vmem:[#allocation32_spill] sm:$0xff]  ;;  %v6326_v23 = vld [vmem:[#allocation2 + $0x70] sm:$0xff]  ;;  %v3841_v34 = vld [vmem:[%s4119_s27 + $0x18] sm:$0xff] }
 0x804   : > { %2611 = vmatpush.msra.mxu3 %v1932_v26  ;;  %2689 = vmatpush.msra.mxu2 %v2180_v44  ;;  %v7384_v44 = vld [vmem:[#allocation54_spill] sm:$0xff]  ;;  %v2052_v6 = vmul.f32 %v2040_v9, %v7369_v29  ;;  %v2122_v53 = vmul.f32 %v7389_v50, %v7385_v24  ;;  %v2120_v10 = vmul.f32 %v7391_v21, %v7385_v24  ;;  %v7392_v27 = vld [vmem:[#allocation33_spill] sm:$0xff]  ;;  %v7393_v62 = vld [vmem:[#allocation35_spill] sm:$0xff] }
 0x805   : > { %2495 = vmatpush.msra.mxu1 %v2109_v57  ;;  %3705 = vmatmul.msk.f32.gmra.mxu2 %vm1290_vm9, %v6236_v18  ;;  %v7382_v57 = vld [vmem:[#allocation40_spill] sm:$0xff]  ;;  %v2039_v4 = vsel %vm770_vm8, %v7384_v44, %v7383_v47  ;;  %v2103_v20 = vsel %vm810_vm7, %v6028_v16, %v6060_v11  ;;  %v2102_v3 = vsel %vm810_vm7, %v6169_v58, %v6147_v43  ;;  %v7395_v16 = vld [vmem:[#allocation94_spill] sm:$0xff]  ;;  %v7397_v9 = vld [vmem:[#allocation55_spill] sm:$0xff] }
 0x806   : > { %2496 = vmatmul.f32.vlgmr.msra.gmra.mxu1 %v6240_v15  ;;  %2612 = vmatpush.msra.mxu3 %v1930_v54  ;;  %v1902_v26 = vsel %vm690_vm2, %v7382_v57, %v7381_v41  ;;  %v7386_v54 = vld [vmem:[#allocation92_spill] sm:$0xff]  ;;  %v2114_v11 = vmul.f32 %v2103_v20, %v7385_v24  ;;  %v2112_v37 = vmul.f32 %v2102_v3, %v7385_v24  ;;  %v7396_v49 = vld [vmem:[#allocation58_spill] sm:$0xff]  ;;  %v7401_v41 = vld [vmem:[#allocation31_spill] sm:$0xff]  ;;  %v6471_v3 = vpop.permute.xlu0 %2320 }
 0x807   : > { %2644 = vmatpush.msrb.mxu1 %v2060_v19  ;;  %2690 = vmatpush.msra.mxu2 %v2178_v28  ;;  %v7388_v19 = vld [vmem:[#allocation41_spill] sm:$0xff]  ;;  %v7394_v56 = vld [vmem:[#allocation96_spill] sm:$0xff]  ;;  %v6368_v43 = vld [vmem:[#allocation2 + $0x98] sm:$0xff] }
 0x808   : > { %2613 = vmatpush.msra.mxu3 %v1928_v22  ;;  %3475 = vmatpush.msrb.mxu0 %v3839_v2  ;;  %v1901_v28 = vsel %vm690_vm2, %v7388_v19, %v7387_v39  ;;  %v7390_v22 = vld [vmem:[#allocation42_spill] sm:$0xff]  ;;  %v3842_v12 = vld [vmem:[%s4119_s27 + $0x8] sm:$0xff]  ;;  %v6385_v57 = vld [vmem:[#allocation2 + $0xc0] sm:$0xff] }
 0x809   : > { %2645 = vmatpush.msrb.mxu1 %v2058_v48  ;;  %2691 = vmatpush.msra.mxu2 %v2176_v13  ;;  %v2038_v42 = vsel %vm770_vm8, %v7390_v22, %v7336_v45  ;;  %v1920_v48 = vmul.f32 %v1902_v26, %v7364_v51  ;;  %v2050_v13 = vmul.f32 %v2039_v4, %v7369_v29  ;;  %v3844_v26 = vld [vmem:[%s4119_s27 + $0x20] sm:$0xff]  ;;  %v7402_v47 = vld [vmem:[#allocation28_spill] sm:$0xff]  ;;  %v3845_v4 = vld [vmem:[%s4119_s27 + $0x10] sm:$0xff] }
 0x80a   : > { %2614 = vmatpush.msra.mxu3 %v1926_v55  ;;  %3476 = vmatpush.msrb.mxu0 %v3840_v17  ;;  %v2037_v45 = vsel %vm770_vm8, %v7393_v62, %v7392_v27  ;;  %v2104_v55 = vsel %vm810_vm7, %v6035_v61, %v5851_v33  ;;  %v1918_v2 = vmul.f32 %v1901_v28, %v7364_v51  ;;  %v6352_v51 = vld [vmem:[#allocation2 + $0x68] sm:$0xff]  ;;  %v6372_v17 = vld [vmem:[#allocation2 + $0xd8] sm:$0xff]  ;;  %v6389_v44 = vld [vmem:[#allocation2 + $0x100] sm:$0xff] }
 0x80b   : > { %2646 = vmatpush.msrb.mxu1 %v2056_v59  ;;  %2692 = vmatpush.msra.mxu2 %v2174_v31  ;;  %v2118_v59 = vmul.f32 %v7394_v56, %v7385_v24  ;;  %v2048_v1 = vmul.f32 %v2038_v42, %v7369_v29  ;;  %v6341_v31 = vld [vmem:[#allocation2 + $0xb0] sm:$0xff]  ;;  %v2116_v33 = vmul.f32 %v2104_v55, %v7385_v24  ;;  %v2282_v39 = vld [vmem:[#allocation2 + $0xe8] sm:$0xff]  ;;  %v2281_v28 = vld [vmem:[#allocation2 + $0xe0] sm:$0xff] }
 0x80c   : > { %2464 = vmatmul.f32.gmra.mxu3 %v6283_v38  ;;  %2581 = vmatmul.f32.gmra.mxu0 %v7386_v54  ;;  %v2046_v61 = vmul.f32 %v2037_v45, %v7369_v29  ;;  %v2101_v29 = vsel %vm810_vm7, %v6209_v5, %v6206_v7  ;;  %v6377_v7 = vld [vmem:[#allocation2 + $0x90] sm:$0xff]  ;;  %v3846_v54 = vld [vmem:[%s4119_s27] sm:$0xff]  ;;  %v6399_v19 = vld [vmem:[#allocation2 + $0x128] sm:$0xff] }
 0x80d   : > { %2615 = vmatpush.msra.mxu3 %v1924_v36  ;;  %2647 = vmatpush.msrb.mxu1 %v2054_v60  ;;  %v2110_v58 = vmul.f32 %v2101_v29, %v7385_v24  ;;  %v7399_v5 = vld [vmem:[#allocation97_spill] sm:$0xff]  ;;  %v7400_v36 = vld [vmem:[#allocation34_spill] sm:$0xff]  ;;  %v7403_v24 = vld [vmem:[#allocation27_spill] sm:$0xff] }
 0x80e   : > { %2693 = vmatpush.msra.mxu2 %v2124_v8  ;;  %2499 = vmatmul.f32.gmra.mxu1 %v6296_v63  ;;  %v3843_v60 = vld [vmem:[%s4119_s27 + $0x30] sm:$0xff]  ;;  %v2276_v8 = vld [vmem:[#allocation2 + $0xb8] sm:$0xff]  ;;  %v7406_v50 = vld [vmem:[#allocation63_spill] sm:$0xff]  ;;  %s3906_s27 = scalar_lea.hbm %s7079_s16, 256 }
 0x80f   : > { %2616 = vmatpush.msra.mxu3 %v1922_v35  ;;  %2648 = vmatpush.msrb.mxu1 %v2052_v6  ;;  %v7404_v35 = vld [vmem:[#allocation72_spill] sm:$0xff]  ;;  %v7405_v6 = vld [vmem:[#allocation25_spill] sm:$0xff]  ;;  %v2292_v21 = vld [vmem:[#allocation2 + $0x138] sm:$0xff]  ;;  %p3908_p4 = scmp.lt.s32.totalorder %s3906_s27, %s3902_s23 }
 0x810   : > { %2694 = vmatpush.msra.mxu2 %v2122_v53  ;;  %3477 = vmatpush.msrb.mxu0 %v3841_v34  ;;  %v2287_v53 = vld [vmem:[#allocation2 + $0x110] sm:$0xff]  ;;  %v2286_v42 = vld [vmem:[#allocation2 + $0x108] sm:$0xff]  ;;  %v7409_v27 = vld [vmem:[#allocation14_spill] sm:$0xff] }
 0x811   : > { %2617 = vmatpush.msra.mxu3 %v1920_v48  ;;  %2649 = vmatpush.msrb.mxu1 %v2050_v13  ;;  %v7407_v48 = vld [vmem:[#allocation39_spill] sm:$0xff]  ;;  %v7410_v45 = vld [vmem:[#allocation80_spill] sm:$0xff]  ;;  %p3909_p7 = por %p3908_p4, %p3907_p3 }
 0x812   : > { %2695 = vmatpush.msra.mxu2 %v2120_v10  ;;  %3478 = vmatpush.msrb.mxu0 %v3842_v12  ;;  %v7408_v13 = vld [vmem:[#allocation95_spill] sm:$0xff]  ;;  %v2291_v10 = vld [vmem:[#allocation2 + $0x130] sm:$0xff] }
 0x813   : > { %3706 = vmatmul.msk.f32.gmra.mxu2 %vm1290_vm9, %v6326_v23  ;;  %2618 = vmatpush.msra.mxu3 %v1918_v2  ;;  %v7411_v56 = vld [vmem:[#allocation15_spill] sm:$0xff]  ;;  %p3910_p8 = pnand %p3909_p7, %p3905_p2 }
 0x814   : > { %2650 = vmatpush.msrb.mxu1 %v2048_v1  ;;  %2696 = vmatpush.msra.mxu2 %v2118_v59  ;;  %v7412_v59 = vld [vmem:[#allocation21_spill] sm:$0xff]  ;;  %v6451_v1 = vpop.permute.xlu1 %2330 }
 0x815   : > { %2467 = vmatmul.f32.gmra.mxu3 %v6341_v31  ;;  %2584 = vmatmul.f32.gmra.mxu0 %v7395_v16 }
 0x816   : > { %2651 = vmatpush.msrb.mxu1 %v2046_v61  ;;  %2697 = vmatpush.msra.mxu2 %v2116_v33 }
 0x817   : > { %2502 = vmatmul.f32.gmra.mxu1 %v6352_v51 }
 0x818   : > { %2652 = vmatpush.msrb.mxu1 %v7396_v49  ;;  %2698 = vmatpush.msra.mxu2 %v2114_v11 }
 0x81a   : > { %2653 = vmatpush.msrb.mxu1 %v7397_v9  ;;  %2699 = vmatpush.msra.mxu2 %v2112_v37 }
 0x81b   : > { %3707 = vmatmul.msk.f32.gmra.mxu2 %vm1290_vm9, %v6368_v43 }
 0x81c   : > { %2654 = vmatpush.msrb.mxu1 %v7398_v14  ;;  %2700 = vmatpush.msra.mxu2 %v2110_v58  ;;  %v6461_v12 = vpop.permute.xlu1 %2315 }
 0x81d   : > { %2470 = vmatmul.f32.gmra.mxu3 %v6372_v17  ;;  %2587 = vmatmul.f32.gmra.mxu0 %v7399_v5 }
 0x81e   : > { %2655 = vmatpush.msrb.mxu1 %v7400_v36  ;;  %3434 = vmatpush.msrb.mxu2 %v3843_v60 }
 0x81f   : > { %2505 = vmatmul.f32.gmra.mxu1 %v6377_v7 }
 0x820   : > { %2656 = vmatpush.msrb.mxu1 %v7401_v41  ;;  %3435 = vmatpush.msrb.mxu2 %v3844_v26 }
 0x822   : > { %2657 = vmatpush.msrb.mxu1 %v7402_v47  ;;  %3436 = vmatpush.msrb.mxu2 %v3845_v4 }
 0x823   : > { %3708 = vmatmul.msk.f32.gmra.mxu2 %vm1290_vm9, %v6385_v57 }
 0x824   : > { %2658 = vmatpush.msrb.mxu1 %v7403_v24  ;;  %3437 = vmatpush.msrb.mxu2 %v3846_v54  ;;  %v6473_v16 = vpop.permute.xlu1 %2300 }
 0x825   : > { %2473 = vmatmul.f32.gmra.mxu3 %v6389_v44  ;;  %2590 = vmatmul.f32.gmra.mxu0 %v7404_v35 }
 0x826   : > { %2659 = vmatpush.msrb.mxu1 %v7405_v6 }
 0x827   : > { %2508 = vmatmul.f32.gmra.mxu1 %v2276_v8 }
 0x82b   : > { %3709 = vmatmul.msk.f32.gmra.mxu2 %vm1290_vm9, %v2282_v39 }
 0x82d   : > { %2476 = vmatmul.f32.gmra.mxu3 %v6399_v19  ;;  %2593 = vmatmul.f32.gmra.mxu0 %v7406_v50  ;;  %v6404_v22 = vpop.f32.mrf.mxu2 }
 0x82f   : > { %2511 = vmatmul.f32.gmra.mxu1 %v2281_v28 }
 0x833   : > { %3710 = vmatmul.msk.f32.gmra.mxu2 %vm1290_vm9, %v2287_v53 }
 0x835   : > { %2596 = vmatmul.f32.gmra.mxu0 %v7407_v48  ;;  %2619 = vmatmul.f32.vlgmr.msra.gmra.mxu3 %v7408_v13  ;;  %v2377_v34 = vpop.f32.mrf.mxu2 }
 0x836   : > { %v2378_v11 = vadd.f32 %v2377_v34, %v6473_v16 }
 0x837   : > { %2514 = vmatmul.f32.gmra.mxu1 %v2286_v42 }
 0x83b   : > { %3711 = vmatmul.msk.f32.gmra.mxu2 %vm1290_vm9, %v2292_v21 }
 0x83d   : > { %2599 = vmatmul.f32.gmra.mxu0 %v6033_v25  ;;  %2622 = vmatmul.f32.gmra.mxu3 %v7409_v27  ;;  %v2380_v2 = vpop.f32.mrf.mxu2 }
 0x83e   : > { %v6412_v62 = vpop.f32.mrf.mxu0 }
 0x83f   : > { %2517 = vmatmul.f32.gmra.mxu1 %v2291_v10 }
 0x843   : > { %2701 = vmatmul.f32.vlgmr.msra.gmra.mxu2 %v6240_v15 }
 0x845   : > { %2625 = vmatmul.f32.gmra.mxu3 %v7410_v45  ;;  %3712 = vmatmul.msk.f32.vlgmr.msra.gmra.mxu0 %vm1290_vm9, %v6177_v52  ;;  %v2383_v15 = vpop.f32.mrf.mxu2 }
 0x846   : > { %v2418_v55 = vpop.f32.mrf.mxu0 }
 0x847   : > { %2660 = vmatmul.f32.vlgmr.msrb.gmra.mxu1 %v6088_v46  ;;  %v2419_v37 = vadd.f32 %v2418_v55, %v2378_v11 }
 0x84b   : > { %2704 = vmatmul.f32.gmra.mxu2 %v6296_v63  ;;  %v7413_v63 = vld [vmem:[#allocation16_spill] sm:$0xff] }
 0x84d   : > { %2628 = vmatmul.f32.gmra.mxu3 %v7411_v56  ;;  %3713 = vmatmul.msk.f32.gmra.mxu0 %vm1290_vm9, %v6236_v18  ;;  %v6429_v52 = vpop.f32.mrf.mxu2 }
 0x84e   : > { %v2421_v25 = vpop.f32.mrf.mxu0 }
 0x84f   : > { %2663 = vmatmul.f32.gmra.mxu1 %v6163_v32 }
 0x853   : > { %2707 = vmatmul.f32.gmra.mxu2 %v6352_v51 }
 0x855   : > { %2631 = vmatmul.f32.gmra.mxu3 %v7412_v59  ;;  %3714 = vmatmul.msk.f32.gmra.mxu0 %vm1290_vm9, %v6326_v23  ;;  %v6436_v18 = vpop.f32.mrf.mxu2 }
 0x857   : > { %2666 = vmatmul.f32.gmra.mxu1 %v6222_v40  ;;  %v2424_v46 = vpop.f32.mrf.mxu0 }
 0x85b   : > { %2710 = vmatmul.f32.gmra.mxu2 %v6377_v7  ;;  %v6480_v7 = vpop.permute.xlu0 %2305 }
 0x85c   : > { %v2381_v36 = vadd.f32 %v2380_v2, %v6480_v7  ;;  %v2390_v2 = vadd.f32 %v6436_v18, %v6471_v3 }
 0x85d   : > { %2634 = vmatmul.f32.gmra.mxu3 %v7413_v63  ;;  %3715 = vmatmul.msk.f32.gmra.mxu0 %vm1290_vm9, %v6368_v43  ;;  %v6446_v23 = vpop.f32.mrf.mxu2 }
 0x85e   : > { %v2422_v41 = vadd.f32 %v2421_v25, %v2381_v36 }
 0x85f   : > { %2669 = vmatmul.f32.gmra.mxu1 %v6283_v38 }
 0x860   : > { %v2427_v32 = vpop.f32.mrf.mxu0 }
 0x863   : > { %2713 = vmatmul.f32.gmra.mxu2 %v2276_v8 }
 0x865   : > { %2637 = vmatmul.f32.gmra.mxu3 %v6099_v0  ;;  %3716 = vmatmul.msk.f32.gmra.mxu0 %vm1290_vm9, %v6385_v57 }
 0x867   : > { %2672 = vmatmul.f32.gmra.mxu1 %v6341_v31 }
 0x868   : > { %v6442_v40 = vpop.f32.mrf.mxu0 }
 0x86b   : > { %2716 = vmatmul.f32.gmra.mxu2 %v2281_v28 }
 0x86d   : > { %2640 = vmatmul.f32.gmra.mxu3 %v6161_v30  ;;  %3717 = vmatmul.msk.f32.gmra.mxu0 %vm1290_vm9, %v2282_v39  ;;  %v6459_v30 = vpop.f32.mrf.mxu2 }
 0x86e   : > { %v2396_v36 = vadd.f32 %v6459_v30, %v6451_v1 }
 0x86f   : > { %2675 = vmatmul.f32.gmra.mxu1 %v6372_v17  ;;  %v6478_v17 = vpop.permute.xlu2 %2325 }
 0x870   : > { %v6449_v38 = vpop.f32.mrf.mxu0 }
 0x873   : > { %2719 = vmatmul.f32.gmra.mxu2 %v2286_v42  ;;  %v2387_v42 = vadd.f32 %v6429_v52, %v6461_v12 }
 0x875   : > { %v6453_v0 = vpop.f32.mrf.mxu3  ;;  %3718 = vmatmul.msk.f32.gmra.mxu0 %vm1290_vm9, %v2287_v53 }
 0x877   : > { %2678 = vmatmul.f32.gmra.mxu1 %v6389_v44  ;;  %v6487_v4 = vpop.permute.xlu2 %2310 }
 0x878   : > { %v6457_v31 = vpop.f32.mrf.mxu0  ;;  %v2384_v8 = vadd.f32 %v2383_v15, %v6487_v4  ;;  %v2431_v15 = vadd.f32 %v6442_v40, %v2390_v2 }
 0x87a   : > { %v2425_v6 = vadd.f32 %v2424_v46, %v2384_v8 }
 0x87b   : > { %2722 = vmatmul.f32.gmra.mxu2 %v2291_v10 }
 0x87d   : > { %3719 = vmatmul.msk.f32.gmra.mxu0 %vm1290_vm9, %v2292_v21  ;;  %v2428_v21 = vadd.f32 %v2427_v32, %v2387_v42  ;;  %v2393_v32 = vadd.f32 %v6446_v23, %v6478_v17 }
 0x87e   : > { %v2459_v20 = vpop.f32.mrf.mxu3 }
 0x87f   : > { %2681 = vmatmul.f32.gmra.mxu1 %v6399_v19  ;;  %v2460_v43 = vadd.f32 %v2459_v20, %v2419_v37  ;;  %v2434_v37 = vadd.f32 %v6449_v38, %v2393_v32 }
 0x880   : > { %v6465_v33 = vpop.f32.mrf.mxu0  ;;  %v6467_v61 = vpop.f32.mrf.mxu2 }
 0x883   : > { %v6469_v51 = vpop.f32.mrf.mxu1 }
 0x886   : > { %v2462_v29 = vpop.f32.mrf.mxu3 }
 0x887   : > { %v2463_v26 = vadd.f32 %v2462_v29, %v2422_v41 }
 0x888   : > { %v2541_v9 = vpop.f32.mrf.mxu2 }
 0x889   : > { %v6476_v49 = vpop.f32.mrf.mxu0 }
 0x88b   : > { %v2500_v58 = vpop.f32.mrf.mxu1 }
 0x88c   : > { %v2501_v14 = vadd.f32 %v2500_v58, %v2460_v43 }
 0x88e   : > { %v6482_v5 = vadd.f32 %v2541_v9, %v2501_v14  ;;  %v6510_v14 = vpop.permute.xlu2 %2295 }
 0x88f   : > { %v2465_v60 = vpop.f32.mrf.mxu3 }
 0x890   : > { %v2466_v19 = vadd.f32 %v2465_v60, %v2425_v6  ;;  %v2580_v60 = vadd.f32 %v6465_v33, %v6510_v14  ;;  %v2583_v6 = vadd.f32 %v6476_v49, %v6473_v16 }
 0x892   : > { %v6485_v57 = vpop.f32.mrf.mxu0 }
 0x894   : > { %v2503_v47 = vpop.f32.mrf.mxu1 }
 0x895   : > { %v2504_v44 = vadd.f32 %v2503_v47, %v2463_v26  ;;  %v2437_v26 = vadd.f32 %v6457_v31, %v2396_v36  ;;  %v2586_v36 = vadd.f32 %v6485_v57, %v6480_v7 }
 0x896   : > { %v2544_v24 = vpop.f32.mrf.mxu2 }
 0x897   : > { %v6490_v54 = vadd.f32 %v2544_v24, %v2504_v44 }
 0x898   : > { %v2468_v35 = vpop.f32.mrf.mxu3 }
 0x899   : > { %v2469_v34 = vadd.f32 %v2468_v35, %v2428_v21 }
 0x89a   : > { %v6492_v39 = vpop.f32.mrf.mxu0 }
 0x89c   : > { %v2506_v28 = vpop.f32.mrf.mxu1 }
 0x89d   : > { %v2507_v50 = vadd.f32 %v2506_v28, %v2466_v19 }
 0x89e   : > { %v2547_v53 = vpop.f32.mrf.mxu2 }
 0x89f   : > { %v6496_v48 = vadd.f32 %v2547_v53, %v2507_v50 }
 0x8a0   : > { %v2471_v13 = vpop.f32.mrf.mxu3 }
 0x8a1   : > { %v2472_v46 = vadd.f32 %v2471_v13, %v2431_v15 }
 0x8a2   : > { %v6498_v10 = vpop.f32.mrf.mxu0 }
 0x8a4   : > { %v2509_v27 = vpop.f32.mrf.mxu1 }
 0x8a5   : > { %v2510_v45 = vadd.f32 %v2509_v27, %v2469_v34 }
 0x8a6   : > { %v2550_v55 = vpop.f32.mrf.mxu2 }
 0x8a7   : > { %v6502_v56 = vadd.f32 %v2550_v55, %v2510_v45 }
 0x8a8   : > { %v2474_v25 = vpop.f32.mrf.mxu3 }
 0x8a9   : > { %v2475_v18 = vadd.f32 %v2474_v25, %v2434_v37 }
 0x8aa   : > { %v2594_v59 = vpop.f32.mrf.mxu0 }
 0x8ac   : > { %v2512_v52 = vpop.f32.mrf.mxu1 }
 0x8ad   : > { %v2513_v63 = vadd.f32 %v2512_v52, %v2472_v46 }
 0x8ae   : > { %v2553_v20 = vpop.f32.mrf.mxu2 }
 0x8af   : > { %v6507_v11 = vadd.f32 %v2553_v20, %v2513_v63 }
 0x8b0   : > { %v2477_v29 = vpop.f32.mrf.mxu3 }
 0x8b1   : > { %v2478_v44 = vadd.f32 %v2477_v29, %v2437_v26 }
 0x8b2   : > { %v2597_v43 = vpop.f32.mrf.mxu0 }
 0x8b4   : > { %v2515_v58 = vpop.f32.mrf.mxu1 }
 0x8b5   : > { %v2516_v9 = vadd.f32 %v2515_v58, %v2475_v18 }
 0x8b6   : > { %v2556_v40 = vpop.f32.mrf.mxu2 }
 0x8b7   : > { %v6516_v41 = vadd.f32 %v2556_v40, %v2516_v9  ;;  %v2595_v9 = vadd.f32 %v2594_v59, %v6471_v3 }
 0x8b8   : > { %v2620_v23 = vpop.f32.mrf.mxu3 }
 0x8b9   : > { %v2621_v47 = vadd.f32 %v2620_v23, %v2580_v60 }
 0x8ba   : > { %v2600_v38 = vpop.f32.mrf.mxu0 }
 0x8bc   : > { %v2518_v24 = vpop.f32.mrf.mxu1 }
 0x8bd   : > { %v2519_v8 = vadd.f32 %v2518_v24, %v2478_v44 }
 0x8be   : > { %v2559_v35 = vpop.f32.mrf.mxu2 }
 0x8bf   : > { %v6521_v19 = vadd.f32 %v2559_v35, %v2519_v8 }
 0x8c0   : > { %v2623_v30 = vpop.f32.mrf.mxu3 }
 0x8c1   : > { %v2624_v28 = vadd.f32 %v2623_v30, %v2583_v6  ;;  %v2598_v6 = vadd.f32 %v2597_v43, %v6478_v17 }
 0x8c2   : > { %v2743_v50 = vpop.f32.mrf.mxu0 }
 0x8c4   : > { %v2661_v33 = vpop.f32.mrf.mxu1 }
 0x8c5   : > { %v2662_v53 = vadd.f32 %v2661_v33, %v2621_v47 }
 0x8c6   : > { %v2702_v42 = vpop.f32.mrf.mxu2 }
 0x8c7   : > { %v2703_v13 = vadd.f32 %v2702_v42, %v2662_v53 }
 0x8c8   : > { %v2626_v21 = vpop.f32.mrf.mxu3 }
 0x8c9   : > { %v6523_v31 = vadd.f32 %v2743_v50, %v2703_v13  ;;  %v2627_v26 = vadd.f32 %v2626_v21, %v2586_v36 }
 0x8ca   : > { %v2746_v34 = vpop.f32.mrf.mxu0 }
 0x8cc   : > { %v2664_v27 = vpop.f32.mrf.mxu1 }
 0x8cd   : > { %v2665_v45 = vadd.f32 %v2664_v27, %v2624_v28  ;;  %v2589_v28 = vadd.f32 %v6492_v39, %v6487_v4  ;;  %v2592_v4 = vadd.f32 %v6498_v10, %v6461_v12 }
 0x8ce   : > { %v2705_v55 = vpop.f32.mrf.mxu2 }
 0x8cf   : > { %v2706_v2 = vadd.f32 %v2705_v55, %v2665_v45 }
 0x8d0   : > { %v2629_v25 = vpop.f32.mrf.mxu3 }
 0x8d1   : > { %v6525_v15 = vadd.f32 %v2746_v34, %v2706_v2  ;;  %v2630_v33 = vadd.f32 %v2629_v25, %v2589_v28  ;;  %v2601_v34 = vadd.f32 %v2600_v38, %v6451_v1  ;;  %v2375_v38 = vadd.f32 %v6404_v22, %v6510_v14  ;;  %v6590_v28 = vld [vmem:[%s7075_s12 + $0x8] sm:$0xff] }
 0x8d2   : > { %v2749_v16 = vpop.f32.mrf.mxu0 }
 0x8d4   : > { %v2667_v49 = vpop.f32.mrf.mxu1 }
 0x8d5   : > { %v2668_v8 = vadd.f32 %v2667_v49, %v2627_v26 }
 0x8d6   : > { %v2708_v46 = vpop.f32.mrf.mxu2 }
 0x8d7   : > { %v2709_v3 = vadd.f32 %v2708_v46, %v2668_v8  ;;  %v7414_v8 = vld [vmem:[#allocation23_spill] sm:$0xff] }
 0x8d8   : > { %v2632_v52 = vpop.f32.mrf.mxu3 }
 0x8d9   : > { %v6537_v13 = vadd.f32 %v2749_v16, %v2709_v3  ;;  %v2633_v16 = vadd.f32 %v2632_v52, %v2592_v4  ;;  %v6597_v3 = vld [vmem:[%s7075_s12 + $0x10] sm:$0xff] }
 0x8da   : > { %v2752_v63 = vpop.f32.mrf.mxu0 }
 0x8db   : > { %v2789_v39 = vadd.f32 %v6537_v13, %v6490_v54 }
 0x8dc   : > { %v2670_v20 = vpop.f32.mrf.mxu1 }
 0x8dd   : > { %v2671_v21 = vadd.f32 %v2670_v20, %v2630_v33  ;;  %v6632_v33 = vld [vmem:[%s7075_s12 + $0x38] sm:$0xff] }
 0x8de   : > { %v2711_v32 = vpop.f32.mrf.mxu2 }
 0x8df   : > { %v2712_v45 = vadd.f32 %v2711_v32, %v2671_v21  ;;  %v2416_v32 = vadd.f32 %v6412_v62, %v2375_v38 }
 0x8e0   : > { %v2635_v37 = vpop.f32.mrf.mxu3 }
 0x8e1   : > { %v2636_v60 = vadd.f32 %v2635_v37, %v2595_v9  ;;  %v6550_v20 = vadd.f32 %v2752_v63, %v2712_v45  ;;  %v2457_v9 = vadd.f32 %v6453_v0, %v2416_v32  ;;  %v2786_v63 = vadd.f32 %v6525_v15, %v6482_v5 }
 0x8e2   : > { %v2755_v29 = vpop.f32.mrf.mxu0 }
 0x8e3   : > { %v2792_v52 = vadd.f32 %v6550_v20, %v6496_v48 }
 0x8e4   : > { %v2673_v18 = vpop.f32.mrf.mxu1 }
 0x8e5   : > { %v2674_v12 = vadd.f32 %v2673_v18, %v2633_v16 }
 0x8e6   : > { %v2714_v58 = vpop.f32.mrf.mxu2 }
 0x8e8   : > { %v2638_v44 = vpop.f32.mrf.mxu3 }
 0x8e9   : > { %v2639_v59 = vadd.f32 %v2638_v44, %v2598_v6  ;;  %v6575_v44 = vld [vmem:[%s7074_s11] sm:$0xff] }
 0x8ea   : > { %v2758_v40 = vpop.f32.mrf.mxu0  ;;  %v6583_v6 = vld [vmem:[%s7075_s12] sm:$0xff] }
 0x8ec   : > { %v2676_v23 = vpop.f32.mrf.mxu1 }
 0x8ed   : > { %v2677_v47 = vadd.f32 %v2676_v23, %v2636_v60  ;;  %v2498_v60 = vadd.f32 %v6469_v51, %v2457_v9 }
 0x8ee   : > { %v2717_v24 = vpop.f32.mrf.mxu2 }
 0x8ef   : > { %v2718_v35 = vadd.f32 %v2717_v24, %v2677_v47  ;;  %v6564_v14 = vadd.f32 %v6467_v61, %v2498_v60 }
 0x8f0   : > { %v2641_v43 = vpop.f32.mrf.mxu3 }
 0x8f1   : > { %v6531_v30 = vadd.f32 %v2758_v40, %v2718_v35  ;;  %v2642_v55 = vadd.f32 %v2641_v43, %v2601_v34  ;;  %v2715_v40 = vadd.f32 %v2714_v58, %v2674_v12  ;;  %v2783_v62 = vadd.f32 %v6523_v31, %v6564_v14 }
 0x8f2   : > { %v2761_v50 = vpop.f32.mrf.mxu0 }
 0x8f3   : > { %v2798_v7 = vadd.f32 %v6531_v30, %v6507_v11  ;;  %v6561_v22 = vadd.f32 %v2755_v29, %v2715_v40 }
 0x8f4   : > { %v2679_v57 = vpop.f32.mrf.mxu1 }
 0x8f5   : > { %v2680_v53 = vadd.f32 %v2679_v57, %v2639_v59  ;;  %2799 = vadd.xlane.f32.xlu2 %v2798_v7  ;;  %v2795_v0 = vadd.f32 %v6561_v22, %v6502_v56  ;;  %v6604_v59 = vld [vmem:[%s7075_s12 + $0x18] sm:$0xff]  ;;  %v6611_v7 = vld [vmem:[%s7075_s12 + $0x20] sm:$0xff]  ;;  %v6618_v57 = vld [vmem:[%s7075_s12 + $0x28] sm:$0xff] }
 0x8f6   : > { %v2720_v42 = vpop.f32.mrf.mxu2 }
 0x8f7   : > { %v2721_v17 = vadd.f32 %v2720_v42, %v2680_v53 }
 0x8f9   : > { %v6540_v27 = vadd.f32 %v2761_v50, %v2721_v17  ;;  %v6625_v50 = vld [vmem:[%s7075_s12 + $0x30] sm:$0xff] }
 0x8fa   : > { %v2764_v1 = vpop.f32.mrf.mxu0 }
 0x8fb   : > { %v2801_v2 = vadd.f32 %v6540_v27, %v6516_v41 }
 0x8fc   : > { %v2682_v25 = vpop.f32.mrf.mxu1 }
 0x8fd   : > { %v2683_v49 = vadd.f32 %v2682_v25, %v2642_v55  ;;  %2790 = vadd.xlane.f32.xlu2 %v2789_v39  ;;  %2802 = vadd.xlane.f32.xlu1 %v2801_v2 }
 0x8fe   : > { %v2723_v46 = vpop.f32.mrf.mxu2 }
 0x8ff   : > { %v2724_v10 = vadd.f32 %v2723_v46, %v2683_v49 }
 0x901   : > { %v6553_v37 = vadd.f32 %v2764_v1, %v2724_v10 }
 0x903   : > { %v2804_v36 = vadd.f32 %v6553_v37, %v6521_v19 }
 0x905   : > { %2805 = vadd.xlane.f32.xlu0 %v2804_v36  ;;  %2793 = vadd.xlane.f32.xlu1 %v2792_v52 }
 0x90d   : > { %2796 = vadd.xlane.f32.xlu0 %v2795_v0  ;;  %2784 = vadd.xlane.f32.xlu1 %v2783_v62 }
 0x915   : > { %2787 = vadd.xlane.f32.xlu0 %v2786_v63 }
 0x968   : > { %v2800_v29 = vpop.xlane.xlu2 %2799 }
 0x970   : > { %v2803_v51 = vpop.xlane.xlu1 %2802  ;;  %v2791_v23 = vpop.xlane.xlu2 %2790 }
 0x978   : > { %v2806_v18 = vpop.xlane.xlu0 %2805  ;;  %v2794_v61 = vpop.xlane.xlu1 %2793 }
 0x979   : > { %2815 = vmatpush.msrb.mxu3 %v2806_v18 }
 0x97b   : > { %2816 = vmatpush.msrb.mxu3 %v2803_v51 }
 0x97d   : > { %2817 = vmatpush.msrb.mxu3 %v2800_v29 }
 0x980   : > { %v2797_v58 = vpop.xlane.xlu0 %2796  ;;  %v2785_v47 = vpop.xlane.xlu1 %2784 }
 0x981   : > { %2818 = vmatpush.msrb.mxu3 %v2797_v58 }
 0x983   : > { %2819 = vmatpush.msrb.mxu3 %v2794_v61 }
 0x985   : > { %2820 = vmatpush.msrb.mxu3 %v2791_v23 }
 0x988   : > { %v2788_v26 = vpop.xlane.xlu0 %2787 }
 0x989   : > { %2821 = vmatpush.msrb.mxu3 %v2788_v26 }
 0x98b   : > { %2822 = vmatpush.msrb.mxu3 %v2785_v47 }
 0x98c   : > { %3720 = vmatmul.msk.f32.vlgmr.msrb.gmra.mxu3 %vm1290_vm9, %v6575_v44 }
 0xa0f   : > { %v2824_v24 = vpop.f32.mrf.mxu3 }
 0xa10   : > { %v2827_v35 = vmul.f32 %v2824_v24, %v7414_v8 }
 0xa12   : > { %2843 = vmatpush.msra.mxu3 %v2827_v35 }
 0xa13   : > { %3721 = vmatmul.msk.f32.vlgmr.msra.gmra.mxu3 %vm1330_vm11, %v6583_v6 }
 0xa1b   : > { %3722 = vmatmul.msk.f32.gmra.mxu3 %vm1330_vm11, %v6590_v28 }
 0xa23   : > { %3723 = vmatmul.msk.f32.gmra.mxu3 %vm1330_vm11, %v6597_v3 }
 0xa2b   : > { %3724 = vmatmul.msk.f32.gmra.mxu3 %vm1330_vm11, %v6604_v59 }
 0xa33   : > { %3725 = vmatmul.msk.f32.gmra.mxu3 %vm1330_vm11, %v6611_v7 }
 0xa3b   : > { %3726 = vmatmul.msk.f32.gmra.mxu3 %vm1330_vm11, %v6618_v57 }
 0xa43   : > { %3727 = vmatmul.msk.f32.gmra.mxu3 %vm1330_vm11, %v6625_v50 }
 0xa4b   : > { %3728 = vmatmul.msk.f32.gmra.mxu3 %vm1330_vm11, %v6632_v33 }
 0xa96   : > { %v2845_v53 = vpop.f32.mrf.mxu3 }
 0xa9e   : > { %v2848_v42 = vpop.f32.mrf.mxu3 }
 0xaa6   : > { %v2851_v21 = vpop.f32.mrf.mxu3 }
 0xaae   : > { %v2854_v17 = vpop.f32.mrf.mxu3 }
 0xab6   : > { %v2857_v43 = vpop.f32.mrf.mxu3 }
 0xabe   : > { %v2860_v34 = vpop.f32.mrf.mxu3 }
 0xabf   : > { %2896 = vperm.xlu1 %3830, %v2860_v34   ;;  %v2769_v34 = vld [vmem:[%s7070_s7 + $0x10] sm:$0xff] }
 0xac6   : > { %v2863_v4 = vpop.f32.mrf.mxu3 }
 0xac7   : > { %2881 = vperm.xlu1 %3830, %v2851_v21   ;;  %2901 = vperm.xlu0 %3832, %v2863_v4   ;;  %v3343_v4 = vld [vmem:[%s7072_s9 + $0x8] sm:$0xff] }
 0xace   : > { %v2866_v39 = vpop.f32.mrf.mxu3 }
 0xacf   : > { %2891 = vperm.xlu0 %3832, %v2857_v43   ;;  %2906 = vperm.xlu2 %3831, %v2866_v39   ;;  %v2768_v43 = vld [vmem:[%s7070_s7 + $0x8] sm:$0xff]  ;;  %v2774_v39 = vld [vmem:[%s7070_s7 + $0x38] sm:$0xff] }
 0xad7   : > { %2876 = vperm.xlu0 %3832, %v2848_v42   ;;  %2886 = vperm.xlu2 %3831, %v2854_v17  }
 0xadf   : > { %2871 = vperm.xlu2 %3831, %v2845_v53  }
 0xb29   : > { %v2907_v45 = vpop.permute.xlu2 %2906 }
 0xb2a   : > { %v6637_v55 = vsub.f32 %v6521_v19, %v2907_v45  ;;  %v6640_v2 = vsub.f32 %v6553_v37, %v2907_v45  ;;  %v2767_v45 = vld [vmem:[%s7070_s7] sm:$0xff] }
 0xb2c   : > { %v2939_v25 = vmul.f32 %v6637_v55, %v6637_v55  ;;  %v2940_v16 = vmul.f32 %v6640_v2, %v6640_v2 }
 0xb2e   : > { %v2962_v49 = vadd.f32 %v2940_v16, %v2939_v25  ;;  %v2772_v25 = vld [vmem:[%s7070_s7 + $0x28] sm:$0xff]  ;;  %v3344_v16 = vld [vmem:[%s7072_s9 + $0x10] sm:$0xff] }
 0xb30   : > { %2963 = vadd.xlane.f32.xlu1 %v2962_v49  ;;  %v2777_v49 = vld [vmem:[%s7071_s8 + $0x10] sm:$0xff] }
 0xb31   : > { %v2897_v46 = vpop.permute.xlu1 %2896  ;;  %v2887_v32 = vpop.permute.xlu2 %2886 }
 0xb32   : > { %v6647_v1 = vsub.f32 %v6507_v11, %v2897_v46  ;;  %v6650_v38 = vsub.f32 %v6531_v30, %v2897_v46  ;;  %v2770_v46 = vld [vmem:[%s7070_s7 + $0x18] sm:$0xff] }
 0xb34   : > { %v2935_v19 = vmul.f32 %v6647_v1, %v6647_v1  ;;  %v2936_v12 = vmul.f32 %v6650_v38, %v6650_v38 }
 0xb36   : > { %v2956_v10 = vadd.f32 %v2936_v12, %v2935_v19  ;;  %v2775_v19 = vld [vmem:[%s7071_s8] sm:$0xff]  ;;  %v2780_v12 = vld [vmem:[%s7071_s8 + $0x28] sm:$0xff] }
 0xb38   : > { %2957 = vadd.xlane.f32.xlu2 %v2956_v10  ;;  %v2773_v10 = vld [vmem:[%s7070_s7 + $0x30] sm:$0xff] }
 0xb39   : > { %v2882_v37 = vpop.permute.xlu1 %2881  ;;  %v2902_v9 = vpop.permute.xlu0 %2901 }
 0xb3a   : > { %v6657_v52 = vsub.f32 %v6490_v54, %v2882_v37  ;;  %v6660_v11 = vsub.f32 %v6537_v13, %v2882_v37  ;;  %v6663_v30 = vsub.f32 %v6516_v41, %v2902_v9  ;;  %v6666_v40 = vsub.f32 %v6540_v27, %v2902_v9  ;;  %v2872_v61 = vpop.permute.xlu2 %2871  ;;  %v3206_v37 = vld [vmem:[%s6768_s18] sm:$0xff] }
 0xb3b   : > { %v6677_v13 = vsub.f32 %v6496_v48, %v2887_v32  ;;  %v6680_v41 = vsub.f32 %v6550_v20, %v2887_v32  ;;  %v6697_v23 = vsub.f32 %v6564_v14, %v2872_v61  ;;  %v6700_v26 = vsub.f32 %v6523_v31, %v2872_v61  ;;  %v2778_v32 = vld [vmem:[%s7071_s8 + $0x18] sm:$0xff] }
 0xb3c   : > { %v2929_v36 = vmul.f32 %v6657_v52, %v6657_v52  ;;  %v2930_v60 = vmul.f32 %v6660_v11, %v6660_v11  ;;  %v2937_v62 = vmul.f32 %v6663_v30, %v6663_v30  ;;  %v2938_v54 = vmul.f32 %v6666_v40, %v6666_v40 }
 0xb3d   : > { %v2931_v51 = vmul.f32 %v6677_v13, %v6677_v13  ;;  %v2932_v18 = vmul.f32 %v6680_v41, %v6680_v41  ;;  %v2926_v35 = vmul.f32 %v6700_v26, %v6700_v26  ;;  %v3214_v9 = vadd.f32 1.0, %v3206_v37  ;;  %v3351_v37 = vld [vmem:[%s7073_s10 + $0x8] sm:$0xff] }
 0xb3e   : > { %v2959_v27 = vadd.f32 %v2938_v54, %v2937_v62  ;;  %v2947_v0 = vadd.f32 %v2930_v60, %v2929_v36  ;;  %v2776_v36 = vld [vmem:[%s7071_s8 + $0x8] sm:$0xff]  ;;  %v2781_v60 = vld [vmem:[%s7071_s8 + $0x30] sm:$0xff]  ;;  %v3209_v62 = vld [vmem:[%s6768_s18 + $0x18] sm:$0xff] }
 0xb3f   : > { %v2950_v24 = vadd.f32 %v2932_v18, %v2931_v51  ;;  %v3217_v54 = vadd.f32 1.0, %v3209_v62  ;;  %v3212_v51 = vld [vmem:[%s6768_s18 + $0x30] sm:$0xff]  ;;  %v3345_v18 = vld [vmem:[%s7072_s9 + $0x18] sm:$0xff]  ;;  %v3354_v62 = vld [vmem:[%s7073_s10 + $0x20] sm:$0xff] }
 0xb40   : > { %2960 = vadd.xlane.f32.xlu0 %v2959_v27  ;;  %2948 = vadd.xlane.f32.xlu2 %v2947_v0  ;;  %v3207_v27 = vld [vmem:[%s6768_s18 + $0x8] sm:$0xff]  ;;  %v2779_v0 = vld [vmem:[%s7071_s8 + $0x20] sm:$0xff]  ;;  %v3220_v61 = vadd.f32 1.0, %v3212_v51 }
 0xb41   : > { %v2892_v63 = vpop.permute.xlu0 %2891 }
 0xb42   : > { %v6687_v29 = vsub.f32 %v6502_v56, %v2892_v63  ;;  %v6690_v48 = vsub.f32 %v6561_v22, %v2892_v63  ;;  %v2925_v22 = vmul.f32 %v6697_v23, %v6697_v23  ;;  %v3215_v63 = vadd.f32 1.0, %v3207_v27 }
 0xb44   : > { %v2933_v20 = vmul.f32 %v6687_v29, %v6687_v29  ;;  %v2934_v58 = vmul.f32 %v6690_v48, %v6690_v48  ;;  %v2941_v17 = vadd.f32 %v2926_v35, %v2925_v22  ;;  %v3213_v35 = vld [vmem:[%s6768_s18 + $0x38] sm:$0xff] }
 0xb46   : > { %v2953_v47 = vadd.f32 %v2934_v58, %v2933_v20  ;;  %v3210_v20 = vld [vmem:[%s6768_s18 + $0x20] sm:$0xff]  ;;  %v2782_v58 = vld [vmem:[%s7071_s8 + $0x38] sm:$0xff] }
 0xb48   : > { %2954 = vadd.xlane.f32.xlu1 %v2953_v47  ;;  %2951 = vadd.xlane.f32.xlu0 %v2950_v24  ;;  %v3218_v47 = vadd.f32 1.0, %v3210_v20  ;;  %v3208_v24 = vld [vmem:[%s6768_s18 + $0x10] sm:$0xff] }
 0xb49   : > { %v2877_v56 = vpop.permute.xlu0 %2876  ;;  %v3216_v22 = vadd.f32 1.0, %v3208_v24 }
 0xb4a   : > { %v6707_v53 = vsub.f32 %v6482_v5, %v2877_v56  ;;  %v6710_v14 = vsub.f32 %v6525_v15, %v2877_v56  ;;  %v3342_v5 = vld [vmem:[%s7072_s9] sm:$0xff]  ;;  %v3279_v56 = vld [vmem:[%s6799_s28 + $0x8] sm:$0xff] }
 0xb4b   : > { %v2771_v15 = vld [vmem:[%s7070_s7 + $0x20] sm:$0xff]  ;;  %3738 = vmatmul.msk.f32.vlgmr.msrb.gmra.mxu2 %vm978_vm4, %v3342_v5  ;;  %3746 = vmatmul.msk.f32.vlgmr.msrb.gmra.mxu0 %vm978_vm4, %v3342_v5  ;;  %v3280_v5 = vld [vmem:[%s6799_s28 + $0x10] sm:$0xff] }
 0xb4c   : > { %v2927_v31 = vmul.f32 %v6707_v53, %v6707_v53  ;;  %v2928_v42 = vmul.f32 %v6710_v14, %v6710_v14 }
 0xb4e   : > { %v2944_v21 = vadd.f32 %v2928_v42, %v2927_v31  ;;  %v3346_v31 = vld [vmem:[%s7072_s9 + $0x20] sm:$0xff]  ;;  %v3221_v42 = vadd.f32 1.0, %v3213_v35 }
 0xb50   : > { %2945 = vadd.xlane.f32.xlu1 %v2944_v21  ;;  %2942 = vadd.xlane.f32.xlu0 %v2941_v17  ;;  %v3211_v21 = vld [vmem:[%s6768_s18 + $0x28] sm:$0xff]  ;;  %v3282_v17 = vld [vmem:[%s6799_s28 + $0x20] sm:$0xff]  ;;  %s6936_s18 = scalar_lea.vmem [#allocation5], %s3656_s29 }
 0xb51   : > { %s3549_s25 = sshll.u32 %s6936_s18, 4  ;;  %s3550_s25 = int_to_ptr.vmem [resolvable:$true] %s3549_s25 }
 0xb53   : > { %3739 = vmatmul.msk.f32.gmra.mxu2 %vm978_vm4, %v3343_v4  ;;  %3747 = vmatmul.msk.f32.gmra.mxu0 %vm978_vm4, %v3343_v4  ;;  %v3278_v4 = vld [vmem:[%s6799_s28] sm:$0xff] }
 0xb58   : > { %3101 = vperm.xlu2 %3831, %v2768_v43   ;;  %v3219_v43 = vadd.f32 1.0, %v3211_v21 }
 0xb5b   : > { %3740 = vmatmul.msk.f32.gmra.mxu2 %vm978_vm4, %v3344_v16  ;;  %3748 = vmatmul.msk.f32.gmra.mxu0 %vm978_vm4, %v3344_v16  ;;  %v3350_v16 = vld [vmem:[%s7073_s10] sm:$0xff] }
 0xb60   : > { %3116 = vperm.xlu2 %3831, %v2771_v15  }
 0xb63   : > { %3741 = vmatmul.msk.f32.gmra.mxu2 %vm978_vm4, %v3345_v18  ;;  %3749 = vmatmul.msk.f32.gmra.mxu0 %vm978_vm4, %v3345_v18 }
 0xb64   : > { %3106 = vperm.xlu0 %3832, %v2769_v34   ;;  %v3285_v34 = vld [vmem:[%s6799_s28 + $0x38] sm:$0xff] }
 0xb68   : > { %3131 = vperm.xlu2 %3831, %v2774_v39   ;;  %v3283_v39 = vld [vmem:[%s6799_s28 + $0x28] sm:$0xff] }
 0xb69   : > { %3096 = vperm.xlu1 %3830, %v2767_v45   ;;  %v3352_v45 = vld [vmem:[%s7073_s10 + $0x10] sm:$0xff] }
 0xb6b   : > { %3742 = vmatmul.msk.f32.gmra.mxu2 %vm978_vm4, %v3346_v31  ;;  %3750 = vmatmul.msk.f32.gmra.mxu0 %vm978_vm4, %v3346_v31 }
 0xb6c   : > { %3121 = vperm.xlu0 %3832, %v2772_v25   ;;  %v3281_v25 = vld [vmem:[%s6799_s28 + $0x18] sm:$0xff] }
 0xb70   : > { %3162 = vperm.xlu2 %3831, %v2777_v49  }
 0xb71   : > { %3111 = vperm.xlu1 %3830, %v2770_v46  }
 0xb74   : > { %3152 = vperm.xlu0 %3832, %v2775_v19   ;;  %v3284_v19 = vld [vmem:[%s6799_s28 + $0x30] sm:$0xff]  ;;  %s3537_s28 = scalar_lea.sflag [#allocation4], %s559_s19 }
 0xb78   : > { %3177 = vperm.xlu2 %3831, %v2780_v12   ;;  %v3353_v12 = vld [vmem:[%s7073_s10 + $0x18] sm:$0xff] }
 0xb79   : > { %3126 = vperm.xlu1 %3830, %v2773_v10  }
 0xb7c   : > { %3167 = vperm.xlu0 %3832, %v2778_v32  }
 0xb80   : > { %3224 = vperm.xlu2 %3831, %v3214_v9  }
 0xb81   : > { %3157 = vperm.xlu1 %3830, %v2776_v36  }
 0xb84   : > { %3182 = vperm.xlu0 %3832, %v2781_v60  }
 0xb88   : > { %3239 = vperm.xlu2 %3831, %v3217_v54  }
 0xb89   : > { %3172 = vperm.xlu1 %3830, %v2779_v0  }
 0xb8c   : > { %3229 = vperm.xlu0 %3832, %v3215_v63  }
 0xb90   : > { %3254 = vperm.xlu2 %3831, %v3220_v61  }
 0xb91   : > { %3187 = vperm.xlu1 %3830, %v2782_v58  }
 0xb94   : > { %3244 = vperm.xlu0 %3832, %v3218_v47  }
 0xb98   : > { %3293 = vperm.xlu2 %3831, %v3279_v56  }
 0xb99   : > { %3234 = vperm.xlu1 %3830, %v3216_v22  }
 0xb9c   : > { %3259 = vperm.xlu0 %3832, %v3221_v42  }
 0xba0   : > { %3308 = vperm.xlu2 %3831, %v3282_v17  }
 0xba1   : > { %3249 = vperm.xlu1 %3830, %v3219_v43  }
 0xba3   : > { %v2964_v15 = vpop.xlane.xlu1 %2963 }
 0xba4   : > { %2973 = vmatpush.msra.mxu1 %v2964_v15  ;;  %3298 = vperm.xlu0 %3832, %v3280_v5  }
 0xba8   : > { %3323 = vperm.xlu2 %3831, %v3285_v34  }
 0xba9   : > { %3288 = vperm.xlu1 %3830, %v3278_v4  }
 0xbab   : > { %v2958_v46 = vpop.xlane.xlu2 %2957 }
 0xbac   : > { %3313 = vperm.xlu0 %3832, %v3283_v39  }
 0xbb0   : > { %3370 = vperm.xlu2 %3831, %v3352_v45  }
 0xbb1   : > { %3303 = vperm.xlu1 %3830, %v3281_v25  }
 0xbb3   : > { %v2961_v49 = vpop.xlane.xlu0 %2960  ;;  %v2949_v9 = vpop.xlane.xlu2 %2948 }
 0xbb4   : > { %2974 = vmatpush.msra.mxu1 %v2961_v49  ;;  %3360 = vperm.xlu0 %3832, %v3350_v16  }
 0xbb6   : > { %2975 = vmatpush.msra.mxu1 %v2958_v46  ;;  %v3357_v46 = vld [vmem:[%s7073_s10 + $0x38] sm:$0xff] }
 0xbb9   : > { %3318 = vperm.xlu1 %3830, %v3284_v19  }
 0xbbb   : > { %v2955_v10 = vpop.xlane.xlu1 %2954  ;;  %v2952_v32 = vpop.xlane.xlu0 %2951 }
 0xbbc   : > { %3375 = vperm.xlu0 %3832, %v3353_v12   ;;  %2976 = vmatpush.msra.mxu1 %v2955_v10 }
 0xbbe   : > { %2977 = vmatpush.msra.mxu1 %v2952_v32  ;;  %v3355_v32 = vld [vmem:[%s7073_s10 + $0x28] sm:$0xff] }
 0xbc0   : > { %2978 = vmatpush.msra.mxu1 %v2949_v9 }
 0xbc1   : > { %3365 = vperm.xlu1 %3830, %v3351_v37  }
 0xbc3   : > { %v2946_v36 = vpop.xlane.xlu1 %2945  ;;  %v2943_v60 = vpop.xlane.xlu0 %2942 }
 0xbc4   : > { %2979 = vmatpush.msra.mxu1 %v2946_v36 }
 0xbc6   : > { %2980 = vmatpush.msra.mxu1 %v2943_v60  ;;  %v3356_v60 = vld [vmem:[%s7073_s10 + $0x30] sm:$0xff] }
 0xbc7   : > { %3729 = vmatmul.msk.f32.vlgmr.msra.gmra.mxu1 %vm1290_vm9, %v6575_v44  ;;  %v6851_v44 = vpop.permute.xlu2 %3101 }
 0xbc9   : > { %3380 = vperm.xlu1 %3830, %v3354_v62  }
 0xc44   : > { %v2982_v54 = vpop.f32.mrf.mxu1 }
 0xc45   : > { %v2985_v27 = vmul.f32 %v2982_v54, %v7414_v8  ;;  %v6853_v8 = vpop.permute.xlu2 %3116 }
 0xc47   : > { %v2986_v0 = vadd.f32 1e-05, %v2985_v27 }
 0xc49   : > { %3837 = vrsqrt.f32 %v2986_v0  ;;  %vm2993_vm0 = vweird.f32 %v2986_v0 }
 0xc4f   : > { %v3838_v63 = vpop.eup %3837 }
 0xc50   : > { %v2988_v51 = vmul.f32 %v3838_v63, %v2986_v0  ;;  %vm2994_vm15 = vweird.f32 %v3838_v63 }
 0xc51   : > { %vm2995_vm1 = vmor %vm2993_vm0, %vm2994_vm15 }
 0xc52   : > { %v2989_v18 = vmul.f32 %v3838_v63, %v2988_v51 }
 0xc54   : > { %v2990_v61 = vmul.f32 0.5, %v2989_v18 }
 0xc56   : > { %v2991_v20 = vsub.f32 1.5, %v2990_v61 }
 0xc58   : > { %v2992_v58 = vmul.f32 %v3838_v63, %v2991_v20 }
 0xc5a   : > { %v2996_v47 = vsel %vm2995_vm1, %v3838_v63, %v2992_v58  ;;  %v3480_v58 = vpop.f32.mrf.mxu0 }
 0xc5b   : > { %3012 = vmatpush.msrb.mxu1 %v2996_v47 }
 0xc5c   : > { %3730 = vmatmul.msk.f32.vlgmr.msrb.gmra.mxu1 %vm1330_vm11, %v6583_v6  ;;  %v3347_v6 = vld [vmem:[%s7072_s9 + $0x28] sm:$0xff] }
 0xc5d   : > { %3743 = vmatmul.msk.f32.gmra.mxu2 %vm978_vm4, %v3347_v6  ;;  %3751 = vmatmul.msk.f32.gmra.mxu0 %vm978_vm4, %v3347_v6  ;;  %v3439_v6 = vpop.f32.mrf.mxu2 }
 0xc64   : > { %3731 = vmatmul.msk.f32.gmra.mxu1 %vm1330_vm11, %v6590_v28  ;;  %v3348_v28 = vld [vmem:[%s7072_s9 + $0x30] sm:$0xff] }
 0xc65   : > { %3744 = vmatmul.msk.f32.gmra.mxu2 %vm978_vm4, %v3348_v28  ;;  %3752 = vmatmul.msk.f32.gmra.mxu0 %vm978_vm4, %v3348_v28 }
 0xc6c   : > { %3732 = vmatmul.msk.f32.gmra.mxu1 %vm1330_vm11, %v6597_v3  ;;  %v6863_v3 = vpop.permute.xlu2 %3131 }
 0xc74   : > { %3733 = vmatmul.msk.f32.gmra.mxu1 %vm1330_vm11, %v6604_v59  ;;  %v3097_v59 = vpop.permute.xlu1 %3096 }
 0xc7c   : > { %3734 = vmatmul.msk.f32.gmra.mxu1 %vm1330_vm11, %v6611_v7  ;;  %v6867_v7 = vpop.permute.xlu0 %3106  ;;  %v6876_v24 = vpop.permute.xlu1 %3111 }
 0xc84   : > { %3735 = vmatmul.msk.f32.gmra.mxu1 %vm1330_vm11, %v6618_v57  ;;  %v6878_v56 = vpop.permute.xlu0 %3121  ;;  %v6882_v31 = vpop.permute.xlu1 %3126 }
 0xc8c   : > { %3736 = vmatmul.msk.f32.gmra.mxu1 %vm1330_vm11, %v6625_v50  ;;  %v3349_v50 = vld [vmem:[%s7072_s9 + $0x38] sm:$0xff]  ;;  %v3153_v21 = vpop.permute.xlu0 %3152  ;;  %v6884_v5 = vpop.permute.xlu1 %3157 }
 0xc8d   : > { %3745 = vmatmul.msk.f32.gmra.mxu2 %vm978_vm4, %v3349_v50  ;;  %3753 = vmatmul.msk.f32.gmra.mxu0 %vm978_vm4, %v3349_v50 }
 0xc94   : > { %3737 = vmatmul.msk.f32.gmra.mxu1 %vm1330_vm11, %v6632_v33  ;;  %v6874_v33 = vpop.permute.xlu2 %3162  ;;  %v6886_v15 = vpop.permute.xlu0 %3167 }
 0xc95   : > { %v6890_v39 = vpop.permute.xlu1 %3172 }
 0xc9c   : > { %v6880_v35 = vpop.permute.xlu2 %3177  ;;  %v6892_v45 = vpop.permute.xlu0 %3182 }
 0xc9d   : > { %v6896_v49 = vpop.permute.xlu1 %3187 }
 0xc9e   : > { %7415 = vst [vmem:[#allocation86_spill] sm:$0xff] %v6896_v49 }
 0xca4   : > { %v3225_v17 = vpop.permute.xlu2 %3224  ;;  %v6901_v19 = vpop.permute.xlu0 %3229 }
 0xca5   : > { %v6908_v37 = vpop.permute.xlu1 %3234 }
 0xcac   : > { %v6888_v4 = vpop.permute.xlu2 %3239  ;;  %v6910_v36 = vpop.permute.xlu0 %3244 }
 0xcad   : > { %v6917_v54 = vpop.permute.xlu1 %3249 }
 0xcb4   : > { %v6894_v16 = vpop.permute.xlu2 %3254  ;;  %v6919_v27 = vpop.permute.xlu0 %3259 }
 0xcb5   : > { %7416 = vst [vmem:[#allocation81_spill] sm:$0xff] %v6919_v27  ;;  %v3289_v63 = vpop.permute.xlu1 %3288  ;;  %v3483_v27 = vpop.f32.mrf.mxu0 }
 0xcbc   : > { %v6903_v10 = vpop.permute.xlu2 %3293  ;;  %v6923_v51 = vpop.permute.xlu0 %3298 }
 0xcbd   : > { %v3304_v61 = vpop.permute.xlu1 %3303 }
 0xcc4   : > { %v6915_v62 = vpop.permute.xlu2 %3308  ;;  %v6927_v20 = vpop.permute.xlu0 %3313 }
 0xccc   : > { %v6921_v0 = vpop.permute.xlu2 %3323 }
 0xccd   : > { %7417 = vst [vmem:[#allocation84_spill] sm:$0xff] %v6921_v0 }
 0xcd4   : > { %v6925_v18 = vpop.permute.xlu2 %3370 }
 0xcd9   : > { %v3014_v57 = vpop.f32.mrf.mxu1 }
 0xcda   : > { %3040 = vperm.xlu2 %3831, %v3014_v57  }
 0xce1   : > { %v3017_v22 = vpop.f32.mrf.mxu1 }
 0xce2   : > { %3045 = vperm.xlu1 %3830, %v3017_v22  }
 0xce9   : > { %v3020_v42 = vpop.f32.mrf.mxu1 }
 0xcea   : > { %3050 = vperm.xlu0 %3832, %v3020_v42   ;;  %v6931_v42 = vpop.permute.xlu1 %3318 }
 0xcf1   : > { %v3023_v43 = vpop.f32.mrf.mxu1 }
 0xcf2   : > { %3055 = vperm.xlu2 %3831, %v3023_v43  }
 0xcf9   : > { %v3026_v34 = vpop.f32.mrf.mxu1 }
 0xcfa   : > { %3060 = vperm.xlu0 %3832, %v3026_v34  }
 0xd01   : > { %v3029_v25 = vpop.f32.mrf.mxu1 }
 0xd02   : > { %3065 = vperm.xlu1 %3830, %v3029_v25   ;;  %v3361_v25 = vpop.permute.xlu0 %3360 }
 0xd09   : > { %v3032_v12 = vpop.f32.mrf.mxu1 }
 0xd0a   : > { %3395 = vperm.xlu1 %3830, %v3357_v46   ;;  %3070 = vperm.xlu2 %3831, %v3032_v12  }
 0xd11   : > { %v3035_v9 = vpop.f32.mrf.mxu1 }
 0xd12   : > { %3385 = vperm.xlu2 %3831, %v3355_v32   ;;  %3075 = vperm.xlu0 %3832, %v3035_v9   ;;  %v3440_v32 = vadd.f32 %v3439_v6, %v3361_v25  ;;  %v3481_v9 = vadd.f32 %v3480_v58, %v3361_v25 }
 0xd1a   : > { %3390 = vperm.xlu0 %3832, %v3356_v60  }
 0xd34   : > { %v3041_v47 = vpop.permute.xlu2 %3040 }
 0xd35   : > { %v3078_v28 = vmul.f32 %v3041_v47, %v6697_v23  ;;  %v3079_v57 = vmul.f32 %v3041_v47, %v6700_v26  ;;  %v3442_v23 = vpop.f32.mrf.mxu2 }
 0xd37   : > { %v3134_v50 = vmul.f32 %v3097_v59, %v3078_v28  ;;  %v3135_v22 = vmul.f32 %v3097_v59, %v3079_v57  ;;  %v3366_v59 = vpop.permute.xlu1 %3365 }
 0xd39   : > { %v3190_v43 = vadd.f32 %v3153_v21, %v3134_v50  ;;  %v3191_v34 = vadd.f32 %v3153_v21, %v3135_v22  ;;  %v3486_v21 = vpop.f32.mrf.mxu0  ;;  %v3376_v22 = vpop.permute.xlu0 %3375 }
 0xd3b   : > { %v3262_v46 = vmul.f32 %v3225_v17, %v3190_v43  ;;  %v3263_v12 = vmul.f32 %v3225_v17, %v3191_v34 }
 0xd3d   : > { %v3326_v60 = vadd.f32 %v3289_v63, %v3262_v46  ;;  %v3327_v0 = vadd.f32 %v3289_v63, %v3263_v12  ;;  %v3445_v47 = vpop.f32.mrf.mxu2 }
 0xd3f   : > { %v3504_v49 = vadd.f32 %v3440_v32, %v3326_v60  ;;  %v3505_v26 = vadd.f32 %v3481_v9, %v3327_v0  ;;  %v6940_v28 = vpop.permute.xlu1 %3380 }
 0xd41   : > { %3520 = vst [vmem:[%s6936_s18] sm:$0xff] %v3504_v49  ;;  %v3489_v57 = vpop.f32.mrf.mxu0 }
 0xd42   : > { %3521 = vst [vmem:[%s6936_s18 + $0x8] sm:$0xff] %v3505_v26  ;;  %v3490_v46 = vadd.f32 %v3489_v57, %v3376_v22 }
 0xd45   : > { %v3448_v50 = vpop.f32.mrf.mxu2 }
 0xd4c   : > { %v3056_v17 = vpop.permute.xlu2 %3055 }
 0xd4d   : > { %v3084_v58 = vmul.f32 %v3056_v17, %v6677_v13  ;;  %v3085_v63 = vmul.f32 %v3056_v17, %v6680_v41  ;;  %v3449_v13 = vadd.f32 %v3448_v50, %v3376_v22 }
 0xd4f   : > { %v3140_v6 = vmul.f32 %v6876_v24, %v3084_v58  ;;  %v3141_v0 = vmul.f32 %v6876_v24, %v3085_v63 }
 0xd51   : > { %v3196_v49 = vadd.f32 %v6886_v15, %v3140_v6  ;;  %v3197_v43 = vadd.f32 %v6886_v15, %v3141_v0 }
 0xd53   : > { %v3268_v34 = vmul.f32 %v6888_v4, %v3196_v49  ;;  %v3269_v25 = vmul.f32 %v6888_v4, %v3197_v43 }
 0xd54   : > { %v3046_v41 = vpop.permute.xlu1 %3045 }
 0xd55   : > { %v3332_v12 = vadd.f32 %v3304_v61, %v3268_v34  ;;  %v3333_v32 = vadd.f32 %v3304_v61, %v3269_v25  ;;  %v3080_v24 = vmul.f32 %v3046_v41, %v6707_v53  ;;  %v3081_v9 = vmul.f32 %v3046_v41, %v6710_v14 }
 0xd56   : > { %v3443_v61 = vadd.f32 %v3442_v23, %v3366_v59  ;;  %v3484_v14 = vadd.f32 %v3483_v27, %v3366_v59  ;;  %v3487_v23 = vadd.f32 %v3486_v21, %v6925_v18 }
 0xd57   : > { %v3510_v60 = vadd.f32 %v3449_v13, %v3332_v12  ;;  %v3511_v26 = vadd.f32 %v3490_v46, %v3333_v32  ;;  %v3136_v17 = vmul.f32 %v6851_v44, %v3080_v24  ;;  %v3137_v15 = vmul.f32 %v6851_v44, %v3081_v9  ;;  %v3451_v13 = vpop.f32.mrf.mxu2 }
 0xd58   : > { %v3452_v9 = vadd.f32 %v3451_v13, %v6940_v28 }
 0xd59   : > { %3526 = vst [vmem:[%s6936_s18 + $0x30] sm:$0xff] %v3510_v60  ;;  %v3192_v58 = vadd.f32 %v6884_v5, %v3136_v17  ;;  %v3193_v4 = vadd.f32 %v6884_v5, %v3137_v15 }
 0xd5a   : > { %3527 = vst [vmem:[%s6936_s18 + $0x38] sm:$0xff] %v3511_v26 }
 0xd5b   : > { %v3264_v63 = vmul.f32 %v6901_v19, %v3192_v58  ;;  %v3265_v53 = vmul.f32 %v6901_v19, %v3193_v4 }
 0xd5c   : > { %v3051_v6 = vpop.permute.xlu0 %3050 }
 0xd5d   : > { %v3328_v0 = vadd.f32 %v6903_v10, %v3264_v63  ;;  %v3329_v57 = vadd.f32 %v6903_v10, %v3265_v53  ;;  %v3082_v44 = vmul.f32 %v3051_v6, %v6657_v52  ;;  %v3083_v50 = vmul.f32 %v3051_v6, %v6660_v11 }
 0xd5e   : > { %v3446_v11 = vadd.f32 %v3445_v47, %v6925_v18 }
 0xd5f   : > { %v3506_v22 = vadd.f32 %v3443_v61, %v3328_v0  ;;  %v3507_v5 = vadd.f32 %v3484_v14, %v3329_v57  ;;  %v3138_v49 = vmul.f32 %v6867_v7, %v3082_v44  ;;  %v3139_v43 = vmul.f32 %v6867_v7, %v3083_v50 }
 0xd61   : > { %3522 = vst [vmem:[%s6936_s18 + $0x10] sm:$0xff] %v3506_v22  ;;  %v3194_v19 = vadd.f32 %v6874_v33, %v3138_v49  ;;  %v3195_v27 = vadd.f32 %v6874_v33, %v3139_v43  ;;  %v3492_v33 = vpop.f32.mrf.mxu0 }
 0xd62   : > { %3523 = vst [vmem:[%s6936_s18 + $0x18] sm:$0xff] %v3507_v5 }
 0xd63   : > { %v3266_v10 = vmul.f32 %v6908_v37, %v3194_v19  ;;  %v3267_v52 = vmul.f32 %v6908_v37, %v3195_v27 }
 0xd64   : > { %v3071_v18 = vpop.permute.xlu2 %3070 }
 0xd65   : > { %v3330_v59 = vadd.f32 %v6923_v51, %v3266_v10  ;;  %v3331_v34 = vadd.f32 %v6923_v51, %v3267_v52  ;;  %v3091_v57 = vmul.f32 %v3071_v18, %v6666_v40 }
 0xd67   : > { %v3508_v25 = vadd.f32 %v3446_v11, %v3330_v59  ;;  %v3509_v7 = vadd.f32 %v3487_v23, %v3331_v34 }
 0xd69   : > { %3524 = vst [vmem:[%s6936_s18 + $0x20] sm:$0xff] %v3508_v25  ;;  %v3495_v26 = vpop.f32.mrf.mxu0 }
 0xd6a   : > { %3525 = vst [vmem:[%s6936_s18 + $0x28] sm:$0xff] %v3509_v7 }
 0xd6c   : > { %v3061_v46 = vpop.permute.xlu0 %3060  ;;  %v3386_v61 = vpop.permute.xlu2 %3385 }
 0xd6d   : > { %v3086_v41 = vmul.f32 %v3061_v46, %v6687_v29  ;;  %v3087_v12 = vmul.f32 %v3061_v46, %v6690_v48  ;;  %v3493_v29 = vadd.f32 %v3492_v33, %v6940_v28  ;;  %v3454_v48 = vpop.f32.mrf.mxu2  ;;  %v3496_v6 = vadd.f32 %v3495_v26, %v3386_v61  ;;  %v7420_v33 = vld [vmem:[#allocation84_spill] sm:$0xff] }
 0xd6e   : > { %v3455_v14 = vadd.f32 %v3454_v48, %v3386_v61 }
 0xd6f   : > { %v3142_v37 = vmul.f32 %v6853_v8, %v3086_v41  ;;  %v3143_v47 = vmul.f32 %v6853_v8, %v3087_v12 }
 0xd71   : > { %v3198_v21 = vadd.f32 %v6890_v39, %v3142_v37  ;;  %v3199_v51 = vadd.f32 %v6890_v39, %v3143_v47 }
 0xd73   : > { %v3270_v32 = vmul.f32 %v6910_v36, %v3198_v21  ;;  %v3271_v24 = vmul.f32 %v6910_v36, %v3199_v51 }
 0xd74   : > { %v3066_v60 = vpop.permute.xlu1 %3065 }
 0xd75   : > { %v3334_v8 = vadd.f32 %v6915_v62, %v3270_v32  ;;  %v3335_v17 = vadd.f32 %v6915_v62, %v3271_v24  ;;  %v3088_v15 = vmul.f32 %v3066_v60, %v6647_v1  ;;  %v3089_v39 = vmul.f32 %v3066_v60, %v6650_v38  ;;  %v3457_v44 = vpop.f32.mrf.mxu2 }
 0xd76   : > { %v3090_v38 = vmul.f32 %v3071_v18, %v6663_v30 }
 0xd77   : > { %v3512_v58 = vadd.f32 %v3452_v9, %v3334_v8  ;;  %v3513_v4 = vadd.f32 %v3493_v29, %v3335_v17  ;;  %v3144_v36 = vmul.f32 %v6878_v56, %v3088_v15  ;;  %v3145_v63 = vmul.f32 %v6878_v56, %v3089_v39 }
 0xd78   : > { %v3146_v5 = vmul.f32 %v6882_v31, %v3090_v38 }
 0xd79   : > { %3528 = vst [vmem:[%s6936_s18 + $0x40] sm:$0xff] %v3512_v58  ;;  %v3200_v28 = vadd.f32 %v6880_v35, %v3144_v36  ;;  %v3201_v53 = vadd.f32 %v6880_v35, %v3145_v63  ;;  %v3498_v35 = vpop.f32.mrf.mxu0 }
 0xd7a   : > { %3529 = vst [vmem:[%s6936_s18 + $0x48] sm:$0xff] %v3513_v4  ;;  %v3202_v30 = vadd.f32 %v6892_v45, %v3146_v5 }
 0xd7b   : > { %v3272_v62 = vmul.f32 %v6917_v54, %v3200_v28  ;;  %v3273_v1 = vmul.f32 %v6917_v54, %v3201_v53  ;;  %v3147_v54 = vmul.f32 %v6882_v31, %v3091_v57  ;;  %v7418_v31 = vld [vmem:[#allocation86_spill] sm:$0xff] }
 0xd7c   : > { %v3274_v52 = vmul.f32 %v6894_v16, %v3202_v30  ;;  %v3396_v23 = vpop.permute.xlu1 %3395 }
 0xd7d   : > { %v3336_v0 = vadd.f32 %v6927_v20, %v3272_v62  ;;  %v3337_v56 = vadd.f32 %v6927_v20, %v3273_v1  ;;  %v3203_v40 = vadd.f32 %v6892_v45, %v3147_v54  ;;  %v3460_v10 = vpop.f32.mrf.mxu2 }
 0xd7e   : > { %v3461_v7 = vadd.f32 %v3460_v10, %v3396_v23  ;;  %v3338_v46 = vadd.f32 %v6931_v42, %v3274_v52 }
 0xd7f   : > { %v3514_v50 = vadd.f32 %v3455_v14, %v3336_v0  ;;  %v3515_v22 = vadd.f32 %v3496_v6, %v3337_v56 }
 0xd81   : > { %3530 = vst [vmem:[%s6936_s18 + $0x50] sm:$0xff] %v3514_v50  ;;  %v3501_v11 = vpop.f32.mrf.mxu0 }
 0xd82   : > { %3531 = vst [vmem:[%s6936_s18 + $0x58] sm:$0xff] %v3515_v22 }
 0xd84   : > { %v3076_v49 = vpop.permute.xlu0 %3075 }
 0xd85   : > { %v3092_v43 = vmul.f32 %v3076_v49, %v6637_v55  ;;  %v3093_v20 = vmul.f32 %v3076_v49, %v6640_v2  ;;  %v3275_v55 = vmul.f32 %v6894_v16, %v3203_v40  ;;  %v7419_v2 = vld [vmem:[#allocation81_spill] sm:$0xff] }
 0xd87   : > { %v3148_v19 = vmul.f32 %v6863_v3, %v3092_v43  ;;  %v3149_v27 = vmul.f32 %v6863_v3, %v3093_v20  ;;  %v3502_v3 = vadd.f32 %v3501_v11, %v3396_v23  ;;  %v3339_v47 = vadd.f32 %v6931_v42, %v3275_v55 }
 0xd89   : > { %v3204_v59 = vadd.f32 %v7418_v31, %v3148_v19  ;;  %v3205_v34 = vadd.f32 %v7418_v31, %v3149_v27 }
 0xd8b   : > { %v3276_v25 = vmul.f32 %v7419_v2, %v3204_v59  ;;  %v3277_v45 = vmul.f32 %v7419_v2, %v3205_v34 }
 0xd8c   : > { %v3391_v13 = vpop.permute.xlu0 %3390 }
 0xd8d   : > { %v3340_v41 = vadd.f32 %v7420_v33, %v3276_v25  ;;  %v3341_v16 = vadd.f32 %v7420_v33, %v3277_v45  ;;  %v3458_v12 = vadd.f32 %v3457_v44, %v3391_v13  ;;  %v3499_v37 = vadd.f32 %v3498_v35, %v3391_v13 }
 0xd8f   : > { %v3518_v18 = vadd.f32 %v3461_v7, %v3340_v41  ;;  %v3519_v21 = vadd.f32 %v3502_v3, %v3341_v16  ;;  %v3516_v51 = vadd.f32 %v3458_v12, %v3338_v46  ;;  %v3517_v32 = vadd.f32 %v3499_v37, %v3339_v47 }
 0xd91   : > { %3534 = vst [vmem:[%s6936_s18 + $0x70] sm:$0xff] %v3518_v18 }
 0xd92   : > { %3535 = vst [vmem:[%s6936_s18 + $0x78] sm:$0xff] %v3519_v21 }
 0xd93   : > { %3532 = vst [vmem:[%s6936_s18 + $0x60] sm:$0xff] %v3516_v51 }
 0xd94   : > { %3533 = vst [vmem:[%s6936_s18 + $0x68] sm:$0xff] %v3517_v32 }
 0xd95   : > { %3913 = shalt.err (!%p3910_p8)
}
 0xd96   : > { %s3967_s19 = smov 256  }
 0xd97   : > { %3771 = dma.vmem_to_hbm [thread:$0]  (%p4091_p5), %s3550_s25, 2048, %s3552_s20, %s3537_s28, %s3967_s19, %s3967_s19, %s7218_s30  }
 0xd98 PF: > { %p3783_p9 = scmp.ge.s32.totalorder %s3952_s24, 2  ;;  %s3566_s18 = sand.u32 1, %s3940_s21  }
 0xd99   : > { %s3567_s29 = scalar_lea.sflag [#allocation4], %s3566_s18 }
 0xd9a   : > { %p3778_p10 = pnand %p3783_p9, %p4095_p6 }
 0xd9c   : > { %p3779_p11 = pneg %p3778_p10 }
 0xd9e   : > { %3935 = dma.done.wait (%p3779_p11), %s3567_s29, 2048  }
 0xd9f   : > { %3937 = vsyncadd (%p3779_p11), %s3567_s29, 4294965248  ;;  %s7421_s24 = sld [smem:[#allocation9_spill]]  ;;  %s7424_s21 = smov %s3944_s22 }
 0xda0   : > { %s7422_s26 = sld [smem:[#allocation8_spill]] }
 0xda1   : > { %s7423_s23 = sld [smem:[#allocation10_spill]] }
 0xda5   : > { %p27_p12 = scmp.ge.s32.totalorder %s7421_s24, 4  }
 0xda6   : > { %s7425_s22 = smov %s7422_s26 }
 0xda7   :  { %29 = sbr.rel (!%p27_p12) target bundleno = 9 (0x9), region = 137 }
 0xdac   :  { %3573 = vsyncpa [#allocation3], 1 }
 0xdad   :  { %3575 = vsyncpa [#allocation3 + $0x1], 1 }
 0xdae   :  { %3576 = vsyncpa [#allocation4], 1 }
 0xdaf   :  { %3578 = vsyncpa [#allocation4 + $0x1], 1 }

</bundles_post_ra>
